<compile_context>
chip_gen: v7x
topology: tpu7x:2x2x1
jax: 0.10.0
libtpu: 0.0.40
codegen_flags: <defaults>
</compile_context>

<pallas_src>
import functools
import math

import jax
import jax.numpy as jnp
from jax.experimental import pallas as pl
from jax.experimental.pallas import tpu as pltpu


# ----------------------------- helpers -------------------------------------

def _round_up(x, m):
    return ((x + m - 1) // m) * m


def _layernorm(x, w, b, eps=1e-5):
    """Plain f32 layernorm (used by the pure-JAX reference)."""
    mu = jnp.mean(x, axis=-1, keepdims=True)
    var = jnp.mean((x - mu) ** 2, axis=-1, keepdims=True)
    return (x - mu) * jax.lax.rsqrt(var + eps) * w + b


def _layernorm_padded(x, w, b, d_real, eps=1e-5):
    """Layernorm over a zero-padded last axis.

    `x` is zero beyond column d_real, and `w`/`b` are zero-padded, so the
    statistics (divided by the *real* feature count) are exact and the padded
    output columns are exactly 0.
    """
    inv_d = 1.0 / float(d_real)
    mu = jnp.sum(x, axis=-1, keepdims=True) * inv_d
    ex2 = jnp.sum(x * x, axis=-1, keepdims=True) * inv_d
    var = ex2 - mu * mu
    return (x - mu) * jax.lax.rsqrt(var + eps) * w + b


def _device_kind():
    try:
        return jax.devices()[0].device_kind.lower()
    except Exception:  # noqa: BLE001 - best-effort query only
        return ""


def _pick_batch_tile(B, L, *, target_rows, min_steps):
    """Largest batch tile with tb*L <= target_rows, grid >= min_steps,
    preferring tb*L % 8 == 0 (f32 sublane granularity)."""
    valid = []
    for c in range(1, B + 1):
        if B % c:
            continue
        if c > 1 and c * L > target_rows:
            continue
        if c > 1 and B // c < min_steps:
            continue
        valid.append(c)
    if not valid:
        valid = [1]
    aligned = [c for c in valid if (c * L) % 8 == 0]
    pool = aligned if aligned else valid
    return max(pool)


# ------------------------------ kernel -------------------------------------

def encoder_block_kernel(x_ref,
                         ln1_w_ref, ln1_b_ref,
                         wq_ref, wk_ref, wv_ref, bq_ref, bk_ref, bv_ref,
                         wo_ref, bo_ref,
                         ln2_w_ref, ln2_b_ref,
                         w1_ref, b1_ref, w2_ref, b2_ref,
                         o_ref, *, nhead, hd_pad, d_real):
    tb, L, Dp = x_ref.shape
    Dh = wq_ref.shape[1]          # nhead * hd_pad (lane aligned)
    n = tb * L

    # ---------------- TransformerBlock ----------------
    # NOTE: the PyTorch code overwrites `query` with layernorm(query), so the
    # residual connection is added to the *layernormed* query (intentional).
    x = x_ref[...].reshape(n, Dp)                               # (N, Dp) f32
    q_ln = _layernorm_padded(x, ln1_w_ref[0], ln1_b_ref[0], d_real)
    q_bf = q_ln.astype(jnp.bfloat16)

    # QKV projections: bf16 operands, f32 MXU accumulation. Weights are
    # pre-transposed, per-head zero-padded, and wq/bq carry the 1/sqrt(hd) scale.
    Q = jnp.dot(q_bf, wq_ref[...], preferred_element_type=jnp.float32) + bq_ref[0]
    K = jnp.dot(q_bf, wk_ref[...], preferred_element_type=jnp.float32) + bk_ref[0]
    V = jnp.dot(q_bf, wv_ref[...], preferred_element_type=jnp.float32) + bv_ref[0]

    Q3 = Q.astype(jnp.bfloat16).reshape(tb, L, Dh)
    K3 = K.astype(jnp.bfloat16).reshape(tb, L, Dh)
    V3 = V.astype(jnp.bfloat16).reshape(tb, L, Dh)

    # Per-head attention, batched over the tb batch elements. hd_pad is a
    # multiple of 128 so each slice below is lane-tile aligned (no sub-tile
    # copies), and the head outputs concatenate into a lane-dense (n, Dh)
    # operand for a single full-depth output-projection matmul.
    head_outs = []
    for h in range(nhead):                                      # static unroll
        sl = slice(h * hd_pad, (h + 1) * hd_pad)
        qh, kh, vh = Q3[:, :, sl], K3[:, :, sl], V3[:, :, sl]    # (tb, L, hd_pad)
        s = jnp.einsum('bqd,bkd->bqk', qh, kh,
                       preferred_element_type=jnp.float32)       # (tb, L, L)
        s = s - jnp.max(s, axis=-1, keepdims=True)
        p = jnp.exp(s)
        p = p * pl.reciprocal(jnp.sum(p, axis=-1, keepdims=True), approx=True)
        a = jnp.einsum('bqk,bkd->bqd', p.astype(jnp.bfloat16), vh,
                       preferred_element_type=jnp.float32)       # (tb, L, hd_pad)
        head_outs.append(a.astype(jnp.bfloat16))
    # TODO(synk): for long sequences, tile the KV axis flash-style (online
    # softmax) instead of materializing the full (tb, L, L) score matrix.

    attn = jnp.concatenate(head_outs, axis=-1).reshape(n, Dh)   # lane aligned
    attn = jnp.dot(attn, wo_ref[...],
                   preferred_element_type=jnp.float32) + bo_ref[0]
    # TODO(synk): attn_dropout / res_dropout are identity in eval mode.
    y = q_ln + attn

    # ---------------- FeedForwardBlock ----------------
    # Same pattern: residual is added to the layernormed input.
    z = _layernorm_padded(y, ln2_w_ref[0], ln2_b_ref[0], d_real)
    z_bf = z.astype(jnp.bfloat16)
    h1 = jnp.maximum(
        jnp.dot(z_bf, w1_ref[...], preferred_element_type=jnp.float32) + b1_ref[0],
        0.0)
    ff = jnp.dot(h1.astype(jnp.bfloat16), w2_ref[...],
                 preferred_element_type=jnp.float32) + b2_ref[0]
    # TODO(synk): for large d_model*dim_feedforward, stream w1/w2 over a dff
    # grid axis (or pltpu.emit_pipeline) instead of holding them fully resident.
    o_ref[...] = (z + ff).reshape(tb, L, Dp)


# ------------------------------ wrapper ------------------------------------

def transformer_encoder_block(x_lbd, params, *, nhead):
    """x_lbd: (L, B, D) float32, matching the PyTorch (L, B, d) convention."""
    L, B, D = x_lbd.shape
    dff = params["w1"].shape[0]
    hd = D // nhead
    scale = 1.0 / math.sqrt(hd)

    # Lane-dense padded sizes.
    Dp = _round_up(D, 128)
    hdp = _round_up(hd, 128)
    Dh = nhead * hdp
    dffp = _round_up(dff, 128)

    f32, bf16 = jnp.float32, jnp.bfloat16

    def pad_to(a, shape):
        pads = [(0, t - s) for s, t in zip(a.shape, shape)]
        return jnp.pad(a, pads)

    # Activations: (L, B, D) -> (B, L, Dp), zero padded on the feature axis.
    x = jnp.transpose(x_lbd, (1, 0, 2)).astype(f32)
    x = pad_to(x, (B, L, Dp))

    # Zero-padded layernorm gamma/beta -> padded columns produce exactly 0.
    ln1_w = pad_to(params["ln1_w"].astype(f32), (1, Dp))
    ln1_b = pad_to(params["ln1_b"].astype(f32), (1, Dp))
    ln2_w = pad_to(params["ln2_w"].astype(f32), (1, Dp))
    ln2_b = pad_to(params["ln2_b"].astype(f32), (1, Dp))

    # QKV weights: transpose, fold query scale, pad input rows to Dp and pad
    # each head's output slice to hdp (so per-head slices are lane aligned).
    def qkv_weight(w, s=1.0):
        wt = (w.astype(f32) * s).T.reshape(D, nhead, hd)
        wt = pad_to(wt, (Dp, nhead, hdp))
        return wt.reshape(Dp, Dh).astype(bf16)

    def qkv_bias(b, s=1.0):
        bb = (b.astype(f32) * s).reshape(nhead, hd)
        bb = pad_to(bb, (nhead, hdp))
        return bb.reshape(1, Dh)

    wq_t = qkv_weight(params["wq"], scale)
    wk_t = qkv_weight(params["wk"])
    wv_t = qkv_weight(params["wv"])
    bq = qkv_bias(params["bq"], scale)
    bk = qkv_bias(params["bk"])
    bv = qkv_bias(params["bv"])

    # Output projection: input rows are the head-concat axis -> pad per head.
    wo_t = params["wo"].astype(f32).T.reshape(nhead, hd, D)
    wo_t = pad_to(wo_t, (nhead, hdp, Dp)).reshape(Dh, Dp).astype(bf16)
    bo = pad_to(params["bo"].astype(f32), (1, Dp))

    # FFN weights.
    w1_t = pad_to(params["w1"].astype(f32).T, (Dp, dffp)).astype(bf16)
    b1 = pad_to(params["b1"].astype(f32), (1, dffp))
    w2_t = pad_to(params["w2"].astype(f32).T, (dffp, Dp)).astype(bf16)
    b2 = pad_to(params["b2"].astype(f32), (1, Dp))

    consts = [ln1_w, ln1_b, wq_t, wk_t, wv_t, bq, bk, bv, wo_t, bo,
              ln2_w, ln2_b, w1_t, b1, w2_t, b2]

    kind = _device_kind()
    is_v7 = "v7" in kind
    target_rows = 512 if is_v7 else 1024          # v7x: 64 MiB VMEM per TC
    min_steps = 2 if is_v7 else 1                 # keep both v7x TCs busy
    tb = _pick_batch_tile(B, L, target_rows=target_rows, min_steps=min_steps)
    grid = (B // tb,)

    # VMEM budget: weights (single-buffered) + activations, with headroom,
    # capped per chip generation (v7x has 64 MiB physical VMEM per TC).
    n_rows = tb * L
    weight_bytes = sum(int(a.size) * a.dtype.itemsize for a in consts)
    act_bytes = 4 * n_rows * (6 * Dp + 4 * Dh + 2 * dffp) + 8 * tb * L * L
    need = 2 * weight_bytes + 2 * act_bytes + 4 * n_rows * Dp * 4
    cap = (48 if is_v7 else 100) * 2**20
    vmem_limit = int(min(cap, max(32 * 2**20, need)))

    kern = functools.partial(encoder_block_kernel,
                             nhead=nhead, hd_pad=hdp, d_real=D)

    buf1 = {"pipeline_mode": pl.Buffered(1)} if hasattr(pl, "Buffered") else {}

    def const_spec(a, use_buf1):
        extra = buf1 if use_buf1 else {}
        return pl.BlockSpec(a.shape, lambda b, _nd=a.ndim: (0,) * _nd, **extra)

    def run(use_buf1):
        in_specs = ([pl.BlockSpec((tb, L, Dp), lambda b: (b, 0, 0))]
                    + [const_spec(a, use_buf1) for a in consts])
        return pl.pallas_call(
            kern,
            out_shape=jax.ShapeDtypeStruct((B, L, Dp), jnp.float32),
            grid=grid,
            in_specs=in_specs,
            out_specs=pl.BlockSpec((tb, L, Dp), lambda b: (b, 0, 0)),
            compiler_params=pltpu.CompilerParams(
                dimension_semantics=("parallel",),   # batch tiles independent
                vmem_limit_bytes=vmem_limit),
        )(x, *consts)

    try:
        out = run(True)          # constants single-buffered (preferred)
    except Exception:            # noqa: BLE001
        # TODO(synk): pipeline_mode=pl.Buffered(1) not supported on this jax
        # version; fall back to default (double-buffered) constant specs.
        out = run(False)

    out = out[:, :, :D]                                  # drop feature padding
    return jnp.transpose(out, (1, 0, 2))                 # back to (L, B, D)


# ------------------------- pure-JAX reference -------------------------------

def reference_jax(x_lbd, params, *, nhead):
    """Pure-JAX f32 reference mirroring the PyTorch forward (eval mode)."""
    L, B, D = x_lbd.shape
    hd = D // nhead
    scale = 1.0 / math.sqrt(hd)
    x = jnp.transpose(x_lbd, (1, 0, 2))                  # (B, L, D)

    q_ln = _layernorm(x, params["ln1_w"][0], params["ln1_b"][0])
    Q = q_ln @ params["wq"].T + params["bq"][0]
    K = q_ln @ params["wk"].T + params["bk"][0]
    V = q_ln @ params["wv"].T + params["bv"][0]

    def heads(t):   # (B, L, D) -> (B, H, L, hd)
        return t.reshape(B, L, nhead, hd).transpose(0, 2, 1, 3)

    Qh, Kh, Vh = heads(Q) * scale, heads(K), heads(V)
    s = jnp.einsum("bhqd,bhkd->bhqk", Qh, Kh)
    p = jax.nn.softmax(s, axis=-1)
    attn = jnp.einsum("bhqk,bhkd->bhqd", p, Vh).transpose(0, 2, 1, 3).reshape(B, L, D)
    attn = attn @ params["wo"].T + params["bo"][0]
    y = q_ln + attn

    z = _layernorm(y, params["ln2_w"][0], params["ln2_b"][0])
    h1 = jax.nn.relu(z @ params["w1"].T + params["b1"][0])
    out = z + h1 @ params["w2"].T + params["b2"][0]
    return jnp.transpose(out, (1, 0, 2))


def make_params(key, d_model, nhead, dim_feedforward):
    ks = jax.random.split(key, 12)
    n = lambda k, shape, s=0.1: (s * jax.random.normal(k, shape)).astype(jnp.float32)
    return {
        "ln1_w": 1.0 + n(ks[0], (1, d_model)),
        "ln1_b": n(ks[1], (1, d_model)),
        "wq": n(ks[2], (d_model, d_model)),
        "wk": n(ks[3], (d_model, d_model)),
        "wv": n(ks[4], (d_model, d_model)),
        "bq": n(ks[5], (1, d_model), 0.01),
        "bk": n(ks[6], (1, d_model), 0.01),
        "bv": n(ks[7], (1, d_model), 0.01),
        "wo": n(ks[8], (d_model, d_model)),
        "bo": n(ks[9], (1, d_model), 0.01),
        "ln2_w": 1.0 + n(ks[10], (1, d_model)),
        "ln2_b": n(ks[11], (1, d_model)),
        "w1": n(jax.random.fold_in(key, 100), (dim_feedforward, d_model)),
        "b1": n(jax.random.fold_in(key, 101), (1, dim_feedforward), 0.01),
        "w2": n(jax.random.fold_in(key, 102), (d_model, dim_feedforward)),
        "b2": n(jax.random.fold_in(key, 103), (1, d_model), 0.01),
    }


if __name__ == "__main__":
    L, B, D = 8, 2, 32
    NHEAD, DFF = 4, 64

    key = jax.random.PRNGKey(0)
    kx, kp = jax.random.split(key)
    x = jax.random.normal(kx, (L, B, D), dtype=jnp.float32)   # (L, B, d) like PyTorch
    params = make_params(kp, D, NHEAD, DFF)

    out = transformer_encoder_block(x, params, nhead=NHEAD)
    out = jax.block_until_ready(out)

    ref = reference_jax(x, params, nhead=NHEAD)
    assert out.shape == (L, B, D)
    # bf16 matmul operands + approx reciprocal => slightly looser tolerance.
    assert jnp.allclose(out, ref, atol=3e-2, rtol=3e-2), "mismatch vs JAX reference"

    print("KERNEL_OK")
</pallas_src>

<mosaic_0001>
module attributes {stable_mosaic.version = 11 : i64} {
  func.func @encoder_block_kernel(%arg0: i32, %arg1: memref<2x8x128xf32, #tpu.memory_space<vmem>>, %arg2: memref<1x128xf32, #tpu.memory_space<vmem>>, %arg3: memref<1x128xf32, #tpu.memory_space<vmem>>, %arg4: memref<128x512xbf16, #tpu.memory_space<vmem>>, %arg5: memref<128x512xbf16, #tpu.memory_space<vmem>>, %arg6: memref<128x512xbf16, #tpu.memory_space<vmem>>, %arg7: memref<1x512xf32, #tpu.memory_space<vmem>>, %arg8: memref<1x512xf32, #tpu.memory_space<vmem>>, %arg9: memref<1x512xf32, #tpu.memory_space<vmem>>, %arg10: memref<512x128xbf16, #tpu.memory_space<vmem>>, %arg11: memref<1x128xf32, #tpu.memory_space<vmem>>, %arg12: memref<1x128xf32, #tpu.memory_space<vmem>>, %arg13: memref<1x128xf32, #tpu.memory_space<vmem>>, %arg14: memref<128x128xbf16, #tpu.memory_space<vmem>>, %arg15: memref<1x128xf32, #tpu.memory_space<vmem>>, %arg16: memref<128x128xbf16, #tpu.memory_space<vmem>>, %arg17: memref<1x128xf32, #tpu.memory_space<vmem>>, %arg18: memref<2x8x128xf32, #tpu.memory_space<vmem>>) attributes {dimension_semantics = [#tpu.dimension_semantics<parallel>], iteration_bounds = array<i64: 1>, scalar_prefetch = 0 : i64, scratch_operands = 0 : i64, tpu.core_type = #tpu.core_type<tc>, window_params = [{transform_indices = @transform_0, window_bounds = array<i64: 2, 8, 128>}, {pipeline_mode = #tpu.pipeline_mode<synchronous>, transform_indices = @transform_1, window_bounds = array<i64: 1, 128>}, {pipeline_mode = #tpu.pipeline_mode<synchronous>, transform_indices = @transform_2, window_bounds = array<i64: 1, 128>}, {pipeline_mode = #tpu.pipeline_mode<synchronous>, transform_indices = @transform_3, window_bounds = array<i64: 128, 512>}, {pipeline_mode = #tpu.pipeline_mode<synchronous>, transform_indices = @transform_4, window_bounds = array<i64: 128, 512>}, {pipeline_mode = #tpu.pipeline_mode<synchronous>, transform_indices = @transform_5, window_bounds = array<i64: 128, 512>}, {pipeline_mode = #tpu.pipeline_mode<synchronous>, transform_indices = @transform_6, window_bounds = array<i64: 1, 512>}, {pipeline_mode = #tpu.pipeline_mode<synchronous>, transform_indices = @transform_7, window_bounds = array<i64: 1, 512>}, {pipeline_mode = #tpu.pipeline_mode<synchronous>, transform_indices = @transform_8, window_bounds = array<i64: 1, 512>}, {pipeline_mode = #tpu.pipeline_mode<synchronous>, transform_indices = @transform_9, window_bounds = array<i64: 512, 128>}, {pipeline_mode = #tpu.pipeline_mode<synchronous>, transform_indices = @transform_10, window_bounds = array<i64: 1, 128>}, {pipeline_mode = #tpu.pipeline_mode<synchronous>, transform_indices = @transform_11, window_bounds = array<i64: 1, 128>}, {pipeline_mode = #tpu.pipeline_mode<synchronous>, transform_indices = @transform_12, window_bounds = array<i64: 1, 128>}, {pipeline_mode = #tpu.pipeline_mode<synchronous>, transform_indices = @transform_13, window_bounds = array<i64: 128, 128>}, {pipeline_mode = #tpu.pipeline_mode<synchronous>, transform_indices = @transform_14, window_bounds = array<i64: 1, 128>}, {pipeline_mode = #tpu.pipeline_mode<synchronous>, transform_indices = @transform_15, window_bounds = array<i64: 128, 128>}, {pipeline_mode = #tpu.pipeline_mode<synchronous>, transform_indices = @transform_16, window_bounds = array<i64: 1, 128>}, {transform_indices = @transform_17, window_bounds = array<i64: 2, 8, 128>}]} {
    %c0 = arith.constant 0 : index
    %c0_0 = arith.constant 0 : index
    %c0_1 = arith.constant 0 : index
    %0 = vector.load %arg1[%c0, %c0_0, %c0_1] : memref<2x8x128xf32, #tpu.memory_space<vmem>>, vector<2x8x128xf32>
    %1 = vector.shape_cast %0 : vector<2x8x128xf32> to vector<16x128xf32>
    %c0_2 = arith.constant 0 : index
    %c0_3 = arith.constant 0 : index
    %2 = vector.load %arg2[%c0_2, %c0_3] : memref<1x128xf32, #tpu.memory_space<vmem>>, vector<1x128xf32>
    %3 = vector.shape_cast %2 : vector<1x128xf32> to vector<128xf32>
    %c0_4 = arith.constant 0 : index
    %c0_5 = arith.constant 0 : index
    %4 = vector.load %arg3[%c0_4, %c0_5] : memref<1x128xf32, #tpu.memory_space<vmem>>, vector<1x128xf32>
    %5 = vector.shape_cast %4 : vector<1x128xf32> to vector<128xf32>
    %cst = arith.constant dense<0.000000e+00> : vector<16xf32>
    %6 = vector.multi_reduction <add>, %1, %cst [1] : vector<16x128xf32> to vector<16xf32>
    %7 = vector.shape_cast %6 : vector<16xf32> to vector<16x1xf32>
    %cst_6 = arith.constant 3.125000e-02 : f32
    %8 = vector.broadcast %cst_6 : f32 to vector<16x1xf32>
    %9 = arith.mulf %7, %8 : vector<16x1xf32>
    %10 = arith.mulf %1, %1 : vector<16x128xf32>
    %cst_7 = arith.constant dense<0.000000e+00> : vector<16xf32>
    %11 = vector.multi_reduction <add>, %10, %cst_7 [1] : vector<16x128xf32> to vector<16xf32>
    %12 = vector.shape_cast %11 : vector<16xf32> to vector<16x1xf32>
    %cst_8 = arith.constant 3.125000e-02 : f32
    %13 = vector.broadcast %cst_8 : f32 to vector<16x1xf32>
    %14 = arith.mulf %12, %13 : vector<16x1xf32>
    %15 = arith.mulf %9, %9 : vector<16x1xf32>
    %16 = arith.subf %14, %15 : vector<16x1xf32>
    %17 = vector.broadcast %9 : vector<16x1xf32> to vector<16x128xf32>
    %18 = arith.subf %1, %17 : vector<16x128xf32>
    %cst_9 = arith.constant 9.99999974E-6 : f32
    %19 = vector.broadcast %cst_9 : f32 to vector<16x1xf32>
    %20 = arith.addf %16, %19 : vector<16x1xf32>
    %21 = math.rsqrt %20 : vector<16x1xf32>
    %22 = vector.broadcast %21 : vector<16x1xf32> to vector<16x128xf32>
    %23 = arith.mulf %18, %22 : vector<16x128xf32>
    %24 = vector.shape_cast %3 : vector<128xf32> to vector<1x128xf32>
    %25 = vector.broadcast %24 : vector<1x128xf32> to vector<16x128xf32>
    %26 = arith.mulf %23, %25 : vector<16x128xf32>
    %27 = vector.shape_cast %5 : vector<128xf32> to vector<1x128xf32>
    %28 = vector.broadcast %27 : vector<1x128xf32> to vector<16x128xf32>
    %29 = arith.addf %26, %28 : vector<16x128xf32>
    %30 = arith.truncf %29 : vector<16x128xf32> to vector<16x128xbf16>
    %c0_10 = arith.constant 0 : index
    %c0_11 = arith.constant 0 : index
    %31 = vector.load %arg4[%c0_10, %c0_11] : memref<128x512xbf16, #tpu.memory_space<vmem>>, vector<128x512xbf16>
    %cst_12 = arith.constant dense<0.000000e+00> : vector<16x512xf32>
    %32 = tpu.matmul %30, %31, %cst_12 {dimension_numbers = #tpu.dot_dimension_numbers<[1], [0], [0], [1], [0, 0, 1, 1], [], []>} : vector<16x128xbf16>, vector<128x512xbf16>, vector<16x512xf32> -> vector<16x512xf32>
    %c0_13 = arith.constant 0 : index
    %c0_14 = arith.constant 0 : index
    %33 = vector.load %arg7[%c0_13, %c0_14] : memref<1x512xf32, #tpu.memory_space<vmem>>, vector<1x512xf32>
    %34 = vector.shape_cast %33 : vector<1x512xf32> to vector<512xf32>
    %35 = vector.shape_cast %34 : vector<512xf32> to vector<1x512xf32>
    %36 = vector.broadcast %35 : vector<1x512xf32> to vector<16x512xf32>
    %37 = arith.addf %32, %36 : vector<16x512xf32>
    %c0_15 = arith.constant 0 : index
    %c0_16 = arith.constant 0 : index
    %38 = vector.load %arg5[%c0_15, %c0_16] : memref<128x512xbf16, #tpu.memory_space<vmem>>, vector<128x512xbf16>
    %cst_17 = arith.constant dense<0.000000e+00> : vector<16x512xf32>
    %39 = tpu.matmul %30, %38, %cst_17 {dimension_numbers = #tpu.dot_dimension_numbers<[1], [0], [0], [1], [0, 0, 1, 1], [], []>} : vector<16x128xbf16>, vector<128x512xbf16>, vector<16x512xf32> -> vector<16x512xf32>
    %c0_18 = arith.constant 0 : index
    %c0_19 = arith.constant 0 : index
    %40 = vector.load %arg8[%c0_18, %c0_19] : memref<1x512xf32, #tpu.memory_space<vmem>>, vector<1x512xf32>
    %41 = vector.shape_cast %40 : vector<1x512xf32> to vector<512xf32>
    %42 = vector.shape_cast %41 : vector<512xf32> to vector<1x512xf32>
    %43 = vector.broadcast %42 : vector<1x512xf32> to vector<16x512xf32>
    %44 = arith.addf %39, %43 : vector<16x512xf32>
    %c0_20 = arith.constant 0 : index
    %c0_21 = arith.constant 0 : index
    %45 = vector.load %arg6[%c0_20, %c0_21] : memref<128x512xbf16, #tpu.memory_space<vmem>>, vector<128x512xbf16>
    %cst_22 = arith.constant dense<0.000000e+00> : vector<16x512xf32>
    %46 = tpu.matmul %30, %45, %cst_22 {dimension_numbers = #tpu.dot_dimension_numbers<[1], [0], [0], [1], [0, 0, 1, 1], [], []>} : vector<16x128xbf16>, vector<128x512xbf16>, vector<16x512xf32> -> vector<16x512xf32>
    %c0_23 = arith.constant 0 : index
    %c0_24 = arith.constant 0 : index
    %47 = vector.load %arg9[%c0_23, %c0_24] : memref<1x512xf32, #tpu.memory_space<vmem>>, vector<1x512xf32>
    %48 = vector.shape_cast %47 : vector<1x512xf32> to vector<512xf32>
    %49 = vector.shape_cast %48 : vector<512xf32> to vector<1x512xf32>
    %50 = vector.broadcast %49 : vector<1x512xf32> to vector<16x512xf32>
    %51 = arith.addf %46, %50 : vector<16x512xf32>
    %52 = arith.truncf %37 : vector<16x512xf32> to vector<16x512xbf16>
    %53 = vector.shape_cast %52 : vector<16x512xbf16> to vector<2x8x512xbf16>
    %54 = arith.truncf %44 : vector<16x512xf32> to vector<16x512xbf16>
    %55 = vector.shape_cast %54 : vector<16x512xbf16> to vector<2x8x512xbf16>
    %56 = arith.truncf %51 : vector<16x512xf32> to vector<16x512xbf16>
    %57 = vector.shape_cast %56 : vector<16x512xbf16> to vector<2x8x512xbf16>
    %58 = vector.extract_strided_slice %53 {offsets = [0, 0, 0], sizes = [2, 8, 128], strides = [1, 1, 1]} : vector<2x8x512xbf16> to vector<2x8x128xbf16>
    %59 = vector.extract_strided_slice %55 {offsets = [0, 0, 0], sizes = [2, 8, 128], strides = [1, 1, 1]} : vector<2x8x512xbf16> to vector<2x8x128xbf16>
    %60 = vector.extract_strided_slice %57 {offsets = [0, 0, 0], sizes = [2, 8, 128], strides = [1, 1, 1]} : vector<2x8x512xbf16> to vector<2x8x128xbf16>
    "tpu.trace_start"() <{level = 10 : i32, message = "bqd,bkd->bqk"}> : () -> ()
    %cst_25 = arith.constant dense<0.000000e+00> : vector<2x8x8xf32>
    %61 = tpu.matmul %58, %59, %cst_25 {dimension_numbers = #tpu.dot_dimension_numbers<[2], [2], [1], [1], [0, 0, 0, 1, 1, 1], [0], [0]>} : vector<2x8x128xbf16>, vector<2x8x128xbf16>, vector<2x8x8xf32> -> vector<2x8x8xf32>
    "tpu.trace_stop"() : () -> ()
    %cst_26 = arith.constant dense<0xFF800000> : vector<2x8xf32>
    %62 = vector.multi_reduction <maximumf>, %61, %cst_26 [2] : vector<2x8x8xf32> to vector<2x8xf32>
    %63 = vector.shape_cast %62 : vector<2x8xf32> to vector<2x8x1xf32>
    %64 = vector.broadcast %63 : vector<2x8x1xf32> to vector<2x8x8xf32>
    %65 = arith.subf %61, %64 : vector<2x8x8xf32>
    %66 = math.exp %65 : vector<2x8x8xf32>
    %cst_27 = arith.constant dense<0.000000e+00> : vector<2x8xf32>
    %67 = vector.multi_reduction <add>, %66, %cst_27 [2] : vector<2x8x8xf32> to vector<2x8xf32>
    %68 = vector.shape_cast %67 : vector<2x8xf32> to vector<2x8x1xf32>
    %69 = tpu.reciprocal %68 {approx = true} : vector<2x8x1xf32> -> vector<2x8x1xf32>
    %70 = vector.broadcast %69 : vector<2x8x1xf32> to vector<2x8x8xf32>
    %71 = arith.mulf %66, %70 : vector<2x8x8xf32>
    %72 = arith.truncf %71 : vector<2x8x8xf32> to vector<2x8x8xbf16>
    "tpu.trace_start"() <{level = 10 : i32, message = "bqk,bkd->bqd"}> : () -> ()
    %cst_28 = arith.constant dense<0.000000e+00> : vector<2x8x128xf32>
    %73 = tpu.matmul %72, %60, %cst_28 {dimension_numbers = #tpu.dot_dimension_numbers<[2], [1], [1], [2], [0, 0, 0, 1, 1, 2], [0], [0]>} : vector<2x8x8xbf16>, vector<2x8x128xbf16>, vector<2x8x128xf32> -> vector<2x8x128xf32>
    "tpu.trace_stop"() : () -> ()
    %74 = arith.truncf %73 : vector<2x8x128xf32> to vector<2x8x128xbf16>
    %75 = vector.extract_strided_slice %53 {offsets = [0, 0, 128], sizes = [2, 8, 128], strides = [1, 1, 1]} : vector<2x8x512xbf16> to vector<2x8x128xbf16>
    %76 = vector.extract_strided_slice %55 {offsets = [0, 0, 128], sizes = [2, 8, 128], strides = [1, 1, 1]} : vector<2x8x512xbf16> to vector<2x8x128xbf16>
    %77 = vector.extract_strided_slice %57 {offsets = [0, 0, 128], sizes = [2, 8, 128], strides = [1, 1, 1]} : vector<2x8x512xbf16> to vector<2x8x128xbf16>
    "tpu.trace_start"() <{level = 10 : i32, message = "bqd,bkd->bqk"}> : () -> ()
    %cst_29 = arith.constant dense<0.000000e+00> : vector<2x8x8xf32>
    %78 = tpu.matmul %75, %76, %cst_29 {dimension_numbers = #tpu.dot_dimension_numbers<[2], [2], [1], [1], [0, 0, 0, 1, 1, 1], [0], [0]>} : vector<2x8x128xbf16>, vector<2x8x128xbf16>, vector<2x8x8xf32> -> vector<2x8x8xf32>
    "tpu.trace_stop"() : () -> ()
    %cst_30 = arith.constant dense<0xFF800000> : vector<2x8xf32>
    %79 = vector.multi_reduction <maximumf>, %78, %cst_30 [2] : vector<2x8x8xf32> to vector<2x8xf32>
    %80 = vector.shape_cast %79 : vector<2x8xf32> to vector<2x8x1xf32>
    %81 = vector.broadcast %80 : vector<2x8x1xf32> to vector<2x8x8xf32>
    %82 = arith.subf %78, %81 : vector<2x8x8xf32>
    %83 = math.exp %82 : vector<2x8x8xf32>
    %cst_31 = arith.constant dense<0.000000e+00> : vector<2x8xf32>
    %84 = vector.multi_reduction <add>, %83, %cst_31 [2] : vector<2x8x8xf32> to vector<2x8xf32>
    %85 = vector.shape_cast %84 : vector<2x8xf32> to vector<2x8x1xf32>
    %86 = tpu.reciprocal %85 {approx = true} : vector<2x8x1xf32> -> vector<2x8x1xf32>
    %87 = vector.broadcast %86 : vector<2x8x1xf32> to vector<2x8x8xf32>
    %88 = arith.mulf %83, %87 : vector<2x8x8xf32>
    %89 = arith.truncf %88 : vector<2x8x8xf32> to vector<2x8x8xbf16>
    "tpu.trace_start"() <{level = 10 : i32, message = "bqk,bkd->bqd"}> : () -> ()
    %cst_32 = arith.constant dense<0.000000e+00> : vector<2x8x128xf32>
    %90 = tpu.matmul %89, %77, %cst_32 {dimension_numbers = #tpu.dot_dimension_numbers<[2], [1], [1], [2], [0, 0, 0, 1, 1, 2], [0], [0]>} : vector<2x8x8xbf16>, vector<2x8x128xbf16>, vector<2x8x128xf32> -> vector<2x8x128xf32>
    "tpu.trace_stop"() : () -> ()
    %91 = arith.truncf %90 : vector<2x8x128xf32> to vector<2x8x128xbf16>
    %92 = vector.extract_strided_slice %53 {offsets = [0, 0, 256], sizes = [2, 8, 128], strides = [1, 1, 1]} : vector<2x8x512xbf16> to vector<2x8x128xbf16>
    %93 = vector.extract_strided_slice %55 {offsets = [0, 0, 256], sizes = [2, 8, 128], strides = [1, 1, 1]} : vector<2x8x512xbf16> to vector<2x8x128xbf16>
    %94 = vector.extract_strided_slice %57 {offsets = [0, 0, 256], sizes = [2, 8, 128], strides = [1, 1, 1]} : vector<2x8x512xbf16> to vector<2x8x128xbf16>
    "tpu.trace_start"() <{level = 10 : i32, message = "bqd,bkd->bqk"}> : () -> ()
    %cst_33 = arith.constant dense<0.000000e+00> : vector<2x8x8xf32>
    %95 = tpu.matmul %92, %93, %cst_33 {dimension_numbers = #tpu.dot_dimension_numbers<[2], [2], [1], [1], [0, 0, 0, 1, 1, 1], [0], [0]>} : vector<2x8x128xbf16>, vector<2x8x128xbf16>, vector<2x8x8xf32> -> vector<2x8x8xf32>
    "tpu.trace_stop"() : () -> ()
    %cst_34 = arith.constant dense<0xFF800000> : vector<2x8xf32>
    %96 = vector.multi_reduction <maximumf>, %95, %cst_34 [2] : vector<2x8x8xf32> to vector<2x8xf32>
    %97 = vector.shape_cast %96 : vector<2x8xf32> to vector<2x8x1xf32>
    %98 = vector.broadcast %97 : vector<2x8x1xf32> to vector<2x8x8xf32>
    %99 = arith.subf %95, %98 : vector<2x8x8xf32>
    %100 = math.exp %99 : vector<2x8x8xf32>
    %cst_35 = arith.constant dense<0.000000e+00> : vector<2x8xf32>
    %101 = vector.multi_reduction <add>, %100, %cst_35 [2] : vector<2x8x8xf32> to vector<2x8xf32>
    %102 = vector.shape_cast %101 : vector<2x8xf32> to vector<2x8x1xf32>
    %103 = tpu.reciprocal %102 {approx = true} : vector<2x8x1xf32> -> vector<2x8x1xf32>
    %104 = vector.broadcast %103 : vector<2x8x1xf32> to vector<2x8x8xf32>
    %105 = arith.mulf %100, %104 : vector<2x8x8xf32>
    %106 = arith.truncf %105 : vector<2x8x8xf32> to vector<2x8x8xbf16>
    "tpu.trace_start"() <{level = 10 : i32, message = "bqk,bkd->bqd"}> : () -> ()
    %cst_36 = arith.constant dense<0.000000e+00> : vector<2x8x128xf32>
    %107 = tpu.matmul %106, %94, %cst_36 {dimension_numbers = #tpu.dot_dimension_numbers<[2], [1], [1], [2], [0, 0, 0, 1, 1, 2], [0], [0]>} : vector<2x8x8xbf16>, vector<2x8x128xbf16>, vector<2x8x128xf32> -> vector<2x8x128xf32>
    "tpu.trace_stop"() : () -> ()
    %108 = arith.truncf %107 : vector<2x8x128xf32> to vector<2x8x128xbf16>
    %109 = vector.extract_strided_slice %53 {offsets = [0, 0, 384], sizes = [2, 8, 128], strides = [1, 1, 1]} : vector<2x8x512xbf16> to vector<2x8x128xbf16>
    %110 = vector.extract_strided_slice %55 {offsets = [0, 0, 384], sizes = [2, 8, 128], strides = [1, 1, 1]} : vector<2x8x512xbf16> to vector<2x8x128xbf16>
    %111 = vector.extract_strided_slice %57 {offsets = [0, 0, 384], sizes = [2, 8, 128], strides = [1, 1, 1]} : vector<2x8x512xbf16> to vector<2x8x128xbf16>
    "tpu.trace_start"() <{level = 10 : i32, message = "bqd,bkd->bqk"}> : () -> ()
    %cst_37 = arith.constant dense<0.000000e+00> : vector<2x8x8xf32>
    %112 = tpu.matmul %109, %110, %cst_37 {dimension_numbers = #tpu.dot_dimension_numbers<[2], [2], [1], [1], [0, 0, 0, 1, 1, 1], [0], [0]>} : vector<2x8x128xbf16>, vector<2x8x128xbf16>, vector<2x8x8xf32> -> vector<2x8x8xf32>
    "tpu.trace_stop"() : () -> ()
    %cst_38 = arith.constant dense<0xFF800000> : vector<2x8xf32>
    %113 = vector.multi_reduction <maximumf>, %112, %cst_38 [2] : vector<2x8x8xf32> to vector<2x8xf32>
    %114 = vector.shape_cast %113 : vector<2x8xf32> to vector<2x8x1xf32>
    %115 = vector.broadcast %114 : vector<2x8x1xf32> to vector<2x8x8xf32>
    %116 = arith.subf %112, %115 : vector<2x8x8xf32>
    %117 = math.exp %116 : vector<2x8x8xf32>
    %cst_39 = arith.constant dense<0.000000e+00> : vector<2x8xf32>
    %118 = vector.multi_reduction <add>, %117, %cst_39 [2] : vector<2x8x8xf32> to vector<2x8xf32>
    %119 = vector.shape_cast %118 : vector<2x8xf32> to vector<2x8x1xf32>
    %120 = tpu.reciprocal %119 {approx = true} : vector<2x8x1xf32> -> vector<2x8x1xf32>
    %121 = vector.broadcast %120 : vector<2x8x1xf32> to vector<2x8x8xf32>
    %122 = arith.mulf %117, %121 : vector<2x8x8xf32>
    %123 = arith.truncf %122 : vector<2x8x8xf32> to vector<2x8x8xbf16>
    "tpu.trace_start"() <{level = 10 : i32, message = "bqk,bkd->bqd"}> : () -> ()
    %cst_40 = arith.constant dense<0.000000e+00> : vector<2x8x128xf32>
    %124 = tpu.matmul %123, %111, %cst_40 {dimension_numbers = #tpu.dot_dimension_numbers<[2], [1], [1], [2], [0, 0, 0, 1, 1, 2], [0], [0]>} : vector<2x8x8xbf16>, vector<2x8x128xbf16>, vector<2x8x128xf32> -> vector<2x8x128xf32>
    "tpu.trace_stop"() : () -> ()
    %125 = arith.truncf %124 : vector<2x8x128xf32> to vector<2x8x128xbf16>
    %126 = tpu.concatenate %74, %91, %108, %125 in 2 : vector<2x8x128xbf16>, vector<2x8x128xbf16>, vector<2x8x128xbf16>, vector<2x8x128xbf16> -> vector<2x8x512xbf16>
    %127 = vector.shape_cast %126 : vector<2x8x512xbf16> to vector<16x512xbf16>
    %c0_41 = arith.constant 0 : index
    %c0_42 = arith.constant 0 : index
    %128 = vector.load %arg10[%c0_41, %c0_42] : memref<512x128xbf16, #tpu.memory_space<vmem>>, vector<512x128xbf16>
    %cst_43 = arith.constant dense<0.000000e+00> : vector<16x128xf32>
    %129 = tpu.matmul %127, %128, %cst_43 {dimension_numbers = #tpu.dot_dimension_numbers<[1], [0], [0], [1], [0, 0, 1, 1], [], []>} : vector<16x512xbf16>, vector<512x128xbf16>, vector<16x128xf32> -> vector<16x128xf32>
    %c0_44 = arith.constant 0 : index
    %c0_45 = arith.constant 0 : index
    %130 = vector.load %arg11[%c0_44, %c0_45] : memref<1x128xf32, #tpu.memory_space<vmem>>, vector<1x128xf32>
    %131 = vector.shape_cast %130 : vector<1x128xf32> to vector<128xf32>
    %132 = vector.shape_cast %131 : vector<128xf32> to vector<1x128xf32>
    %133 = vector.broadcast %132 : vector<1x128xf32> to vector<16x128xf32>
    %134 = arith.addf %129, %133 : vector<16x128xf32>
    %135 = arith.addf %29, %134 : vector<16x128xf32>
    %c0_46 = arith.constant 0 : index
    %c0_47 = arith.constant 0 : index
    %136 = vector.load %arg12[%c0_46, %c0_47] : memref<1x128xf32, #tpu.memory_space<vmem>>, vector<1x128xf32>
    %137 = vector.shape_cast %136 : vector<1x128xf32> to vector<128xf32>
    %c0_48 = arith.constant 0 : index
    %c0_49 = arith.constant 0 : index
    %138 = vector.load %arg13[%c0_48, %c0_49] : memref<1x128xf32, #tpu.memory_space<vmem>>, vector<1x128xf32>
    %139 = vector.shape_cast %138 : vector<1x128xf32> to vector<128xf32>
    %cst_50 = arith.constant dense<0.000000e+00> : vector<16xf32>
    %140 = vector.multi_reduction <add>, %135, %cst_50 [1] : vector<16x128xf32> to vector<16xf32>
    %141 = vector.shape_cast %140 : vector<16xf32> to vector<16x1xf32>
    %cst_51 = arith.constant 3.125000e-02 : f32
    %142 = vector.broadcast %cst_51 : f32 to vector<16x1xf32>
    %143 = arith.mulf %141, %142 : vector<16x1xf32>
    %144 = arith.mulf %135, %135 : vector<16x128xf32>
    %cst_52 = arith.constant dense<0.000000e+00> : vector<16xf32>
    %145 = vector.multi_reduction <add>, %144, %cst_52 [1] : vector<16x128xf32> to vector<16xf32>
    %146 = vector.shape_cast %145 : vector<16xf32> to vector<16x1xf32>
    %cst_53 = arith.constant 3.125000e-02 : f32
    %147 = vector.broadcast %cst_53 : f32 to vector<16x1xf32>
    %148 = arith.mulf %146, %147 : vector<16x1xf32>
    %149 = arith.mulf %143, %143 : vector<16x1xf32>
    %150 = arith.subf %148, %149 : vector<16x1xf32>
    %151 = vector.broadcast %143 : vector<16x1xf32> to vector<16x128xf32>
    %152 = arith.subf %135, %151 : vector<16x128xf32>
    %cst_54 = arith.constant 9.99999974E-6 : f32
    %153 = vector.broadcast %cst_54 : f32 to vector<16x1xf32>
    %154 = arith.addf %150, %153 : vector<16x1xf32>
    %155 = math.rsqrt %154 : vector<16x1xf32>
    %156 = vector.broadcast %155 : vector<16x1xf32> to vector<16x128xf32>
    %157 = arith.mulf %152, %156 : vector<16x128xf32>
    %158 = vector.shape_cast %137 : vector<128xf32> to vector<1x128xf32>
    %159 = vector.broadcast %158 : vector<1x128xf32> to vector<16x128xf32>
    %160 = arith.mulf %157, %159 : vector<16x128xf32>
    %161 = vector.shape_cast %139 : vector<128xf32> to vector<1x128xf32>
    %162 = vector.broadcast %161 : vector<1x128xf32> to vector<16x128xf32>
    %163 = arith.addf %160, %162 : vector<16x128xf32>
    %164 = arith.truncf %163 : vector<16x128xf32> to vector<16x128xbf16>
    %c0_55 = arith.constant 0 : index
    %c0_56 = arith.constant 0 : index
    %165 = vector.load %arg14[%c0_55, %c0_56] : memref<128x128xbf16, #tpu.memory_space<vmem>>, vector<128x128xbf16>
    %cst_57 = arith.constant dense<0.000000e+00> : vector<16x128xf32>
    %166 = tpu.matmul %164, %165, %cst_57 {dimension_numbers = #tpu.dot_dimension_numbers<[1], [0], [0], [1], [0, 0, 1, 1], [], []>} : vector<16x128xbf16>, vector<128x128xbf16>, vector<16x128xf32> -> vector<16x128xf32>
    %c0_58 = arith.constant 0 : index
    %c0_59 = arith.constant 0 : index
    %167 = vector.load %arg15[%c0_58, %c0_59] : memref<1x128xf32, #tpu.memory_space<vmem>>, vector<1x128xf32>
    %168 = vector.shape_cast %167 : vector<1x128xf32> to vector<128xf32>
    %169 = vector.shape_cast %168 : vector<128xf32> to vector<1x128xf32>
    %170 = vector.broadcast %169 : vector<1x128xf32> to vector<16x128xf32>
    %171 = arith.addf %166, %170 : vector<16x128xf32>
    %cst_60 = arith.constant 0.000000e+00 : f32
    %172 = vector.broadcast %cst_60 : f32 to vector<16x128xf32>
    %173 = arith.maximumf %171, %172 : vector<16x128xf32>
    %174 = arith.truncf %173 : vector<16x128xf32> to vector<16x128xbf16>
    %c0_61 = arith.constant 0 : index
    %c0_62 = arith.constant 0 : index
    %175 = vector.load %arg16[%c0_61, %c0_62] : memref<128x128xbf16, #tpu.memory_space<vmem>>, vector<128x128xbf16>
    %cst_63 = arith.constant dense<0.000000e+00> : vector<16x128xf32>
    %176 = tpu.matmul %174, %175, %cst_63 {dimension_numbers = #tpu.dot_dimension_numbers<[1], [0], [0], [1], [0, 0, 1, 1], [], []>} : vector<16x128xbf16>, vector<128x128xbf16>, vector<16x128xf32> -> vector<16x128xf32>
    %c0_64 = arith.constant 0 : index
    %c0_65 = arith.constant 0 : index
    %177 = vector.load %arg17[%c0_64, %c0_65] : memref<1x128xf32, #tpu.memory_space<vmem>>, vector<1x128xf32>
    %178 = vector.shape_cast %177 : vector<1x128xf32> to vector<128xf32>
    %179 = vector.shape_cast %178 : vector<128xf32> to vector<1x128xf32>
    %180 = vector.broadcast %179 : vector<1x128xf32> to vector<16x128xf32>
    %181 = arith.addf %176, %180 : vector<16x128xf32>
    %182 = arith.addf %163, %181 : vector<16x128xf32>
    %183 = vector.shape_cast %182 : vector<16x128xf32> to vector<2x8x128xf32>
    %c0_66 = arith.constant 0 : index
    %c0_67 = arith.constant 0 : index
    %c0_68 = arith.constant 0 : index
    %184 = vector.load %arg18[%c0_66, %c0_67, %c0_68] : memref<2x8x128xf32, #tpu.memory_space<vmem>>, vector<2x8x128xf32>
    tpu.vector_store %arg18[%c0_66, %c0_67, %c0_68], %183 {strides = array<i32>} : memref<2x8x128xf32, #tpu.memory_space<vmem>>, vector<2x8x128xf32>,
    return
  }
  func.func @transform_0(%arg0: i32) -> (i32, i32, i32) {
    %c0_i32 = arith.constant 0 : i32
    %c0_i32_0 = arith.constant 0 : i32
    %c0_i32_1 = arith.constant 0 : i32
    return %arg0, %c0_i32, %c0_i32_0 : i32, i32, i32
  }
  func.func @transform_1(%arg0: i32) -> (i32, i32) {
    %c0_i32 = arith.constant 0 : i32
    %c0_i32_0 = arith.constant 0 : i32
    %c0_i32_1 = arith.constant 0 : i32
    return %c0_i32, %c0_i32_0 : i32, i32
  }
  func.func @transform_2(%arg0: i32) -> (i32, i32) {
    %c0_i32 = arith.constant 0 : i32
    %c0_i32_0 = arith.constant 0 : i32
    %c0_i32_1 = arith.constant 0 : i32
    return %c0_i32, %c0_i32_0 : i32, i32
  }
  func.func @transform_3(%arg0: i32) -> (i32, i32) {
    %c0_i32 = arith.constant 0 : i32
    %c0_i32_0 = arith.constant 0 : i32
    %c0_i32_1 = arith.constant 0 : i32
    return %c0_i32, %c0_i32_0 : i32, i32
  }
  func.func @transform_4(%arg0: i32) -> (i32, i32) {
    %c0_i32 = arith.constant 0 : i32
    %c0_i32_0 = arith.constant 0 : i32
    %c0_i32_1 = arith.constant 0 : i32
    return %c0_i32, %c0_i32_0 : i32, i32
  }
  func.func @transform_5(%arg0: i32) -> (i32, i32) {
    %c0_i32 = arith.constant 0 : i32
    %c0_i32_0 = arith.constant 0 : i32
    %c0_i32_1 = arith.constant 0 : i32
    return %c0_i32, %c0_i32_0 : i32, i32
  }
  func.func @transform_6(%arg0: i32) -> (i32, i32) {
    %c0_i32 = arith.constant 0 : i32
    %c0_i32_0 = arith.constant 0 : i32
    %c0_i32_1 = arith.constant 0 : i32
    return %c0_i32, %c0_i32_0 : i32, i32
  }
  func.func @transform_7(%arg0: i32) -> (i32, i32) {
    %c0_i32 = arith.constant 0 : i32
    %c0_i32_0 = arith.constant 0 : i32
    %c0_i32_1 = arith.constant 0 : i32
    return %c0_i32, %c0_i32_0 : i32, i32
  }
  func.func @transform_8(%arg0: i32) -> (i32, i32) {
    %c0_i32 = arith.constant 0 : i32
    %c0_i32_0 = arith.constant 0 : i32
    %c0_i32_1 = arith.constant 0 : i32
    return %c0_i32, %c0_i32_0 : i32, i32
  }
  func.func @transform_9(%arg0: i32) -> (i32, i32) {
    %c0_i32 = arith.constant 0 : i32
    %c0_i32_0 = arith.constant 0 : i32
    %c0_i32_1 = arith.constant 0 : i32
    return %c0_i32, %c0_i32_0 : i32, i32
  }
  func.func @transform_10(%arg0: i32) -> (i32, i32) {
    %c0_i32 = arith.constant 0 : i32
    %c0_i32_0 = arith.constant 0 : i32
    %c0_i32_1 = arith.constant 0 : i32
    return %c0_i32, %c0_i32_0 : i32, i32
  }
  func.func @transform_11(%arg0: i32) -> (i32, i32) {
    %c0_i32 = arith.constant 0 : i32
    %c0_i32_0 = arith.constant 0 : i32
    %c0_i32_1 = arith.constant 0 : i32
    return %c0_i32, %c0_i32_0 : i32, i32
  }
  func.func @transform_12(%arg0: i32) -> (i32, i32) {
    %c0_i32 = arith.constant 0 : i32
    %c0_i32_0 = arith.constant 0 : i32
    %c0_i32_1 = arith.constant 0 : i32
    return %c0_i32, %c0_i32_0 : i32, i32
  }
  func.func @transform_13(%arg0: i32) -> (i32, i32) {
    %c0_i32 = arith.constant 0 : i32
    %c0_i32_0 = arith.constant 0 : i32
    %c0_i32_1 = arith.constant 0 : i32
    return %c0_i32, %c0_i32_0 : i32, i32
  }
  func.func @transform_14(%arg0: i32) -> (i32, i32) {
    %c0_i32 = arith.constant 0 : i32
    %c0_i32_0 = arith.constant 0 : i32
    %c0_i32_1 = arith.constant 0 : i32
    return %c0_i32, %c0_i32_0 : i32, i32
  }
  func.func @transform_15(%arg0: i32) -> (i32, i32) {
    %c0_i32 = arith.constant 0 : i32
    %c0_i32_0 = arith.constant 0 : i32
    %c0_i32_1 = arith.constant 0 : i32
    return %c0_i32, %c0_i32_0 : i32, i32
  }
  func.func @transform_16(%arg0: i32) -> (i32, i32) {
    %c0_i32 = arith.constant 0 : i32
    %c0_i32_0 = arith.constant 0 : i32
    %c0_i32_1 = arith.constant 0 : i32
    return %c0_i32, %c0_i32_0 : i32, i32
  }
  func.func @transform_17(%arg0: i32) -> (i32, i32, i32) {
    %c0_i32 = arith.constant 0 : i32
    %c0_i32_0 = arith.constant 0 : i32
    %c0_i32_1 = arith.constant 0 : i32
    return %arg0, %c0_i32, %c0_i32_0 : i32, i32, i32
  }
}

module attributes {stable_mosaic.version = 11 : i64} {
  func.func @encoder_block_kernel(%arg0: i32, %arg1: memref<2x8x128xf32, #tpu.memory_space<vmem>>, %arg2: memref<1x128xf32, #tpu.memory_space<vmem>>, %arg3: memref<1x128xf32, #tpu.memory_space<vmem>>, %arg4: memref<128x512xbf16, #tpu.memory_space<vmem>>, %arg5: memref<128x512xbf16, #tpu.memory_space<vmem>>, %arg6: memref<128x512xbf16, #tpu.memory_space<vmem>>, %arg7: memref<1x512xf32, #tpu.memory_space<vmem>>, %arg8: memref<1x512xf32, #tpu.memory_space<vmem>>, %arg9: memref<1x512xf32, #tpu.memory_space<vmem>>, %arg10: memref<512x128xbf16, #tpu.memory_space<vmem>>, %arg11: memref<1x128xf32, #tpu.memory_space<vmem>>, %arg12: memref<1x128xf32, #tpu.memory_space<vmem>>, %arg13: memref<1x128xf32, #tpu.memory_space<vmem>>, %arg14: memref<128x128xbf16, #tpu.memory_space<vmem>>, %arg15: memref<1x128xf32, #tpu.memory_space<vmem>>, %arg16: memref<128x128xbf16, #tpu.memory_space<vmem>>, %arg17: memref<1x128xf32, #tpu.memory_space<vmem>>, %arg18: memref<2x8x128xf32, #tpu.memory_space<vmem>>) attributes {dimension_semantics = [#tpu.dimension_semantics<parallel>], iteration_bounds = array<i64: 1>, scalar_prefetch = 0 : i64, scratch_operands = 0 : i64, tpu.core_type = #tpu.core_type<tc>, window_params = [{transform_indices = @transform_0, window_bounds = array<i64: 2, 8, 128>}, {pipeline_mode = #tpu.pipeline_mode<synchronous>, transform_indices = @transform_1, window_bounds = array<i64: 1, 128>}, {pipeline_mode = #tpu.pipeline_mode<synchronous>, transform_indices = @transform_2, window_bounds = array<i64: 1, 128>}, {pipeline_mode = #tpu.pipeline_mode<synchronous>, transform_indices = @transform_3, window_bounds = array<i64: 128, 512>}, {pipeline_mode = #tpu.pipeline_mode<synchronous>, transform_indices = @transform_4, window_bounds = array<i64: 128, 512>}, {pipeline_mode = #tpu.pipeline_mode<synchronous>, transform_indices = @transform_5, window_bounds = array<i64: 128, 512>}, {pipeline_mode = #tpu.pipeline_mode<synchronous>, transform_indices = @transform_6, window_bounds = array<i64: 1, 512>}, {pipeline_mode = #tpu.pipeline_mode<synchronous>, transform_indices = @transform_7, window_bounds = array<i64: 1, 512>}, {pipeline_mode = #tpu.pipeline_mode<synchronous>, transform_indices = @transform_8, window_bounds = array<i64: 1, 512>}, {pipeline_mode = #tpu.pipeline_mode<synchronous>, transform_indices = @transform_9, window_bounds = array<i64: 512, 128>}, {pipeline_mode = #tpu.pipeline_mode<synchronous>, transform_indices = @transform_10, window_bounds = array<i64: 1, 128>}, {pipeline_mode = #tpu.pipeline_mode<synchronous>, transform_indices = @transform_11, window_bounds = array<i64: 1, 128>}, {pipeline_mode = #tpu.pipeline_mode<synchronous>, transform_indices = @transform_12, window_bounds = array<i64: 1, 128>}, {pipeline_mode = #tpu.pipeline_mode<synchronous>, transform_indices = @transform_13, window_bounds = array<i64: 128, 128>}, {pipeline_mode = #tpu.pipeline_mode<synchronous>, transform_indices = @transform_14, window_bounds = array<i64: 1, 128>}, {pipeline_mode = #tpu.pipeline_mode<synchronous>, transform_indices = @transform_15, window_bounds = array<i64: 128, 128>}, {pipeline_mode = #tpu.pipeline_mode<synchronous>, transform_indices = @transform_16, window_bounds = array<i64: 1, 128>}, {transform_indices = @transform_17, window_bounds = array<i64: 2, 8, 128>}]} {
    %c0 = arith.constant 0 : index
    %c0_0 = arith.constant 0 : index
    %c0_1 = arith.constant 0 : index
    %0 = vector.load %arg1[%c0, %c0_0, %c0_1] : memref<2x8x128xf32, #tpu.memory_space<vmem>>, vector<2x8x128xf32>
    %1 = vector.shape_cast %0 : vector<2x8x128xf32> to vector<16x128xf32>
    %c0_2 = arith.constant 0 : index
    %c0_3 = arith.constant 0 : index
    %2 = vector.load %arg2[%c0_2, %c0_3] : memref<1x128xf32, #tpu.memory_space<vmem>>, vector<1x128xf32>
    %3 = vector.shape_cast %2 : vector<1x128xf32> to vector<128xf32>
    %c0_4 = arith.constant 0 : index
    %c0_5 = arith.constant 0 : index
    %4 = vector.load %arg3[%c0_4, %c0_5] : memref<1x128xf32, #tpu.memory_space<vmem>>, vector<1x128xf32>
    %5 = vector.shape_cast %4 : vector<1x128xf32> to vector<128xf32>
    %cst = arith.constant dense<0.000000e+00> : vector<16xf32>
    %6 = vector.multi_reduction <add>, %1, %cst [1] : vector<16x128xf32> to vector<16xf32>
    %7 = vector.shape_cast %6 : vector<16xf32> to vector<16x1xf32>
    %cst_6 = arith.constant 3.125000e-02 : f32
    %8 = vector.broadcast %cst_6 : f32 to vector<16x1xf32>
    %9 = arith.mulf %7, %8 : vector<16x1xf32>
    %10 = arith.mulf %1, %1 : vector<16x128xf32>
    %cst_7 = arith.constant dense<0.000000e+00> : vector<16xf32>
    %11 = vector.multi_reduction <add>, %10, %cst_7 [1] : vector<16x128xf32> to vector<16xf32>
    %12 = vector.shape_cast %11 : vector<16xf32> to vector<16x1xf32>
    %cst_8 = arith.constant 3.125000e-02 : f32
    %13 = vector.broadcast %cst_8 : f32 to vector<16x1xf32>
    %14 = arith.mulf %12, %13 : vector<16x1xf32>
    %15 = arith.mulf %9, %9 : vector<16x1xf32>
    %16 = arith.subf %14, %15 : vector<16x1xf32>
    %17 = vector.broadcast %9 : vector<16x1xf32> to vector<16x128xf32>
    %18 = arith.subf %1, %17 : vector<16x128xf32>
    %cst_9 = arith.constant 9.99999974E-6 : f32
    %19 = vector.broadcast %cst_9 : f32 to vector<16x1xf32>
    %20 = arith.addf %16, %19 : vector<16x1xf32>
    %21 = math.rsqrt %20 : vector<16x1xf32>
    %22 = vector.broadcast %21 : vector<16x1xf32> to vector<16x128xf32>
    %23 = arith.mulf %18, %22 : vector<16x128xf32>
    %24 = vector.shape_cast %3 : vector<128xf32> to vector<1x128xf32>
    %25 = vector.broadcast %24 : vector<1x128xf32> to vector<16x128xf32>
    %26 = arith.mulf %23, %25 : vector<16x128xf32>
    %27 = vector.shape_cast %5 : vector<128xf32> to vector<1x128xf32>
    %28 = vector.broadcast %27 : vector<1x128xf32> to vector<16x128xf32>
    %29 = arith.addf %26, %28 : vector<16x128xf32>
    %30 = arith.truncf %29 : vector<16x128xf32> to vector<16x128xbf16>
    %c0_10 = arith.constant 0 : index
    %c0_11 = arith.constant 0 : index
    %31 = vector.load %arg4[%c0_10, %c0_11] : memref<128x512xbf16, #tpu.memory_space<vmem>>, vector<128x512xbf16>
    %cst_12 = arith.constant dense<0.000000e+00> : vector<16x512xf32>
    %32 = tpu.matmul %30, %31, %cst_12 {dimension_numbers = #tpu.dot_dimension_numbers<[1], [0], [0], [1], [0, 0, 1, 1], [], []>} : vector<16x128xbf16>, vector<128x512xbf16>, vector<16x512xf32> -> vector<16x512xf32>
    %c0_13 = arith.constant 0 : index
    %c0_14 = arith.constant 0 : index
    %33 = vector.load %arg7[%c0_13, %c0_14] : memref<1x512xf32, #tpu.memory_space<vmem>>, vector<1x512xf32>
    %34 = vector.shape_cast %33 : vector<1x512xf32> to vector<512xf32>
    %35 = vector.shape_cast %34 : vector<512xf32> to vector<1x512xf32>
    %36 = vector.broadcast %35 : vector<1x512xf32> to vector<16x512xf32>
    %37 = arith.addf %32, %36 : vector<16x512xf32>
    %c0_15 = arith.constant 0 : index
    %c0_16 = arith.constant 0 : index
    %38 = vector.load %arg5[%c0_15, %c0_16] : memref<128x512xbf16, #tpu.memory_space<vmem>>, vector<128x512xbf16>
    %cst_17 = arith.constant dense<0.000000e+00> : vector<16x512xf32>
    %39 = tpu.matmul %30, %38, %cst_17 {dimension_numbers = #tpu.dot_dimension_numbers<[1], [0], [0], [1], [0, 0, 1, 1], [], []>} : vector<16x128xbf16>, vector<128x512xbf16>, vector<16x512xf32> -> vector<16x512xf32>
    %c0_18 = arith.constant 0 : index
    %c0_19 = arith.constant 0 : index
    %40 = vector.load %arg8[%c0_18, %c0_19] : memref<1x512xf32, #tpu.memory_space<vmem>>, vector<1x512xf32>
    %41 = vector.shape_cast %40 : vector<1x512xf32> to vector<512xf32>
    %42 = vector.shape_cast %41 : vector<512xf32> to vector<1x512xf32>
    %43 = vector.broadcast %42 : vector<1x512xf32> to vector<16x512xf32>
    %44 = arith.addf %39, %43 : vector<16x512xf32>
    %c0_20 = arith.constant 0 : index
    %c0_21 = arith.constant 0 : index
    %45 = vector.load %arg6[%c0_20, %c0_21] : memref<128x512xbf16, #tpu.memory_space<vmem>>, vector<128x512xbf16>
    %cst_22 = arith.constant dense<0.000000e+00> : vector<16x512xf32>
    %46 = tpu.matmul %30, %45, %cst_22 {dimension_numbers = #tpu.dot_dimension_numbers<[1], [0], [0], [1], [0, 0, 1, 1], [], []>} : vector<16x128xbf16>, vector<128x512xbf16>, vector<16x512xf32> -> vector<16x512xf32>
    %c0_23 = arith.constant 0 : index
    %c0_24 = arith.constant 0 : index
    %47 = vector.load %arg9[%c0_23, %c0_24] : memref<1x512xf32, #tpu.memory_space<vmem>>, vector<1x512xf32>
    %48 = vector.shape_cast %47 : vector<1x512xf32> to vector<512xf32>
    %49 = vector.shape_cast %48 : vector<512xf32> to vector<1x512xf32>
    %50 = vector.broadcast %49 : vector<1x512xf32> to vector<16x512xf32>
    %51 = arith.addf %46, %50 : vector<16x512xf32>
    %52 = arith.truncf %37 : vector<16x512xf32> to vector<16x512xbf16>
    %53 = vector.shape_cast %52 : vector<16x512xbf16> to vector<2x8x512xbf16>
    %54 = arith.truncf %44 : vector<16x512xf32> to vector<16x512xbf16>
    %55 = vector.shape_cast %54 : vector<16x512xbf16> to vector<2x8x512xbf16>
    %56 = arith.truncf %51 : vector<16x512xf32> to vector<16x512xbf16>
    %57 = vector.shape_cast %56 : vector<16x512xbf16> to vector<2x8x512xbf16>
    %58 = vector.extract_strided_slice %53 {offsets = [0, 0, 0], sizes = [2, 8, 128], strides = [1, 1, 1]} : vector<2x8x512xbf16> to vector<2x8x128xbf16>
    %59 = vector.extract_strided_slice %55 {offsets = [0, 0, 0], sizes = [2, 8, 128], strides = [1, 1, 1]} : vector<2x8x512xbf16> to vector<2x8x128xbf16>
    %60 = vector.extract_strided_slice %57 {offsets = [0, 0, 0], sizes = [2, 8, 128], strides = [1, 1, 1]} : vector<2x8x512xbf16> to vector<2x8x128xbf16>
    "tpu.trace_start"() <{level = 10 : i32, message = "bqd,bkd->bqk"}> : () -> ()
    %cst_25 = arith.constant dense<0.000000e+00> : vector<2x8x8xf32>
    %61 = tpu.matmul %58, %59, %cst_25 {dimension_numbers = #tpu.dot_dimension_numbers<[2], [2], [1], [1], [0, 0, 0, 1, 1, 1], [0], [0]>} : vector<2x8x128xbf16>, vector<2x8x128xbf16>, vector<2x8x8xf32> -> vector<2x8x8xf32>
    "tpu.trace_stop"() : () -> ()
    %cst_26 = arith.constant dense<0xFF800000> : vector<2x8xf32>
    %62 = vector.multi_reduction <maximumf>, %61, %cst_26 [2] : vector<2x8x8xf32> to vector<2x8xf32>
    %63 = vector.shape_cast %62 : vector<2x8xf32> to vector<2x8x1xf32>
    %64 = vector.broadcast %63 : vector<2x8x1xf32> to vector<2x8x8xf32>
    %65 = arith.subf %61, %64 : vector<2x8x8xf32>
    %66 = math.exp %65 : vector<2x8x8xf32>
    %cst_27 = arith.constant dense<0.000000e+00> : vector<2x8xf32>
    %67 = vector.multi_reduction <add>, %66, %cst_27 [2] : vector<2x8x8xf32> to vector<2x8xf32>
    %68 = vector.shape_cast %67 : vector<2x8xf32> to vector<2x8x1xf32>
    %69 = tpu.reciprocal %68 {approx = true} : vector<2x8x1xf32> -> vector<2x8x1xf32>
    %70 = vector.broadcast %69 : vector<2x8x1xf32> to vector<2x8x8xf32>
    %71 = arith.mulf %66, %70 : vector<2x8x8xf32>
    %72 = arith.truncf %71 : vector<2x8x8xf32> to vector<2x8x8xbf16>
    "tpu.trace_start"() <{level = 10 : i32, message = "bqk,bkd->bqd"}> : () -> ()
    %cst_28 = arith.constant dense<0.000000e+00> : vector<2x8x128xf32>
    %73 = tpu.matmul %72, %60, %cst_28 {dimension_numbers = #tpu.dot_dimension_numbers<[2], [1], [1], [2], [0, 0, 0, 1, 1, 2], [0], [0]>} : vector<2x8x8xbf16>, vector<2x8x128xbf16>, vector<2x8x128xf32> -> vector<2x8x128xf32>
    "tpu.trace_stop"() : () -> ()
    %74 = arith.truncf %73 : vector<2x8x128xf32> to vector<2x8x128xbf16>
    %75 = vector.extract_strided_slice %53 {offsets = [0, 0, 128], sizes = [2, 8, 128], strides = [1, 1, 1]} : vector<2x8x512xbf16> to vector<2x8x128xbf16>
    %76 = vector.extract_strided_slice %55 {offsets = [0, 0, 128], sizes = [2, 8, 128], strides = [1, 1, 1]} : vector<2x8x512xbf16> to vector<2x8x128xbf16>
    %77 = vector.extract_strided_slice %57 {offsets = [0, 0, 128], sizes = [2, 8, 128], strides = [1, 1, 1]} : vector<2x8x512xbf16> to vector<2x8x128xbf16>
    "tpu.trace_start"() <{level = 10 : i32, message = "bqd,bkd->bqk"}> : () -> ()
    %cst_29 = arith.constant dense<0.000000e+00> : vector<2x8x8xf32>
    %78 = tpu.matmul %75, %76, %cst_29 {dimension_numbers = #tpu.dot_dimension_numbers<[2], [2], [1], [1], [0, 0, 0, 1, 1, 1], [0], [0]>} : vector<2x8x128xbf16>, vector<2x8x128xbf16>, vector<2x8x8xf32> -> vector<2x8x8xf32>
    "tpu.trace_stop"() : () -> ()
    %cst_30 = arith.constant dense<0xFF800000> : vector<2x8xf32>
    %79 = vector.multi_reduction <maximumf>, %78, %cst_30 [2] : vector<2x8x8xf32> to vector<2x8xf32>
    %80 = vector.shape_cast %79 : vector<2x8xf32> to vector<2x8x1xf32>
    %81 = vector.broadcast %80 : vector<2x8x1xf32> to vector<2x8x8xf32>
    %82 = arith.subf %78, %81 : vector<2x8x8xf32>
    %83 = math.exp %82 : vector<2x8x8xf32>
    %cst_31 = arith.constant dense<0.000000e+00> : vector<2x8xf32>
    %84 = vector.multi_reduction <add>, %83, %cst_31 [2] : vector<2x8x8xf32> to vector<2x8xf32>
    %85 = vector.shape_cast %84 : vector<2x8xf32> to vector<2x8x1xf32>
    %86 = tpu.reciprocal %85 {approx = true} : vector<2x8x1xf32> -> vector<2x8x1xf32>
    %87 = vector.broadcast %86 : vector<2x8x1xf32> to vector<2x8x8xf32>
    %88 = arith.mulf %83, %87 : vector<2x8x8xf32>
    %89 = arith.truncf %88 : vector<2x8x8xf32> to vector<2x8x8xbf16>
    "tpu.trace_start"() <{level = 10 : i32, message = "bqk,bkd->bqd"}> : () -> ()
    %cst_32 = arith.constant dense<0.000000e+00> : vector<2x8x128xf32>
    %90 = tpu.matmul %89, %77, %cst_32 {dimension_numbers = #tpu.dot_dimension_numbers<[2], [1], [1], [2], [0, 0, 0, 1, 1, 2], [0], [0]>} : vector<2x8x8xbf16>, vector<2x8x128xbf16>, vector<2x8x128xf32> -> vector<2x8x128xf32>
    "tpu.trace_stop"() : () -> ()
    %91 = arith.truncf %90 : vector<2x8x128xf32> to vector<2x8x128xbf16>
    %92 = vector.extract_strided_slice %53 {offsets = [0, 0, 256], sizes = [2, 8, 128], strides = [1, 1, 1]} : vector<2x8x512xbf16> to vector<2x8x128xbf16>
    %93 = vector.extract_strided_slice %55 {offsets = [0, 0, 256], sizes = [2, 8, 128], strides = [1, 1, 1]} : vector<2x8x512xbf16> to vector<2x8x128xbf16>
    %94 = vector.extract_strided_slice %57 {offsets = [0, 0, 256], sizes = [2, 8, 128], strides = [1, 1, 1]} : vector<2x8x512xbf16> to vector<2x8x128xbf16>
    "tpu.trace_start"() <{level = 10 : i32, message = "bqd,bkd->bqk"}> : () -> ()
    %cst_33 = arith.constant dense<0.000000e+00> : vector<2x8x8xf32>
    %95 = tpu.matmul %92, %93, %cst_33 {dimension_numbers = #tpu.dot_dimension_numbers<[2], [2], [1], [1], [0, 0, 0, 1, 1, 1], [0], [0]>} : vector<2x8x128xbf16>, vector<2x8x128xbf16>, vector<2x8x8xf32> -> vector<2x8x8xf32>
    "tpu.trace_stop"() : () -> ()
    %cst_34 = arith.constant dense<0xFF800000> : vector<2x8xf32>
    %96 = vector.multi_reduction <maximumf>, %95, %cst_34 [2] : vector<2x8x8xf32> to vector<2x8xf32>
    %97 = vector.shape_cast %96 : vector<2x8xf32> to vector<2x8x1xf32>
    %98 = vector.broadcast %97 : vector<2x8x1xf32> to vector<2x8x8xf32>
    %99 = arith.subf %95, %98 : vector<2x8x8xf32>
    %100 = math.exp %99 : vector<2x8x8xf32>
    %cst_35 = arith.constant dense<0.000000e+00> : vector<2x8xf32>
    %101 = vector.multi_reduction <add>, %100, %cst_35 [2] : vector<2x8x8xf32> to vector<2x8xf32>
    %102 = vector.shape_cast %101 : vector<2x8xf32> to vector<2x8x1xf32>
    %103 = tpu.reciprocal %102 {approx = true} : vector<2x8x1xf32> -> vector<2x8x1xf32>
    %104 = vector.broadcast %103 : vector<2x8x1xf32> to vector<2x8x8xf32>
    %105 = arith.mulf %100, %104 : vector<2x8x8xf32>
    %106 = arith.truncf %105 : vector<2x8x8xf32> to vector<2x8x8xbf16>
    "tpu.trace_start"() <{level = 10 : i32, message = "bqk,bkd->bqd"}> : () -> ()
    %cst_36 = arith.constant dense<0.000000e+00> : vector<2x8x128xf32>
    %107 = tpu.matmul %106, %94, %cst_36 {dimension_numbers = #tpu.dot_dimension_numbers<[2], [1], [1], [2], [0, 0, 0, 1, 1, 2], [0], [0]>} : vector<2x8x8xbf16>, vector<2x8x128xbf16>, vector<2x8x128xf32> -> vector<2x8x128xf32>
    "tpu.trace_stop"() : () -> ()
    %108 = arith.truncf %107 : vector<2x8x128xf32> to vector<2x8x128xbf16>
    %109 = vector.extract_strided_slice %53 {offsets = [0, 0, 384], sizes = [2, 8, 128], strides = [1, 1, 1]} : vector<2x8x512xbf16> to vector<2x8x128xbf16>
    %110 = vector.extract_strided_slice %55 {offsets = [0, 0, 384], sizes = [2, 8, 128], strides = [1, 1, 1]} : vector<2x8x512xbf16> to vector<2x8x128xbf16>
    %111 = vector.extract_strided_slice %57 {offsets = [0, 0, 384], sizes = [2, 8, 128], strides = [1, 1, 1]} : vector<2x8x512xbf16> to vector<2x8x128xbf16>
    "tpu.trace_start"() <{level = 10 : i32, message = "bqd,bkd->bqk"}> : () -> ()
    %cst_37 = arith.constant dense<0.000000e+00> : vector<2x8x8xf32>
    %112 = tpu.matmul %109, %110, %cst_37 {dimension_numbers = #tpu.dot_dimension_numbers<[2], [2], [1], [1], [0, 0, 0, 1, 1, 1], [0], [0]>} : vector<2x8x128xbf16>, vector<2x8x128xbf16>, vector<2x8x8xf32> -> vector<2x8x8xf32>
    "tpu.trace_stop"() : () -> ()
    %cst_38 = arith.constant dense<0xFF800000> : vector<2x8xf32>
    %113 = vector.multi_reduction <maximumf>, %112, %cst_38 [2] : vector<2x8x8xf32> to vector<2x8xf32>
    %114 = vector.shape_cast %113 : vector<2x8xf32> to vector<2x8x1xf32>
    %115 = vector.broadcast %114 : vector<2x8x1xf32> to vector<2x8x8xf32>
    %116 = arith.subf %112, %115 : vector<2x8x8xf32>
    %117 = math.exp %116 : vector<2x8x8xf32>
    %cst_39 = arith.constant dense<0.000000e+00> : vector<2x8xf32>
    %118 = vector.multi_reduction <add>, %117, %cst_39 [2] : vector<2x8x8xf32> to vector<2x8xf32>
    %119 = vector.shape_cast %118 : vector<2x8xf32> to vector<2x8x1xf32>
    %120 = tpu.reciprocal %119 {approx = true} : vector<2x8x1xf32> -> vector<2x8x1xf32>
    %121 = vector.broadcast %120 : vector<2x8x1xf32> to vector<2x8x8xf32>
    %122 = arith.mulf %117, %121 : vector<2x8x8xf32>
    %123 = arith.truncf %122 : vector<2x8x8xf32> to vector<2x8x8xbf16>
    "tpu.trace_start"() <{level = 10 : i32, message = "bqk,bkd->bqd"}> : () -> ()
    %cst_40 = arith.constant dense<0.000000e+00> : vector<2x8x128xf32>
    %124 = tpu.matmul %123, %111, %cst_40 {dimension_numbers = #tpu.dot_dimension_numbers<[2], [1], [1], [2], [0, 0, 0, 1, 1, 2], [0], [0]>} : vector<2x8x8xbf16>, vector<2x8x128xbf16>, vector<2x8x128xf32> -> vector<2x8x128xf32>
    "tpu.trace_stop"() : () -> ()
    %125 = arith.truncf %124 : vector<2x8x128xf32> to vector<2x8x128xbf16>
    %126 = tpu.concatenate %74, %91, %108, %125 in 2 : vector<2x8x128xbf16>, vector<2x8x128xbf16>, vector<2x8x128xbf16>, vector<2x8x128xbf16> -> vector<2x8x512xbf16>
    %127 = vector.shape_cast %126 : vector<2x8x512xbf16> to vector<16x512xbf16>
    %c0_41 = arith.constant 0 : index
    %c0_42 = arith.constant 0 : index
    %128 = vector.load %arg10[%c0_41, %c0_42] : memref<512x128xbf16, #tpu.memory_space<vmem>>, vector<512x128xbf16>
    %cst_43 = arith.constant dense<0.000000e+00> : vector<16x128xf32>
    %129 = tpu.matmul %127, %128, %cst_43 {dimension_numbers = #tpu.dot_dimension_numbers<[1], [0], [0], [1], [0, 0, 1, 1], [], []>} : vector<16x512xbf16>, vector<512x128xbf16>, vector<16x128xf32> -> vector<16x128xf32>
    %c0_44 = arith.constant 0 : index
    %c0_45 = arith.constant 0 : index
    %130 = vector.load %arg11[%c0_44, %c0_45] : memref<1x128xf32, #tpu.memory_space<vmem>>, vector<1x128xf32>
    %131 = vector.shape_cast %130 : vector<1x128xf32> to vector<128xf32>
    %132 = vector.shape_cast %131 : vector<128xf32> to vector<1x128xf32>
    %133 = vector.broadcast %132 : vector<1x128xf32> to vector<16x128xf32>
    %134 = arith.addf %129, %133 : vector<16x128xf32>
    %135 = arith.addf %29, %134 : vector<16x128xf32>
    %c0_46 = arith.constant 0 : index
    %c0_47 = arith.constant 0 : index
    %136 = vector.load %arg12[%c0_46, %c0_47] : memref<1x128xf32, #tpu.memory_space<vmem>>, vector<1x128xf32>
    %137 = vector.shape_cast %136 : vector<1x128xf32> to vector<128xf32>
    %c0_48 = arith.constant 0 : index
    %c0_49 = arith.constant 0 : index
    %138 = vector.load %arg13[%c0_48, %c0_49] : memref<1x128xf32, #tpu.memory_space<vmem>>, vector<1x128xf32>
    %139 = vector.shape_cast %138 : vector<1x128xf32> to vector<128xf32>
    %cst_50 = arith.constant dense<0.000000e+00> : vector<16xf32>
    %140 = vector.multi_reduction <add>, %135, %cst_50 [1] : vector<16x128xf32> to vector<16xf32>
    %141 = vector.shape_cast %140 : vector<16xf32> to vector<16x1xf32>
    %cst_51 = arith.constant 3.125000e-02 : f32
    %142 = vector.broadcast %cst_51 : f32 to vector<16x1xf32>
    %143 = arith.mulf %141, %142 : vector<16x1xf32>
    %144 = arith.mulf %135, %135 : vector<16x128xf32>
    %cst_52 = arith.constant dense<0.000000e+00> : vector<16xf32>
    %145 = vector.multi_reduction <add>, %144, %cst_52 [1] : vector<16x128xf32> to vector<16xf32>
    %146 = vector.shape_cast %145 : vector<16xf32> to vector<16x1xf32>
    %cst_53 = arith.constant 3.125000e-02 : f32
    %147 = vector.broadcast %cst_53 : f32 to vector<16x1xf32>
    %148 = arith.mulf %146, %147 : vector<16x1xf32>
    %149 = arith.mulf %143, %143 : vector<16x1xf32>
    %150 = arith.subf %148, %149 : vector<16x1xf32>
    %151 = vector.broadcast %143 : vector<16x1xf32> to vector<16x128xf32>
    %152 = arith.subf %135, %151 : vector<16x128xf32>
    %cst_54 = arith.constant 9.99999974E-6 : f32
    %153 = vector.broadcast %cst_54 : f32 to vector<16x1xf32>
    %154 = arith.addf %150, %153 : vector<16x1xf32>
    %155 = math.rsqrt %154 : vector<16x1xf32>
    %156 = vector.broadcast %155 : vector<16x1xf32> to vector<16x128xf32>
    %157 = arith.mulf %152, %156 : vector<16x128xf32>
    %158 = vector.shape_cast %137 : vector<128xf32> to vector<1x128xf32>
    %159 = vector.broadcast %158 : vector<1x128xf32> to vector<16x128xf32>
    %160 = arith.mulf %157, %159 : vector<16x128xf32>
    %161 = vector.shape_cast %139 : vector<128xf32> to vector<1x128xf32>
    %162 = vector.broadcast %161 : vector<1x128xf32> to vector<16x128xf32>
    %163 = arith.addf %160, %162 : vector<16x128xf32>
    %164 = arith.truncf %163 : vector<16x128xf32> to vector<16x128xbf16>
    %c0_55 = arith.constant 0 : index
    %c0_56 = arith.constant 0 : index
    %165 = vector.load %arg14[%c0_55, %c0_56] : memref<128x128xbf16, #tpu.memory_space<vmem>>, vector<128x128xbf16>
    %cst_57 = arith.constant dense<0.000000e+00> : vector<16x128xf32>
    %166 = tpu.matmul %164, %165, %cst_57 {dimension_numbers = #tpu.dot_dimension_numbers<[1], [0], [0], [1], [0, 0, 1, 1], [], []>} : vector<16x128xbf16>, vector<128x128xbf16>, vector<16x128xf32> -> vector<16x128xf32>
    %c0_58 = arith.constant 0 : index
    %c0_59 = arith.constant 0 : index
    %167 = vector.load %arg15[%c0_58, %c0_59] : memref<1x128xf32, #tpu.memory_space<vmem>>, vector<1x128xf32>
    %168 = vector.shape_cast %167 : vector<1x128xf32> to vector<128xf32>
    %169 = vector.shape_cast %168 : vector<128xf32> to vector<1x128xf32>
    %170 = vector.broadcast %169 : vector<1x128xf32> to vector<16x128xf32>
    %171 = arith.addf %166, %170 : vector<16x128xf32>
    %cst_60 = arith.constant 0.000000e+00 : f32
    %172 = vector.broadcast %cst_60 : f32 to vector<16x128xf32>
    %173 = arith.maximumf %171, %172 : vector<16x128xf32>
    %174 = arith.truncf %173 : vector<16x128xf32> to vector<16x128xbf16>
    %c0_61 = arith.constant 0 : index
    %c0_62 = arith.constant 0 : index
    %175 = vector.load %arg16[%c0_61, %c0_62] : memref<128x128xbf16, #tpu.memory_space<vmem>>, vector<128x128xbf16>
    %cst_63 = arith.constant dense<0.000000e+00> : vector<16x128xf32>
    %176 = tpu.matmul %174, %175, %cst_63 {dimension_numbers = #tpu.dot_dimension_numbers<[1], [0], [0], [1], [0, 0, 1, 1], [], []>} : vector<16x128xbf16>, vector<128x128xbf16>, vector<16x128xf32> -> vector<16x128xf32>
    %c0_64 = arith.constant 0 : index
    %c0_65 = arith.constant 0 : index
    %177 = vector.load %arg17[%c0_64, %c0_65] : memref<1x128xf32, #tpu.memory_space<vmem>>, vector<1x128xf32>
    %178 = vector.shape_cast %177 : vector<1x128xf32> to vector<128xf32>
    %179 = vector.shape_cast %178 : vector<128xf32> to vector<1x128xf32>
    %180 = vector.broadcast %179 : vector<1x128xf32> to vector<16x128xf32>
    %181 = arith.addf %176, %180 : vector<16x128xf32>
    %182 = arith.addf %163, %181 : vector<16x128xf32>
    %183 = vector.shape_cast %182 : vector<16x128xf32> to vector<2x8x128xf32>
    %c0_66 = arith.constant 0 : index
    %c0_67 = arith.constant 0 : index
    %c0_68 = arith.constant 0 : index
    %184 = vector.load %arg18[%c0_66, %c0_67, %c0_68] : memref<2x8x128xf32, #tpu.memory_space<vmem>>, vector<2x8x128xf32>
    tpu.vector_store %arg18[%c0_66, %c0_67, %c0_68], %183 {strides = array<i32>} : memref<2x8x128xf32, #tpu.memory_space<vmem>>, vector<2x8x128xf32>,
    return
  }
  func.func @transform_0(%arg0: i32) -> (i32, i32, i32) {
    %c0_i32 = arith.constant 0 : i32
    %c0_i32_0 = arith.constant 0 : i32
    %c0_i32_1 = arith.constant 0 : i32
    return %arg0, %c0_i32, %c0_i32_0 : i32, i32, i32
  }
  func.func @transform_1(%arg0: i32) -> (i32, i32) {
    %c0_i32 = arith.constant 0 : i32
    %c0_i32_0 = arith.constant 0 : i32
    %c0_i32_1 = arith.constant 0 : i32
    return %c0_i32, %c0_i32_0 : i32, i32
  }
  func.func @transform_2(%arg0: i32) -> (i32, i32) {
    %c0_i32 = arith.constant 0 : i32
    %c0_i32_0 = arith.constant 0 : i32
    %c0_i32_1 = arith.constant 0 : i32
    return %c0_i32, %c0_i32_0 : i32, i32
  }
  func.func @transform_3(%arg0: i32) -> (i32, i32) {
    %c0_i32 = arith.constant 0 : i32
    %c0_i32_0 = arith.constant 0 : i32
    %c0_i32_1 = arith.constant 0 : i32
    return %c0_i32, %c0_i32_0 : i32, i32
  }
  func.func @transform_4(%arg0: i32) -> (i32, i32) {
    %c0_i32 = arith.constant 0 : i32
    %c0_i32_0 = arith.constant 0 : i32
    %c0_i32_1 = arith.constant 0 : i32
    return %c0_i32, %c0_i32_0 : i32, i32
  }
  func.func @transform_5(%arg0: i32) -> (i32, i32) {
    %c0_i32 = arith.constant 0 : i32
    %c0_i32_0 = arith.constant 0 : i32
    %c0_i32_1 = arith.constant 0 : i32
    return %c0_i32, %c0_i32_0 : i32, i32
  }
  func.func @transform_6(%arg0: i32) -> (i32, i32) {
    %c0_i32 = arith.constant 0 : i32
    %c0_i32_0 = arith.constant 0 : i32
    %c0_i32_1 = arith.constant 0 : i32
    return %c0_i32, %c0_i32_0 : i32, i32
  }
  func.func @transform_7(%arg0: i32) -> (i32, i32) {
    %c0_i32 = arith.constant 0 : i32
    %c0_i32_0 = arith.constant 0 : i32
    %c0_i32_1 = arith.constant 0 : i32
    return %c0_i32, %c0_i32_0 : i32, i32
  }
  func.func @transform_8(%arg0: i32) -> (i32, i32) {
    %c0_i32 = arith.constant 0 : i32
    %c0_i32_0 = arith.constant 0 : i32
    %c0_i32_1 = arith.constant 0 : i32
    return %c0_i32, %c0_i32_0 : i32, i32
  }
  func.func @transform_9(%arg0: i32) -> (i32, i32) {
    %c0_i32 = arith.constant 0 : i32
    %c0_i32_0 = arith.constant 0 : i32
    %c0_i32_1 = arith.constant 0 : i32
    return %c0_i32, %c0_i32_0 : i32, i32
  }
  func.func @transform_10(%arg0: i32) -> (i32, i32) {
    %c0_i32 = arith.constant 0 : i32
    %c0_i32_0 = arith.constant 0 : i32
    %c0_i32_1 = arith.constant 0 : i32
    return %c0_i32, %c0_i32_0 : i32, i32
  }
  func.func @transform_11(%arg0: i32) -> (i32, i32) {
    %c0_i32 = arith.constant 0 : i32
    %c0_i32_0 = arith.constant 0 : i32
    %c0_i32_1 = arith.constant 0 : i32
    return %c0_i32, %c0_i32_0 : i32, i32
  }
  func.func @transform_12(%arg0: i32) -> (i32, i32) {
    %c0_i32 = arith.constant 0 : i32
    %c0_i32_0 = arith.constant 0 : i32
    %c0_i32_1 = arith.constant 0 : i32
    return %c0_i32, %c0_i32_0 : i32, i32
  }
  func.func @transform_13(%arg0: i32) -> (i32, i32) {
    %c0_i32 = arith.constant 0 : i32
    %c0_i32_0 = arith.constant 0 : i32
    %c0_i32_1 = arith.constant 0 : i32
    return %c0_i32, %c0_i32_0 : i32, i32
  }
  func.func @transform_14(%arg0: i32) -> (i32, i32) {
    %c0_i32 = arith.constant 0 : i32
    %c0_i32_0 = arith.constant 0 : i32
    %c0_i32_1 = arith.constant 0 : i32
    return %c0_i32, %c0_i32_0 : i32, i32
  }
  func.func @transform_15(%arg0: i32) -> (i32, i32) {
    %c0_i32 = arith.constant 0 : i32
    %c0_i32_0 = arith.constant 0 : i32
    %c0_i32_1 = arith.constant 0 : i32
    return %c0_i32, %c0_i32_0 : i32, i32
  }
  func.func @transform_16(%arg0: i32) -> (i32, i32) {
    %c0_i32 = arith.constant 0 : i32
    %c0_i32_0 = arith.constant 0 : i32
    %c0_i32_1 = arith.constant 0 : i32
    return %c0_i32, %c0_i32_0 : i32, i32
  }
  func.func @transform_17(%arg0: i32) -> (i32, i32, i32) {
    %c0_i32 = arith.constant 0 : i32
    %c0_i32_0 = arith.constant 0 : i32
    %c0_i32_1 = arith.constant 0 : i32
    return %arg0, %c0_i32, %c0_i32_0 : i32, i32, i32
  }
}

</mosaic_0001>

<bundles_post_ra>
// kernel: tpu_custom_call.1
= control target key start
LH: loop header
LB: loop body
LE: loop exit
PB: predicated region body
PF: predicated region fallthrough
CT: control target
= control target key end

     0   :  { %s4003_s0 = inlined_call_operand.hbm [shape: f32[2,8,128], index: 0, kind: input, shape index: {}]   ;;  %s4004_s1 = inlined_call_operand.vmem [shape: f32[1,128], index: 1, kind: input, shape index: {}]   ;;  %s4005_s2 = inlined_call_operand.vmem [shape: f32[1,128], index: 2, kind: input, shape index: {}]   ;;  %s4006_s3 = inlined_call_operand.hbm [shape: bf16[128,512], index: 3, kind: input, shape index: {}]   ;;  %s4007_s4 = inlined_call_operand.hbm [shape: bf16[128,512], index: 4, kind: input, shape index: {}]   ;;  %s4008_s5 = inlined_call_operand.hbm [shape: bf16[128,512], index: 5, kind: input, shape index: {}]   ;;  %s4009_s6 = inlined_call_operand.vmem [shape: f32[1,512], index: 6, kind: input, shape index: {}]   ;;  %s4010_s7 = inlined_call_operand.vmem [shape: f32[1,512], index: 7, kind: input, shape index: {}]   ;;  %s4011_s8 = inlined_call_operand.vmem [shape: f32[1,512], index: 8, kind: input, shape index: {}]   ;;  %s4012_s9 = inlined_call_operand.hbm [shape: bf16[512,128], index: 9, kind: input, shape index: {}]   ;;  %s4013_s10 = inlined_call_operand.vmem [shape: f32[1,128], index: 10, kind: input, shape index: {}]   ;;  %s4014_s11 = inlined_call_operand.vmem [shape: f32[1,128], index: 11, kind: input, shape index: {}]   ;;  %s4015_s12 = inlined_call_operand.vmem [shape: f32[1,128], index: 12, kind: input, shape index: {}]   ;;  %s4016_s13 = inlined_call_operand.hbm [shape: bf16[128,128], index: 13, kind: input, shape index: {}]   ;;  %s4017_s14 = inlined_call_operand.vmem [shape: f32[1,128], index: 14, kind: input, shape index: {}]   ;;  %s4018_s15 = inlined_call_operand.hbm [shape: bf16[128,128], index: 15, kind: input, shape index: {}]   ;;  %s4019_s16 = inlined_call_operand.vmem [shape: f32[1,128], index: 16, kind: input, shape index: {}]   ;;  %s4020_s17 = inlined_call_operand.hbm [shape: f32[2,8,128], index: 17, kind: output, shape index: {}]  }
   0x1   :  { %4027 = sst [smem:[#allocation20_spill]] %s4003_s0 }
   0x2   :  { %4028 = sst [smem:[#allocation21_spill]] %s4004_s1 }
   0x3   :  { %22 = vsyncpa [#allocation3], 0 }
   0x4   :  { %23 = vsyncpa [#allocation6], 0 }
   0x5   :  { %24 = vsyncpa [#allocation9], 0 }
   0x6   :  { %25 = vsyncpa [#allocation12], 0 }
   0x7   :  { %26 = vsyncpa [#allocation4], 0  ;;  %s3505_s24 = smov [#allocation5]   ;;  %s3319_s28 = scalar_lea.hbm %s4006_s3, 4096 }
   0x8   :  { %s48_s25 = sshll.u32 %s3505_s24, 4  ;;  %p3320_p0 = scmp.ne.s32.totalorder %s4006_s3, %s3319_s28  ;;  %s49_s25 = int_to_ptr.vmem [resolvable:$true] %s48_s25 }
   0x9   :  { %p3323_p1 = scmp.lt.u32.totalorder %s3319_s28, %s4006_s3 }
   0xb   :  { %p3325_p2 = pnand %p3323_p1, %p3320_p0 }
   0xd   :  { %3328 = shalt.err (!%p3325_p2)
}
   0xe   :  { %s3329_s19 = scalar_lea.vmem %s49_s25, 4096  ;;  %p3334_p4 = scmp.lt.s32.totalorder %s49_s25, %s49_s25 }
   0xf   :  { %p3330_p3 = scmp.ne.s32.totalorder %s49_s25, %s3329_s19  ;;  %p3335_p5 = scmp.lt.s32.totalorder %s3329_s19, %s3329_s19 }
  0x11   :  { %p3336_p6 = por %p3335_p5, %p3334_p4 }
  0x13   :  { %p3337_p7 = pnand %p3336_p6, %p3330_p3 }
  0x15   :  { %3340 = shalt.err (!%p3337_p7)
}
  0x16   :  { %s4026_s1 = smov 256   ;;  %s3507_s20 = smov 16  }
  0x17   :  { %54 = dma.hbm_to_vmem [thread:$0]  %s4006_s3, 4096, %s49_s25, [#allocation6], %s4026_s1, %s4026_s1, %s3507_s20  }
  0x18   :  { %s3508_s23 = smov [#allocation8]   ;;  %s3341_s28 = scalar_lea.hbm %s4008_s5, 4096 }
  0x19   :  { %s72_s24 = sshll.u32 %s3508_s23, 4  ;;  %p3342_p8 = scmp.ne.s32.totalorder %s4008_s5, %s3341_s28  ;;  %s73_s24 = int_to_ptr.vmem [resolvable:$true] %s72_s24 }
  0x1a   :  { %p3345_p9 = scmp.lt.u32.totalorder %s3341_s28, %s4008_s5 }
  0x1c   :  { %p3347_p10 = pnand %p3345_p9, %p3342_p8 }
  0x1e   :  { %3350 = shalt.err (!%p3347_p10)
}
  0x1f   :  { %s3351_s19 = scalar_lea.vmem %s73_s24, 4096  ;;  %p3356_p12 = scmp.lt.s32.totalorder %s73_s24, %s73_s24 }
  0x20   :  { %p3352_p11 = scmp.ne.s32.totalorder %s73_s24, %s3351_s19  ;;  %p3357_p13 = scmp.lt.s32.totalorder %s3351_s19, %s3351_s19 }
  0x22   :  { %p3358_p0 = por %p3357_p13, %p3356_p12 }
  0x24   :  { %p3359_p1 = pnand %p3358_p0, %p3352_p11 }
  0x26   :  { %3362 = shalt.err (!%p3359_p1)
}
  0x27   :  { %78 = dma.hbm_to_vmem [thread:$0]  %s4008_s5, 4096, %s73_s24, [#allocation9], %s4026_s1, %s4026_s1, %s3507_s20  }
  0x28   :  { %s3509_s21 = smov [#allocation11]   ;;  %s3510_s23 = smov [#allocation2]  }
  0x29   :  { %s108_s22 = sshll.u32 %s3509_s21, 4  ;;  %s32_s26 = sshll.u32 %s3510_s23, 4  ;;  %s109_s22 = int_to_ptr.vmem [resolvable:$true] %s108_s22  ;;  %s3642_s26 = int_to_ptr.vmem [resolvable:$true] %s32_s26 }
  0x2a   :  { %s3363_s29 = scalar_lea.hbm %s4016_s13, 1024 }
  0x2b   :  { %p3364_p2 = scmp.ne.s32.totalorder %s4016_s13, %s3363_s29  ;;  %p3367_p3 = scmp.lt.u32.totalorder %s3363_s29, %s4016_s13 }
  0x2d   :  { %p3369_p4 = pnand %p3367_p3, %p3364_p2 }
  0x2f   :  { %3372 = shalt.err (!%p3369_p4)
}
  0x30   :  { %s3373_s5 = scalar_lea.vmem %s109_s22, 1024  ;;  %p3378_p6 = scmp.lt.s32.totalorder %s109_s22, %s109_s22 }
  0x31   :  { %p3374_p5 = scmp.ne.s32.totalorder %s109_s22, %s3373_s5  ;;  %p3379_p7 = scmp.lt.s32.totalorder %s3373_s5, %s3373_s5 }
  0x33   :  { %p3380_p8 = por %p3379_p7, %p3378_p6 }
  0x35   :  { %p3381_p9 = pnand %p3380_p8, %p3374_p5 }
  0x37   :  { %3384 = shalt.err (!%p3381_p9)
}
  0x38   :  { %s4022_s24 = smov 64   ;;  %s4024_s3 = smov 4  }
  0x39   :  { %114 = dma.hbm_to_vmem [thread:$0]  %s4016_s13, 1024, %s109_s22, [#allocation12], %s4022_s24, %s4022_s24, %s4024_s3  }
  0x3a   :  { %s4029_s28 = sld [smem:[#allocation20_spill]] }
  0x40   :  { %s3385_s29 = scalar_lea.hbm %s4029_s28, 256 }
  0x41   :  { %p3386_p10 = scmp.ne.s32.totalorder %s4029_s28, %s3385_s29  ;;  %p3389_p11 = scmp.lt.u32.totalorder %s3385_s29, %s4029_s28 }
  0x43   :  { %p3391_p12 = pnand %p3389_p11, %p3386_p10 }
  0x45   :  { %3394 = shalt.err (!%p3391_p12)
}
  0x46   :  { %s3395_s5 = scalar_lea.vmem %s3642_s26, 256  ;;  %p3400_p0 = scmp.lt.s32.totalorder %s3642_s26, %s3642_s26 }
  0x47   :  { %p3396_p13 = scmp.ne.s32.totalorder %s3642_s26, %s3395_s5  ;;  %p3401_p1 = scmp.lt.s32.totalorder %s3395_s5, %s3395_s5 }
  0x49   :  { %p3402_p2 = por %p3401_p1, %p3400_p0 }
  0x4b   :  { %p3403_p3 = pnand %p3402_p2, %p3396_p13 }
  0x4d   :  { %3406 = shalt.err (!%p3403_p3)
}
  0x4e   :  { %s3513_s13 = smov 128   ;;  %s3514_s22 = smov 8  }
  0x4f   :  { %38 = dma.hbm_to_vmem [thread:$0]  %s4029_s28, 256, %s3642_s26, [#allocation3], %s3513_s13, %s3513_s13, %s3514_s22  }
  0x50   :  { %s3515_s23 = smov [#allocation7]   ;;  %s3516_s29 = smov [#allocation10]  }
  0x51   :  { %s60_s27 = sshll.u32 %s3515_s23, 4  ;;  %s90_s0 = sshll.u32 %s3516_s29, 4  ;;  %s61_s27 = int_to_ptr.vmem [resolvable:$true] %s60_s27  ;;  %s3679_s0 = int_to_ptr.vmem [resolvable:$true] %s90_s0 }
  0x52   :  { %s3407_s19 = scalar_lea.hbm %s4007_s4, 4096 }
  0x53   :  { %p3408_p4 = scmp.ne.s32.totalorder %s4007_s4, %s3407_s19  ;;  %p3411_p5 = scmp.lt.u32.totalorder %s3407_s19, %s4007_s4 }
  0x55   :  { %p3413_p6 = pnand %p3411_p5, %p3408_p4 }
  0x57   :  { %3416 = shalt.err (!%p3413_p6)
}
  0x58   :  { %s3417_s26 = scalar_lea.vmem %s61_s27, 4096  ;;  %p3422_p8 = scmp.lt.s32.totalorder %s61_s27, %s61_s27 }
  0x59   :  { %p3418_p7 = scmp.ne.s32.totalorder %s61_s27, %s3417_s26  ;;  %p3423_p9 = scmp.lt.s32.totalorder %s3417_s26, %s3417_s26 }
  0x5b   :  { %p3424_p10 = por %p3423_p9, %p3422_p8 }
  0x5d   :  { %p3425_p11 = pnand %p3424_p10, %p3418_p7 }
  0x5f   :  { %3428 = shalt.err (!%p3425_p11)
}
  0x60   :  { %s4030_s28 = smov 256   ;;  %s3429_s1 = scalar_lea.hbm %s4012_s9, 4096 }
  0x61   :  { %66 = dma.hbm_to_vmem [thread:$0]  %s4007_s4, 4096, %s61_s27, [#allocation6], %s4030_s28, %s4030_s28, %s3507_s20  }
  0x62   :  { %p3430_p12 = scmp.ne.s32.totalorder %s4012_s9, %s3429_s1  ;;  %p3433_p13 = scmp.lt.u32.totalorder %s3429_s1, %s4012_s9 }
  0x64   :  { %p3435_p0 = pnand %p3433_p13, %p3430_p12 }
  0x66   :  { %3438 = shalt.err (!%p3435_p0)
}
  0x67   :  { %s3439_s19 = scalar_lea.vmem %s3679_s0, 4096  ;;  %p3444_p2 = scmp.lt.s32.totalorder %s3679_s0, %s3679_s0 }
  0x68   :  { %p3440_p1 = scmp.ne.s32.totalorder %s3679_s0, %s3439_s19  ;;  %p3445_p3 = scmp.lt.s32.totalorder %s3439_s19, %s3439_s19 }
  0x6a   :  { %p3446_p4 = por %p3445_p3, %p3444_p2 }
  0x6c   :  { %p3447_p5 = pnand %p3446_p4, %p3440_p1 }
  0x6e   :  { %3450 = shalt.err (!%p3447_p5)
}
  0x6f   :  { %s4031_s4 = smov 4   ;;  %s4032_s20 = smov 64  }
  0x70   :  { %96 = dma.hbm_to_vmem [thread:$0]  %s4012_s9, 4096, %s3679_s0, [#allocation9], %s4032_s20, %s4032_s20, %s4031_s4  }
  0x71   :  { %s3517_s26 = smov [#allocation13]   ;;  %s3451_s24 = scalar_lea.hbm %s4018_s15, 1024 }
  0x72   :  { %s122_s28 = sshll.u32 %s3517_s26, 4  ;;  %p3452_p6 = scmp.ne.s32.totalorder %s4018_s15, %s3451_s24  ;;  %s123_s28 = int_to_ptr.vmem [resolvable:$true] %s122_s28 }
  0x73   :  { %p3455_p7 = scmp.lt.u32.totalorder %s3451_s24, %s4018_s15 }
  0x75   :  { %p3457_p8 = pnand %p3455_p7, %p3452_p6 }
  0x77   :  { %3460 = shalt.err (!%p3457_p8)
}
  0x78   :  { %s3461_s30 = scalar_lea.vmem %s123_s28, 1024  ;;  %p3466_p10 = scmp.lt.s32.totalorder %s123_s28, %s123_s28 }
  0x79   :  { %p3462_p9 = scmp.ne.s32.totalorder %s123_s28, %s3461_s30  ;;  %p3467_p11 = scmp.lt.s32.totalorder %s3461_s30, %s3461_s30 }
  0x7b   :  { %p3468_p12 = por %p3467_p11, %p3466_p10 }
  0x7d   :  { %p3469_p13 = pnand %p3468_p12, %p3462_p9 }
  0x7f   :  { %3472 = shalt.err (!%p3469_p13)
}
  0x80   :  { %128 = dma.hbm_to_vmem [thread:$0]  %s4018_s15, 1024, %s123_s28, [#allocation12], %s4032_s20, %s4032_s20, %s4031_s4  }
  0x81   :  { %3495 = dma.done.wait [#allocation3], 256  }
  0x82   :  { %3496 = vsyncadd [#allocation3], 4294967040 }
  0x83   :  { %3497 = dma.done.wait [#allocation6], 8192  }
  0x84   :  { %3498 = vsyncadd [#allocation6], 4294959104 }
  0x85   :  { %3499 = dma.done.wait [#allocation9], 8192  }
  0x86   :  { %3500 = vsyncadd [#allocation9], 4294959104 }
  0x87   :  { %3501 = dma.done.wait [#allocation12], 2048  }
  0x88   :  { %3502 = vsyncadd [#allocation12], 4294965248  ;;  %v3731_v0 = vld [vmem:[#allocation2] sm:$0xff]  ;;  %v3733_v1 = vld [vmem:[#allocation2 + $0x8] sm:$0xff]  ;;  %v3518_v37 = vmov 0   ;;  %s4033_s19 = sld [smem:[#allocation21_spill]] }
  0x89   :  { %157 = vadd.xlane.f32.xlu0 %v3731_v0  ;;  %v163_v2 = vmul.f32 %v3731_v0, %v3731_v0  ;;  %v3087_v3 = vld [vmem:[#allocation5 + $0x4] ss:$16 sps:$4 sm:$0xff]   ;;  %v3089_v4 = vld [vmem:[#allocation5 + $0xc] ss:$16 sps:$4 sm:$0xff]   ;;  %v3091_v5 = vld [vmem:[#allocation5] ss:$16 sps:$4 sm:$0xff]   ;;  %v164_v6 = vmul.f32 %v3733_v1, %v3733_v1  ;;  %446 = vmatprep.mubr.bf16.mxu0 %v3518_v37 }
  0x8a   :  { %414 = vmatprep.subr.bf16.mxu0 %v3087_v3  ;;  %v3092_v7 = vld [vmem:[#allocation5 + $0x8] ss:$16 sps:$4 sm:$0xff]   ;;  %457 = vmatprep.subr.bf16.mxu1 %v3089_v4  ;;  %v3093_v8 = vld [vmem:[#allocation5 + $0x24] ss:$16 sps:$4 sm:$0xff]   ;;  %v3095_v9 = vld [vmem:[#allocation5 + $0x2c] ss:$16 sps:$4 sm:$0xff]  }
  0x8b   :  { %165 = vadd.xlane.f32.xlu1 %v163_v2  ;;  %415 = vmatpush1.bf16.msra.mxu0 %v3091_v5  ;;  %v3097_v10 = vld [vmem:[#allocation5 + $0x20] ss:$16 sps:$4 sm:$0xff]   ;;  %v3098_v11 = vld [vmem:[#allocation5 + $0x28] ss:$16 sps:$4 sm:$0xff]   ;;  %v3099_v12 = vld [vmem:[#allocation5 + $0x44] ss:$16 sps:$4 sm:$0xff]  }
  0x8c   :  { %458 = vmatpush1.bf16.msra.mxu1 %v3092_v7  ;;  %416 = vmatprep.subr.bf16.mxu0 %v3093_v8  ;;  %v3101_v13 = vld [vmem:[#allocation5 + $0x4c] ss:$16 sps:$4 sm:$0xff]   ;;  %v3103_v14 = vld [vmem:[#allocation5 + $0x40] ss:$16 sps:$4 sm:$0xff]   ;;  %v3104_v15 = vld [vmem:[#allocation5 + $0x48] ss:$16 sps:$4 sm:$0xff]  }
  0x8d   :  { %159 = vadd.xlane.f32.xlu0 %v3733_v1  ;;  %459 = vmatprep.subr.bf16.mxu1 %v3095_v9  ;;  %v3105_v16 = vld [vmem:[#allocation5 + $0x64] ss:$16 sps:$4 sm:$0xff]   ;;  %v3107_v17 = vld [vmem:[#allocation5 + $0x6c] ss:$16 sps:$4 sm:$0xff]   ;;  %v3109_v18 = vld [vmem:[#allocation5 + $0x60] ss:$16 sps:$4 sm:$0xff]  }
  0x8e   :  { %v3110_v19 = vld [vmem:[#allocation5 + $0x68] ss:$16 sps:$4 sm:$0xff]   ;;  %v3111_v20 = vld [vmem:[#allocation5 + $0x84] ss:$16 sps:$4 sm:$0xff]   ;;  %v3113_v21 = vld [vmem:[#allocation5 + $0x8c] ss:$16 sps:$4 sm:$0xff]   ;;  %489 = vmatprep.mubr.bf16.mxu1 %v3518_v37 }
  0x8f   :  { %167 = vadd.xlane.f32.xlu1 %v164_v6  ;;  %417 = vmatpush1.bf16.msra.mxu0 %v3097_v10  ;;  %v3115_v22 = vld [vmem:[#allocation5 + $0x80] ss:$16 sps:$4 sm:$0xff]   ;;  %v3116_v23 = vld [vmem:[#allocation5 + $0x88] ss:$16 sps:$4 sm:$0xff]   ;;  %v3117_v24 = vld [vmem:[#allocation5 + $0xa4] ss:$16 sps:$4 sm:$0xff]  }
  0x90   :  { %460 = vmatpush1.bf16.msra.mxu1 %v3098_v11  ;;  %418 = vmatprep.subr.bf16.mxu0 %v3099_v12  ;;  %v3119_v25 = vld [vmem:[#allocation5 + $0xac] ss:$16 sps:$4 sm:$0xff]   ;;  %v3121_v26 = vld [vmem:[#allocation5 + $0xa0] ss:$16 sps:$4 sm:$0xff]   ;;  %v3122_v27 = vld [vmem:[#allocation5 + $0xa8] ss:$16 sps:$4 sm:$0xff]  }
  0x91   :  { %461 = vmatprep.subr.bf16.mxu1 %v3101_v13  ;;  %v3123_v28 = vld [vmem:[#allocation5 + $0xc4] ss:$16 sps:$4 sm:$0xff]   ;;  %v3125_v29 = vld [vmem:[#allocation5 + $0xcc] ss:$16 sps:$4 sm:$0xff]   ;;  %v3127_v30 = vld [vmem:[#allocation5 + $0xc0] ss:$16 sps:$4 sm:$0xff]  }
  0x92   :  { %v3128_v31 = vld [vmem:[#allocation5 + $0xc8] ss:$16 sps:$4 sm:$0xff]   ;;  %v3129_v32 = vld [vmem:[#allocation5 + $0xe4] ss:$16 sps:$4 sm:$0xff]   ;;  %v3131_v33 = vld [vmem:[#allocation5 + $0xec] ss:$16 sps:$4 sm:$0xff]  }
  0x93   :  { %419 = vmatpush1.bf16.msra.mxu0 %v3103_v14  ;;  %v3133_v34 = vld [vmem:[#allocation5 + $0xe0] ss:$16 sps:$4 sm:$0xff]   ;;  %v3134_v35 = vld [vmem:[#allocation5 + $0xe8] ss:$16 sps:$4 sm:$0xff]   ;;  %v3137_v36 = vld [vmem:[#allocation7 + $0x4] ss:$16 sps:$4 sm:$0xff]  }
  0x94   :  { %462 = vmatpush1.bf16.msra.mxu1 %v3104_v15  ;;  %420 = vmatprep.subr.bf16.mxu0 %v3105_v16  ;;  %v3140_v38 = vld [vmem:[#allocation7 + $0xc] ss:$16 sps:$4 sm:$0xff]   ;;  %v2649_v56 = vld [vmem:[%s4033_s19] ss:$0 sm:$0xff]  ;;  %v3138_v3 = vld [vmem:[#allocation7 + $0x8] ss:$16 sps:$4 sm:$0xff]  }
  0x95   :  { %463 = vmatprep.subr.bf16.mxu1 %v3107_v17  ;;  %v2650_v61 = vld [vmem:[%s4005_s2] ss:$0 sm:$0xff]  ;;  %v3143_v5 = vld [vmem:[#allocation7 + $0x24] ss:$16 sps:$4 sm:$0xff]   ;;  %v3144_v7 = vld [vmem:[#allocation7 + $0x28] ss:$16 sps:$4 sm:$0xff]  }
  0x96   :  { %v3141_v6 = vld [vmem:[#allocation7 + $0x20] ss:$16 sps:$4 sm:$0xff]   ;;  %v3149_v8 = vld [vmem:[#allocation7 + $0x44] ss:$16 sps:$4 sm:$0xff]   ;;  %v3152_v9 = vld [vmem:[#allocation7 + $0x4c] ss:$16 sps:$4 sm:$0xff]  }
  0x97   :  { %421 = vmatpush1.bf16.msra.mxu0 %v3109_v18  ;;  %v3147_v10 = vld [vmem:[#allocation7 + $0x40] ss:$16 sps:$4 sm:$0xff]   ;;  %v3150_v11 = vld [vmem:[#allocation7 + $0x48] ss:$16 sps:$4 sm:$0xff]   ;;  %v3155_v12 = vld [vmem:[#allocation7 + $0x64] ss:$16 sps:$4 sm:$0xff]  }
  0x98   :  { %464 = vmatpush1.bf16.msra.mxu1 %v3110_v19  ;;  %422 = vmatprep.subr.bf16.mxu0 %v3111_v20  ;;  %v3158_v13 = vld [vmem:[#allocation7 + $0x6c] ss:$16 sps:$4 sm:$0xff]   ;;  %v3153_v14 = vld [vmem:[#allocation7 + $0x60] ss:$16 sps:$4 sm:$0xff]   ;;  %v3156_v15 = vld [vmem:[#allocation7 + $0x68] ss:$16 sps:$4 sm:$0xff]  }
  0x99   :  { %465 = vmatprep.subr.bf16.mxu1 %v3113_v21  ;;  %v3161_v16 = vld [vmem:[#allocation7 + $0x84] ss:$16 sps:$4 sm:$0xff]   ;;  %v3164_v17 = vld [vmem:[#allocation7 + $0x8c] ss:$16 sps:$4 sm:$0xff]   ;;  %v3159_v18 = vld [vmem:[#allocation7 + $0x80] ss:$16 sps:$4 sm:$0xff]  }
  0x9a   :  { %v3162_v19 = vld [vmem:[#allocation7 + $0x88] ss:$16 sps:$4 sm:$0xff]   ;;  %v3167_v20 = vld [vmem:[#allocation7 + $0xa4] ss:$16 sps:$4 sm:$0xff]   ;;  %v3170_v21 = vld [vmem:[#allocation7 + $0xac] ss:$16 sps:$4 sm:$0xff]  }
  0x9b   :  { %423 = vmatpush1.bf16.msra.mxu0 %v3115_v22  ;;  %v3165_v22 = vld [vmem:[#allocation7 + $0xa0] ss:$16 sps:$4 sm:$0xff]   ;;  %vm3520_vm0 = vmmov 0   ;;  %vm1276_vm1 = vcmask 1043456   ;;  %vm1248_vm2 = vcmask 64512   ;;  %s3521_s3 = smov [#allocation14]  }
  0x9c   :  { %466 = vmatpush1.bf16.msra.mxu1 %v3116_v23  ;;  %424 = vmatprep.subr.bf16.mxu0 %v3117_v24  ;;  %v3168_v23 = vld [vmem:[#allocation7 + $0xa8] ss:$16 sps:$4 sm:$0xff]   ;;  %v3173_v24 = vld [vmem:[#allocation7 + $0xc4] ss:$16 sps:$4 sm:$0xff]  }
  0x9d   :  { %467 = vmatprep.subr.bf16.mxu1 %v3119_v25  ;;  %v3176_v25 = vld [vmem:[#allocation7 + $0xcc] ss:$16 sps:$4 sm:$0xff]  }
  0x9f   :  { %425 = vmatpush1.bf16.msra.mxu0 %v3121_v26  ;;  %v3171_v26 = vld [vmem:[#allocation7 + $0xc0] ss:$16 sps:$4 sm:$0xff]  }
  0xa0   :  { %468 = vmatpush1.bf16.msra.mxu1 %v3122_v27  ;;  %426 = vmatprep.subr.bf16.mxu0 %v3123_v28  ;;  %v3174_v27 = vld [vmem:[#allocation7 + $0xc8] ss:$16 sps:$4 sm:$0xff]   ;;  %v3179_v28 = vld [vmem:[#allocation7 + $0xe4] ss:$16 sps:$4 sm:$0xff]  }
  0xa1   :  { %469 = vmatprep.subr.bf16.mxu1 %v3125_v29  ;;  %v3182_v29 = vld [vmem:[#allocation7 + $0xec] ss:$16 sps:$4 sm:$0xff]  }
  0xa3   :  { %427 = vmatpush1.bf16.msra.mxu0 %v3127_v30  ;;  %v3177_v30 = vld [vmem:[#allocation7 + $0xe0] ss:$16 sps:$4 sm:$0xff]  }
  0xa4   :  { %470 = vmatpush1.bf16.msra.mxu1 %v3128_v31  ;;  %428 = vmatprep.subr.bf16.mxu0 %v3129_v32  ;;  %v3180_v31 = vld [vmem:[#allocation7 + $0xe8] ss:$16 sps:$4 sm:$0xff]   ;;  %v3185_v32 = vld [vmem:[#allocation8 + $0x4] ss:$16 sps:$4 sm:$0xff]  }
  0xa5   :  { %471 = vmatprep.subr.bf16.mxu1 %v3131_v33  ;;  %v3188_v33 = vld [vmem:[#allocation8 + $0xc] ss:$16 sps:$4 sm:$0xff]  }
  0xa7   :  { %429 = vmatpush1.bf16.msra.mxu0 %v3133_v34  ;;  %v3183_v34 = vld [vmem:[#allocation8] ss:$16 sps:$4 sm:$0xff]  }
  0xa8   :  { %472 = vmatpush1.bf16.msra.mxu1 %v3134_v35  ;;  %714 = vmatprep.subr.bf16.mxu0 %v3137_v36  ;;  %v3186_v35 = vld [vmem:[#allocation8 + $0x8] ss:$16 sps:$4 sm:$0xff]   ;;  %v3191_v36 = vld [vmem:[#allocation8 + $0x24] ss:$16 sps:$4 sm:$0xff]  }
  0xa9   :  { %757 = vmatprep.subr.bf16.mxu1 %v3140_v38  ;;  %v3194_v38 = vld [vmem:[#allocation8 + $0x2c] ss:$16 sps:$4 sm:$0xff]  }
 0x116   :  { %v158_v39 = vpop.xlane.xlu0 %157 }
 0x117   :  { %v161_v40 = vmul.f32 0.03125, %v158_v39  ;;  %v3189_v39 = vld [vmem:[#allocation8 + $0x20] ss:$16 sps:$4 sm:$0xff]  }
 0x118   :  { %v166_v41 = vpop.xlane.xlu1 %165 }
 0x119   :  { %v171_v42 = vmul.f32 %v161_v40, %v161_v40  ;;  %v169_v43 = vmul.f32 0.03125, %v166_v41  ;;  %v175_v53 = vsub.f32 %v3731_v0, %v161_v40  ;;  %v3135_v0 = vld [vmem:[#allocation7] ss:$16 sps:$4 sm:$0xff]   ;;  %v3192_v40 = vld [vmem:[#allocation8 + $0x28] ss:$16 sps:$4 sm:$0xff]  }
 0x11a   :  { %v160_v44 = vpop.xlane.xlu0 %159  ;;  %v3197_v41 = vld [vmem:[#allocation8 + $0x44] ss:$16 sps:$4 sm:$0xff]  }
 0x11b   :  { %v173_v45 = vsub.f32 %v169_v43, %v171_v42  ;;  %v162_v46 = vmul.f32 0.03125, %v160_v44  ;;  %v3200_v42 = vld [vmem:[#allocation8 + $0x4c] ss:$16 sps:$4 sm:$0xff]   ;;  %v3195_v43 = vld [vmem:[#allocation8 + $0x40] ss:$16 sps:$4 sm:$0xff]  }
 0x11c   :  { %v168_v47 = vpop.xlane.xlu1 %167  ;;  %v3198_v44 = vld [vmem:[#allocation8 + $0x48] ss:$16 sps:$4 sm:$0xff]  }
 0x11d   :  { %v177_v48 = vadd.f32 1e-05, %v173_v45  ;;  %v172_v49 = vmul.f32 %v162_v46, %v162_v46  ;;  %v170_v50 = vmul.f32 0.03125, %v168_v47  ;;  %v176_v57 = vsub.f32 %v3733_v1, %v162_v46  ;;  %v3146_v1 = vld [vmem:[#allocation7 + $0x2c] ss:$16 sps:$4 sm:$0xff]  }
 0x11e   :  { %v3203_v45 = vld [vmem:[#allocation8 + $0x64] ss:$16 sps:$4 sm:$0xff]   ;;  %v3206_v46 = vld [vmem:[#allocation8 + $0x6c] ss:$16 sps:$4 sm:$0xff]   ;;  %v3201_v47 = vld [vmem:[#allocation8 + $0x60] ss:$16 sps:$4 sm:$0xff]  }
 0x11f   :  { %3279 = vrsqrt.f32 %v177_v48  ;;  %v174_v51 = vsub.f32 %v170_v50, %v172_v49  ;;  %v3204_v48 = vld [vmem:[#allocation8 + $0x68] ss:$16 sps:$4 sm:$0xff]   ;;  %v3209_v49 = vld [vmem:[#allocation8 + $0x84] ss:$16 sps:$4 sm:$0xff]   ;;  %v3212_v50 = vld [vmem:[#allocation8 + $0x8c] ss:$16 sps:$4 sm:$0xff]  }
 0x121   :  { %v178_v52 = vadd.f32 1e-05, %v174_v51  ;;  %v3207_v51 = vld [vmem:[#allocation8 + $0x80] ss:$16 sps:$4 sm:$0xff]  }
 0x123   :  { %3281 = vrsqrt.f32 %v178_v52  ;;  %v3215_v52 = vld [vmem:[#allocation8 + $0xa4] ss:$16 sps:$4 sm:$0xff]  }
 0x129   :  { %v3280_v54 = vpop.eup %3279 }
 0x12a   :  { %v181_v55 = vmul.f32 %v3280_v54, %v175_v53  ;;  %v3218_v53 = vld [vmem:[#allocation8 + $0xac] ss:$16 sps:$4 sm:$0xff]   ;;  %v3213_v54 = vld [vmem:[#allocation8 + $0xa0] ss:$16 sps:$4 sm:$0xff]  }
 0x12c   :  { %v189_v59 = vmul.f32 %v2649_v56, %v181_v55  ;;  %v3216_v55 = vld [vmem:[#allocation8 + $0xa8] ss:$16 sps:$4 sm:$0xff]  }
 0x12d   :  { %v3282_v58 = vpop.eup %3281 }
 0x12e   :  { %v182_v60 = vmul.f32 %v3282_v58, %v176_v57  ;;  %v3751_v63 = vadd.f32 %v2650_v61, %v189_v59  ;;  %v3224_v57 = vld [vmem:[#allocation8 + $0xcc] ss:$16 sps:$4 sm:$0xff]   ;;  %v3219_v58 = vld [vmem:[#allocation8 + $0xc0] ss:$16 sps:$4 sm:$0xff]   ;;  %v3222_v59 = vld [vmem:[#allocation8 + $0xc8] ss:$16 sps:$4 sm:$0xff]  }
 0x130   :  { %v190_v62 = vmul.f32 %v2649_v56, %v182_v60  ;;  %v3221_v56 = vld [vmem:[#allocation8 + $0xc4] ss:$16 sps:$4 sm:$0xff]  }
 0x131   :  { %v3227_v60 = vld [vmem:[#allocation8 + $0xe4] ss:$16 sps:$4 sm:$0xff]  }
 0x132   :  { %v3753_v2 = vadd.f32 %v2650_v61, %v190_v62  ;;  %v3230_v61 = vld [vmem:[#allocation8 + $0xec] ss:$16 sps:$4 sm:$0xff]   ;;  %v3225_v62 = vld [vmem:[#allocation8 + $0xe0] ss:$16 sps:$4 sm:$0xff]  }
 0x134   :  { %v3757_v4 = vpack.c.bf16 %v3753_v2, %v3751_v63 }
 0x136   :  { %447 = vmatmul.mubr.bf16.vlgmr.msra.gmra.mrb[0].mxu0 %v3757_v4  ;;  %490 = vmatmul.mubr.bf16.vlgmr.msra.gmra.mrb[0].mxu1 %v3757_v4 }
 0x137   :  { %715 = vmatpush1.bf16.msra.mxu0 %v3135_v0  ;;  %758 = vmatpush1.bf16.msra.mxu1 %v3138_v3  ;;  %v3228_v0 = vld [vmem:[#allocation8 + $0xe8] ss:$16 sps:$4 sm:$0xff]   ;;  %v3519_v3 = vmov 0.0  }
 0x138   :  { %716 = vmatprep.subr.bf16.mxu0 %v3143_v5  ;;  %759 = vmatprep.subr.bf16.mxu1 %v3146_v1  ;;  %v234_v5 = vlaneseq }
 0x139   :  { %746 = vmatprep.mubr.bf16.mxu0 %v3518_v37  ;;  %789 = vmatprep.mubr.bf16.mxu1 %v3518_v37 }
 0x13a   :  { %v235_v1 = vshrl.u32 %v234_v5, 7 }
 0x13b   :  { %717 = vmatpush1.bf16.msra.mxu0 %v3141_v6  ;;  %760 = vmatpush1.bf16.msra.mxu1 %v3144_v7 }
 0x13c   :  { %718 = vmatprep.subr.bf16.mxu0 %v3149_v8  ;;  %761 = vmatprep.subr.bf16.mxu1 %v3152_v9  ;;  %v3775_v6 = vsub.s32 0, %v235_v1  ;;  %v3777_v7 = vsub.s32 2, %v235_v1  ;;  %v240_v8 = vsub.s32 1, %v235_v1  ;;  %v248_v9 = vsub.s32 3, %v235_v1 }
 0x13f   :  { %719 = vmatpush1.bf16.msra.mxu0 %v3147_v10  ;;  %762 = vmatpush1.bf16.msra.mxu1 %v3150_v11 }
 0x140   :  { %720 = vmatprep.subr.bf16.mxu0 %v3155_v12  ;;  %763 = vmatprep.subr.bf16.mxu1 %v3158_v13 }
 0x143   :  { %721 = vmatpush1.bf16.msra.mxu0 %v3153_v14  ;;  %764 = vmatpush1.bf16.msra.mxu1 %v3156_v15 }
 0x144   :  { %722 = vmatprep.subr.bf16.mxu0 %v3161_v16  ;;  %765 = vmatprep.subr.bf16.mxu1 %v3164_v17 }
 0x147   :  { %723 = vmatpush1.bf16.msra.mxu0 %v3159_v18  ;;  %766 = vmatpush1.bf16.msra.mxu1 %v3162_v19 }
 0x148   :  { %724 = vmatprep.subr.bf16.mxu0 %v3167_v20  ;;  %767 = vmatprep.subr.bf16.mxu1 %v3170_v21 }
 0x14b   :  { %725 = vmatpush1.bf16.msra.mxu0 %v3165_v22  ;;  %768 = vmatpush1.bf16.msra.mxu1 %v3168_v23 }
 0x14c   :  { %726 = vmatprep.subr.bf16.mxu0 %v3173_v24  ;;  %769 = vmatprep.subr.bf16.mxu1 %v3176_v25 }
 0x14f   :  { %727 = vmatpush1.bf16.msra.mxu0 %v3171_v26  ;;  %770 = vmatpush1.bf16.msra.mxu1 %v3174_v27 }
 0x150   :  { %728 = vmatprep.subr.bf16.mxu0 %v3179_v28  ;;  %771 = vmatprep.subr.bf16.mxu1 %v3182_v29 }
 0x153   :  { %729 = vmatpush1.bf16.msra.mxu0 %v3177_v30  ;;  %772 = vmatpush1.bf16.msra.mxu1 %v3180_v31 }
 0x154   :  { %1014 = vmatprep.subr.bf16.mxu0 %v3185_v32  ;;  %1057 = vmatprep.subr.bf16.mxu1 %v3188_v33 }
 0x156   :  { %747 = vmatmul.mubr.bf16.vlgmr.msra.gmra.mrb[4].mxu0 %v3757_v4  ;;  %790 = vmatmul.mubr.bf16.vlgmr.msra.gmra.mrb[4].mxu1 %v3757_v4 }
 0x157   :  { %1015 = vmatpush1.bf16.msra.mxu0 %v3183_v34  ;;  %1058 = vmatpush1.bf16.msra.mxu1 %v3186_v35  ;;  %v532_v34 = vld [vmem:[%s4010_s7] sm:$0xf] }
 0x158   :  { %1016 = vmatprep.subr.bf16.mxu0 %v3191_v36  ;;  %1059 = vmatprep.subr.bf16.mxu1 %v3194_v38  ;;  %v537_v35 = vrot.slane %v532_v34, %v3775_v6  ;;  %v545_v36 = vrot.slane %v532_v34, %v3777_v7  ;;  %v541_v38 = vrot.slane %v532_v34, %v240_v8 }
 0x159   :  { %1046 = vmatprep.mubr.bf16.mxu0 %v3518_v37  ;;  %1089 = vmatprep.mubr.bf16.mxu1 %v3518_v37  ;;  %v3210_v37 = vld [vmem:[#allocation8 + $0x88] ss:$16 sps:$4 sm:$0xff]  }
 0x15b   :  { %1017 = vmatpush1.bf16.msra.mxu0 %v3189_v39  ;;  %1060 = vmatpush1.bf16.msra.mxu1 %v3192_v40  ;;  %v549_v39 = vrot.slane %v532_v34, %v248_v9 }
 0x15c   :  { %1018 = vmatprep.subr.bf16.mxu0 %v3197_v41  ;;  %1061 = vmatprep.subr.bf16.mxu1 %v3200_v42 }
 0x15f   :  { %1019 = vmatpush1.bf16.msra.mxu0 %v3195_v43  ;;  %1062 = vmatpush1.bf16.msra.mxu1 %v3198_v44 }
 0x160   :  { %1020 = vmatprep.subr.bf16.mxu0 %v3203_v45  ;;  %1063 = vmatprep.subr.bf16.mxu1 %v3206_v46 }
 0x163   :  { %1021 = vmatpush1.bf16.msra.mxu0 %v3201_v47  ;;  %1064 = vmatpush1.bf16.msra.mxu1 %v3204_v48 }
 0x164   :  { %1022 = vmatprep.subr.bf16.mxu0 %v3209_v49  ;;  %1065 = vmatprep.subr.bf16.mxu1 %v3212_v50 }
 0x167   :  { %1023 = vmatpush1.bf16.msra.mxu0 %v3207_v51  ;;  %1066 = vmatpush1.bf16.msra.mxu1 %v3210_v37 }
 0x168   :  { %1024 = vmatprep.subr.bf16.mxu0 %v3215_v52  ;;  %1067 = vmatprep.subr.bf16.mxu1 %v3218_v53 }
 0x16b   :  { %1025 = vmatpush1.bf16.msra.mxu0 %v3213_v54  ;;  %1068 = vmatpush1.bf16.msra.mxu1 %v3216_v55 }
 0x16c   :  { %1026 = vmatprep.subr.bf16.mxu0 %v3221_v56  ;;  %1069 = vmatprep.subr.bf16.mxu1 %v3224_v57 }
 0x16f   :  { %1027 = vmatpush1.bf16.msra.mxu0 %v3219_v58  ;;  %1070 = vmatpush1.bf16.msra.mxu1 %v3222_v59  ;;  %v832_v59 = vld [vmem:[%s4011_s8] sm:$0xf] }
 0x170   :  { %1028 = vmatprep.subr.bf16.mxu0 %v3227_v60  ;;  %1071 = vmatprep.subr.bf16.mxu1 %v3230_v61  ;;  %v837_v60 = vrot.slane %v832_v59, %v3775_v6  ;;  %v845_v61 = vrot.slane %v832_v59, %v3777_v7 }
 0x173   :  { %1029 = vmatpush1.bf16.msra.mxu0 %v3225_v62  ;;  %1072 = vmatpush1.bf16.msra.mxu1 %v3228_v0  ;;  %v841_v62 = vrot.slane %v832_v59, %v240_v8  ;;  %v849_v0 = vrot.slane %v832_v59, %v248_v9 }
 0x174   :  { %2934 = vmatprep.subr.bf16.mxu0 %v3519_v3  ;;  %2940 = vmatprep.subr.bf16.mxu1 %v3519_v3 }
 0x176   :  { %1047 = vmatmul.mubr.bf16.vlgmr.msra.gmra.mrb[8].mxu0 %v3757_v4  ;;  %1090 = vmatmul.mubr.bf16.vlgmr.msra.gmra.mrb[8].mxu1 %v3757_v4  ;;  %v232_v4 = vld [vmem:[%s4009_s6] sm:$0xf] }
 0x177   :  { %2936 = vmatprep.mubr.msk.bf16.mxu0 %vm3520_vm0, %v3519_v3  ;;  %2942 = vmatprep.mubr.msk.bf16.mxu1 %vm3520_vm0, %v3519_v3  ;;  %v237_v10 = vrot.slane %v232_v4, %v3775_v6  ;;  %v245_v11 = vrot.slane %v232_v4, %v3777_v7  ;;  %v241_v12 = vrot.slane %v232_v4, %v240_v8 }
 0x178   :  { %v249_v13 = vrot.slane %v232_v4, %v248_v9 }
 0x209   :  { %v448_v14 = vpop.f32.mrb[0].mxu0  ;;  %v491_v15 = vpop.f32.mrb[0].mxu1 }
 0x20a   :  { %v449_v16 = vadd.f32 %v448_v14, %v237_v10  ;;  %v492_v17 = vadd.f32 %v491_v15, %v245_v11  ;;  %v450_v18 = vpop.f32.mrb[1].mxu0  ;;  %v493_v19 = vpop.f32.mrb[1].mxu1 }
 0x20b   :  { %v451_v20 = vadd.f32 %v450_v18, %v241_v12  ;;  %v494_v21 = vadd.f32 %v493_v19, %v249_v13  ;;  %v452_v22 = vpop.f32.mrb[2].mxu0  ;;  %v495_v23 = vpop.f32.mrb[2].mxu1 }
 0x20c   :  { %v453_v24 = vadd.f32 %v452_v22, %v237_v10  ;;  %v496_v25 = vadd.f32 %v495_v23, %v245_v11  ;;  %v454_v26 = vpop.f32.mrb[3].mxu0  ;;  %v497_v27 = vpop.f32.mrb[3].mxu1 }
 0x20d   :  { %v3784_v28 = vpack.c.bf16 %v451_v20, %v449_v16  ;;  %v3786_v29 = vpack.c.bf16 %v494_v21, %v492_v17  ;;  %v455_v30 = vadd.f32 %v454_v26, %v241_v12  ;;  %v498_v31 = vadd.f32 %v497_v27, %v249_v13 }
 0x20f   :  { %v3788_v32 = vpack.c.bf16 %v455_v30, %v453_v24  ;;  %v3790_v33 = vpack.c.bf16 %v498_v31, %v496_v25 }
 0x229   :  { %v748_v40 = vpop.f32.mrb[4].mxu0  ;;  %v791_v41 = vpop.f32.mrb[4].mxu1 }
 0x22a   :  { %v749_v42 = vadd.f32 %v748_v40, %v537_v35  ;;  %v792_v43 = vadd.f32 %v791_v41, %v545_v36  ;;  %v750_v44 = vpop.f32.mrb[5].mxu0  ;;  %v793_v45 = vpop.f32.mrb[5].mxu1 }
 0x22b   :  { %v751_v46 = vadd.f32 %v750_v44, %v541_v38  ;;  %v794_v47 = vadd.f32 %v793_v45, %v549_v39  ;;  %v752_v48 = vpop.f32.mrb[6].mxu0  ;;  %v795_v49 = vpop.f32.mrb[6].mxu1 }
 0x22c   :  { %v753_v50 = vadd.f32 %v752_v48, %v537_v35  ;;  %v796_v51 = vadd.f32 %v795_v49, %v545_v36  ;;  %v754_v37 = vpop.f32.mrb[7].mxu0  ;;  %v797_v52 = vpop.f32.mrb[7].mxu1 }
 0x22d   :  { %v3797_v53 = vpack.c.bf16 %v751_v46, %v749_v42  ;;  %v3799_v54 = vpack.c.bf16 %v794_v47, %v792_v43  ;;  %v755_v55 = vadd.f32 %v754_v37, %v541_v38  ;;  %v798_v56 = vadd.f32 %v797_v52, %v549_v39 }
 0x22f   :  { %v3801_v57 = vpack.c.bf16 %v755_v55, %v753_v50  ;;  %v3803_v58 = vpack.c.bf16 %v798_v56, %v796_v51  ;;  %2935 = vmatpush3.bf16.xpose.msra.mxu0 %v3797_v53 }
 0x230   :  { %2946 = vmatprep.subr.bf16.mxu0 %v3519_v3 }
 0x231   :  { %2941 = vmatpush3.bf16.xpose.msra.mxu1 %v3801_v57 }
 0x232   :  { %2952 = vmatprep.subr.bf16.mxu1 %v3519_v3 }
 0x236   :  { %2937 = vmatmul.mubr.bf16.vlgmr.msra.gmra.mrb[12].mxu0 %v3784_v28 }
 0x237   :  { %2948 = vmatprep.mubr.msk.bf16.mxu0 %vm3520_vm0, %v3519_v3 }
 0x238   :  { %2943 = vmatmul.mubr.bf16.vlgmr.msra.gmra.mrb[12].mxu1 %v3788_v32 }
 0x239   :  { %2954 = vmatprep.mubr.msk.bf16.mxu1 %vm3520_vm0, %v3519_v3 }
 0x249   :  { %v1048_v5 = vpop.f32.mrb[8].mxu0  ;;  %v1091_v1 = vpop.f32.mrb[8].mxu1 }
 0x24a   :  { %v1049_v4 = vadd.f32 %v1048_v5, %v837_v60  ;;  %v1092_v10 = vadd.f32 %v1091_v1, %v845_v61  ;;  %v1050_v11 = vpop.f32.mrb[9].mxu0  ;;  %v1093_v12 = vpop.f32.mrb[9].mxu1 }
 0x24b   :  { %v1051_v13 = vadd.f32 %v1050_v11, %v841_v62  ;;  %v1094_v14 = vadd.f32 %v1093_v12, %v849_v0  ;;  %v1052_v15 = vpop.f32.mrb[10].mxu0  ;;  %v1095_v16 = vpop.f32.mrb[10].mxu1 }
 0x24c   :  { %v1053_v17 = vadd.f32 %v1052_v15, %v837_v60  ;;  %v1096_v18 = vadd.f32 %v1095_v16, %v845_v61  ;;  %v1054_v19 = vpop.f32.mrb[11].mxu0  ;;  %v1097_v20 = vpop.f32.mrb[11].mxu1  ;;  %v1414_v15 = vrot.slane %v3801_v57, 4  ;;  %v1412_v16 = vrot.slane %v3788_v32, 4 }
 0x24d   :  { %v2832_v6 = vpack.c.bf16 %v1051_v13, %v1049_v4  ;;  %v2833_v21 = vpack.c.bf16 %v1094_v14, %v1092_v10  ;;  %v1055_v7 = vadd.f32 %v1054_v19, %v841_v62  ;;  %v1098_v8 = vadd.f32 %v1097_v20, %v849_v0 }
 0x24e   :  { %v1370_v13 = vrot.slane %v3797_v53, 4  ;;  %v1368_v53 = vrot.slane %v3784_v28, 4 }
 0x24f   :  { %v1480_v9 = vrot.slane %v2832_v6, 4  ;;  %v1886_v22 = vrot.slane %v2833_v21, 4  ;;  %v2834_v23 = vpack.c.bf16 %v1055_v7, %v1053_v17  ;;  %v2835_v24 = vpack.c.bf16 %v1098_v8, %v1096_v18 }
 0x250   :  { %v1278_v25 = vsel %vm1276_vm1, %v2832_v6, 0  ;;  %v3822_v26 = vsel %vm1276_vm1, %v2833_v21, 0 }
 0x251   :  { %v1527_v27 = vrot.slane %v2834_v23, 4  ;;  %v1933_v30 = vrot.slane %v2835_v24, 4  ;;  %2947 = vmatpush3.bf16.msra.mxu0 %v1278_v25  ;;  %v1324_v31 = vsel %vm1276_vm1, %v2834_v23, 0  ;;  %v1485_v34 = vsel %vm1276_vm1, %v1480_v9, 0 }
 0x252   :  { %2953 = vmatpush3.bf16.msra.mxu1 %v1324_v31  ;;  %2958 = vmatprep.subr.bf16.mxu0 %v3519_v3  ;;  %v3828_v35 = vsel %vm1276_vm1, %v2835_v24, 0  ;;  %v3831_v36 = vsel %vm1276_vm1, %v1886_v22, 0 }
 0x253   :  { %2964 = vmatprep.subr.bf16.mxu1 %v3519_v3  ;;  %v1532_v38 = vsel %vm1276_vm1, %v1527_v27, 0  ;;  %v3836_v39 = vsel %vm1276_vm1, %v1933_v30, 0 }
 0x309   :  { %v1202_v40 = vpop.f32.mrb[12].mxu0 }
 0x30a   :  { %v2938_v41 = vpop.f32.mrb[13].mxu0  ;;  %v1249_v42 = vsel %vm1248_vm2, %v1202_v40, -inf }
 0x30b   :  { %v1242_v43 = vpop.f32.mrb[12].mxu1  ;;  %1250 = vmax.xlane.f32.xlu0 %v1249_v42  ;;  %v1205_v44 = vpop.f32.mrb[14].mxu0 }
 0x30c   :  { %v2939_v45 = vpop.f32.mrb[15].mxu0  ;;  %v2944_v46 = vpop.f32.mrb[13].mxu1  ;;  %v1252_v47 = vsel %vm1248_vm2, %v1242_v43, -inf }
 0x30d   :  { %1253 = vmax.xlane.f32.xlu1 %v1252_v47  ;;  %v1245_v48 = vpop.f32.mrb[14].mxu1 }
 0x30e   :  { %v2945_v49 = vpop.f32.mrb[15].mxu1 }
 0x398   :  { %v1251_v50 = vpop.xlane.xlu0 %1250 }
 0x399   :  { %v1255_v51 = vsub.f32 %v1202_v40, %v1251_v50 }
 0x39a   :  { %v1254_v37 = vpop.xlane.xlu1 %1253 }
 0x39b   :  { %v1257_v52 = vmul.f32 1.442695, %v1255_v51  ;;  %v1256_v55 = vsub.f32 %v1242_v43, %v1254_v37 }
 0x39d   :  { %3283 = vpow2.f32 %v1257_v52  ;;  %v1259_v56 = vmul.f32 1.442695, %v1256_v55 }
 0x39f   :  { %3285 = vpow2.f32 %v1259_v56 }
 0x3a7   :  { %v3284_v59 = vpop.eup %3283 }
 0x3a8   :  { %v1261_v60 = vsel %vm1248_vm2, %v3284_v59, 0.0 }
 0x3a9   :  { %v3286_v61 = vpop.eup %3285  ;;  %1262 = vadd.xlane.f32.xlu0 %v1261_v60 }
 0x3aa   :  { %v1264_v62 = vsel %vm1248_vm2, %v3286_v61, 0.0 }
 0x3ab   :  { %1265 = vadd.xlane.f32.xlu1 %v1264_v62 }
 0x436   :  { %v1263_v0 = vpop.xlane.xlu0 %1262 }
 0x437   :  { %3287 = vrcp.f32 %v1263_v0 }
 0x438   :  { %v1266_v5 = vpop.xlane.xlu1 %1265 }
 0x439   :  { %3289 = vrcp.f32 %v1266_v5 }
 0x441   :  { %v3288_v1 = vpop.eup %3287 }
 0x442   :  { %v1269_v4 = vmul.f32 %v3288_v1, %v3284_v59 }
 0x443   :  { %v3290_v10 = vpop.eup %3289 }
 0x444   :  { %v1270_v11 = vmul.f32 %v3290_v10, %v3286_v61  ;;  %v1271_v12 = vpack.c.bf16 %v1269_v4, %v1269_v4 }
 0x446   :  { %2949 = vmatmul.mubr.msk.bf16.vlgmr.msra.gmra.mrb[16].mxu0 %vm1248_vm2, %v1271_v12  ;;  %v1272_v14 = vpack.c.bf16 %v1270_v11, %v1270_v11 }
 0x447   :  { %2959 = vmatpush3.bf16.xpose.msra.mxu0 %v1370_v13  ;;  %2960 = vmatprep.mubr.msk.bf16.mxu0 %vm3520_vm0, %v3519_v3 }
 0x448   :  { %2955 = vmatmul.mubr.msk.bf16.vlgmr.msra.gmra.mrb[16].mxu1 %vm1248_vm2, %v1272_v14  ;;  %2970 = vmatprep.subr.bf16.mxu0 %v3519_v3 }
 0x449   :  { %2965 = vmatpush3.bf16.xpose.msra.mxu1 %v1414_v15  ;;  %2966 = vmatprep.mubr.msk.bf16.mxu1 %vm3520_vm0, %v3519_v3 }
 0x44a   :  { %2976 = vmatprep.subr.bf16.mxu1 %v3519_v3 }
 0x44e   :  { %2961 = vmatmul.mubr.bf16.vlgmr.msra.gmra.mrb[20].mxu0 %v1368_v53 }
 0x44f   :  { %2971 = vmatpush3.bf16.msra.mxu0 %v1485_v34  ;;  %2972 = vmatprep.mubr.msk.bf16.mxu0 %vm3520_vm0, %v3519_v3 }
 0x450   :  { %2967 = vmatmul.mubr.bf16.vlgmr.msra.gmra.mrb[20].mxu1 %v1412_v16  ;;  %2982 = vmatprep.subr.bf16.mxu0 %v3519_v3 }
 0x451   :  { %2977 = vmatpush3.bf16.msra.mxu1 %v1532_v38  ;;  %2978 = vmatprep.mubr.msk.bf16.mxu1 %vm3520_vm0, %v3519_v3 }
 0x452   :  { %2988 = vmatprep.subr.bf16.mxu1 %v3519_v3 }
 0x519   :  { %v3860_v57 = vpop.f32.mrb[16].mxu0 }
 0x51a   :  { %v2950_v17 = vpop.f32.mrb[17].mxu0 }
 0x51b   :  { %v1317_v28 = vpop.f32.mrb[18].mxu0  ;;  %v3862_v18 = vpop.f32.mrb[16].mxu1 }
 0x51c   :  { %v2836_v32 = vpack.c.bf16 %v3862_v18, %v3860_v57  ;;  %v2951_v19 = vpop.f32.mrb[19].mxu0  ;;  %v2956_v20 = vpop.f32.mrb[17].mxu1 }
 0x51d   :  { %v1363_v6 = vpop.f32.mrb[18].mxu1 }
 0x51e   :  { %v2957_v21 = vpop.f32.mrb[19].mxu1 }
 0x521   :  { %v1406_v7 = vpop.f32.mrb[20].mxu0 }
 0x522   :  { %v2962_v8 = vpop.f32.mrb[21].mxu0  ;;  %v1456_v9 = vsel %vm1248_vm2, %v1406_v7, -inf }
 0x523   :  { %v1450_v22 = vpop.f32.mrb[20].mxu1  ;;  %1457 = vmax.xlane.f32.xlu0 %v1456_v9  ;;  %v1409_v23 = vpop.f32.mrb[22].mxu0 }
 0x524   :  { %v2963_v24 = vpop.f32.mrb[23].mxu0  ;;  %v2968_v25 = vpop.f32.mrb[21].mxu1  ;;  %v1459_v27 = vsel %vm1248_vm2, %v1450_v22, -inf }
 0x525   :  { %1460 = vmax.xlane.f32.xlu1 %v1459_v27  ;;  %v1453_v30 = vpop.f32.mrb[22].mxu1 }
 0x526   :  { %v2969_v31 = vpop.f32.mrb[23].mxu1 }
 0x5b0   :  { %v1458_v34 = vpop.xlane.xlu0 %1457 }
 0x5b1   :  { %v1462_v38 = vsub.f32 %v1406_v7, %v1458_v34 }
 0x5b2   :  { %v1461_v40 = vpop.xlane.xlu1 %1460 }
 0x5b3   :  { %v1464_v41 = vmul.f32 1.442695, %v1462_v38  ;;  %v1463_v42 = vsub.f32 %v1450_v22, %v1461_v40  ;;  %v1776_v40 = vrot.slane %v3799_v54, 4 }
 0x5b5   :  { %3291 = vpow2.f32 %v1464_v41  ;;  %v1466_v43 = vmul.f32 1.442695, %v1463_v42  ;;  %v1820_v42 = vrot.slane %v3803_v58, 4 }
 0x5b7   :  { %3293 = vpow2.f32 %v1466_v43  ;;  %v1818_v43 = vrot.slane %v3790_v33, 4 }
 0x5bf   :  { %v3292_v44 = vpop.eup %3291 }
 0x5c0   :  { %v1468_v45 = vsel %vm1248_vm2, %v3292_v44, 0.0 }
 0x5c1   :  { %v3294_v46 = vpop.eup %3293  ;;  %1469 = vadd.xlane.f32.xlu0 %v1468_v45 }
 0x5c2   :  { %v1471_v47 = vsel %vm1248_vm2, %v3294_v46, 0.0 }
 0x5c3   :  { %1472 = vadd.xlane.f32.xlu1 %v1471_v47 }
 0x64e   :  { %v1470_v48 = vpop.xlane.xlu0 %1469 }
 0x64f   :  { %3295 = vrcp.f32 %v1470_v48 }
 0x650   :  { %v1473_v49 = vpop.xlane.xlu1 %1472 }
 0x651   :  { %3297 = vrcp.f32 %v1473_v49 }
 0x659   :  { %v3296_v50 = vpop.eup %3295 }
 0x65a   :  { %v1476_v51 = vmul.f32 %v3296_v50, %v3292_v44 }
 0x65b   :  { %v3298_v37 = vpop.eup %3297 }
 0x65c   :  { %v1477_v52 = vmul.f32 %v3298_v37, %v3294_v46  ;;  %v1478_v55 = vpack.c.bf16 %v1476_v51, %v1476_v51 }
 0x65e   :  { %2973 = vmatmul.mubr.msk.bf16.vlgmr.msra.gmra.mrb[24].mxu0 %vm1248_vm2, %v1478_v55  ;;  %v1479_v56 = vpack.c.bf16 %v1477_v52, %v1477_v52 }
 0x65f   :  { %2983 = vmatpush3.bf16.xpose.msra.mxu0 %v3799_v54  ;;  %2984 = vmatprep.mubr.msk.bf16.mxu0 %vm3520_vm0, %v3519_v3  ;;  %v1774_v54 = vrot.slane %v3786_v29, 4 }
 0x660   :  { %2979 = vmatmul.mubr.msk.bf16.vlgmr.msra.gmra.mrb[24].mxu1 %vm1248_vm2, %v1479_v56  ;;  %2994 = vmatprep.subr.bf16.mxu0 %v3519_v3 }
 0x661   :  { %2989 = vmatpush3.bf16.xpose.msra.mxu1 %v3803_v58  ;;  %2990 = vmatprep.mubr.msk.bf16.mxu1 %vm3520_vm0, %v3519_v3 }
 0x662   :  { %3000 = vmatprep.subr.bf16.mxu1 %v3519_v3 }
 0x666   :  { %2985 = vmatmul.mubr.bf16.vlgmr.msra.gmra.mrb[28].mxu0 %v3786_v29 }
 0x667   :  { %2995 = vmatpush3.bf16.msra.mxu0 %v3822_v26  ;;  %2996 = vmatprep.mubr.msk.bf16.mxu0 %vm3520_vm0, %v3519_v3 }
 0x668   :  { %2991 = vmatmul.mubr.bf16.vlgmr.msra.gmra.mrb[28].mxu1 %v3790_v33  ;;  %3006 = vmatprep.subr.bf16.mxu0 %v3519_v3 }
 0x669   :  { %3001 = vmatpush3.bf16.msra.mxu1 %v3828_v35  ;;  %3002 = vmatprep.mubr.msk.bf16.mxu1 %vm3520_vm0, %v3519_v3 }
 0x66a   :  { %3012 = vmatprep.subr.bf16.mxu1 %v3519_v3 }
 0x731   :  { %v3890_v59 = vpop.f32.mrb[24].mxu0 }
 0x732   :  { %v2974_v60 = vpop.f32.mrb[25].mxu0 }
 0x733   :  { %v1524_v61 = vpop.f32.mrb[26].mxu0  ;;  %v3892_v62 = vpop.f32.mrb[24].mxu1 }
 0x734   :  { %v2837_v26 = vpack.c.bf16 %v3892_v62, %v3890_v59  ;;  %v2975_v0 = vpop.f32.mrb[27].mxu0  ;;  %v2980_v5 = vpop.f32.mrb[25].mxu1  ;;  %v3238_v59 = vld [vmem:[#allocation10 + $0x18] sm:$0xff]   ;;  %v3239_v62 = vld [vmem:[#allocation10 + $0x60] sm:$0xff]  }
 0x735   :  { %v1571_v1 = vpop.f32.mrb[26].mxu1 }
 0x736   :  { %v2981_v4 = vpop.f32.mrb[27].mxu1 }
 0x739   :  { %v1610_v10 = vpop.f32.mrb[28].mxu0 }
 0x73a   :  { %v2986_v35 = vpop.f32.mrb[29].mxu0  ;;  %v1656_v11 = vsel %vm1248_vm2, %v1610_v10, -inf }
 0x73b   :  { %v1650_v12 = vpop.f32.mrb[28].mxu1  ;;  %1657 = vmax.xlane.f32.xlu0 %v1656_v11  ;;  %v1613_v13 = vpop.f32.mrb[30].mxu0 }
 0x73c   :  { %v2987_v14 = vpop.f32.mrb[31].mxu0  ;;  %v2992_v15 = vpop.f32.mrb[29].mxu1  ;;  %v1659_v53 = vsel %vm1248_vm2, %v1650_v12, -inf }
 0x73d   :  { %1660 = vmax.xlane.f32.xlu1 %v1659_v53  ;;  %v1653_v16 = vpop.f32.mrb[30].mxu1  ;;  %v3231_v15 = vld [vmem:[#allocation10 + $0x40] sm:$0xff]  }
 0x73e   :  { %v2993_v17 = vpop.f32.mrb[31].mxu1  ;;  %v3247_v53 = vld [vmem:[#allocation10 + $0xc0] sm:$0xff]  }
 0x7c8   :  { %v1658_v28 = vpop.xlane.xlu0 %1657 }
 0x7c9   :  { %v1662_v19 = vsub.f32 %v1610_v10, %v1658_v28 }
 0x7ca   :  { %v1661_v20 = vpop.xlane.xlu1 %1660 }
 0x7cb   :  { %v1664_v6 = vmul.f32 1.442695, %v1662_v19  ;;  %v1663_v21 = vsub.f32 %v1650_v12, %v1661_v20 }
 0x7cd   :  { %3299 = vpow2.f32 %v1664_v6  ;;  %v1666_v7 = vmul.f32 1.442695, %v1663_v21  ;;  %v3232_v6 = vld [vmem:[#allocation10] sm:$0xff]  }
 0x7cf   :  { %3301 = vpow2.f32 %v1666_v7 }
 0x7d7   :  { %v3300_v8 = vpop.eup %3299 }
 0x7d8   :  { %v1668_v9 = vsel %vm1248_vm2, %v3300_v8, 0.0 }
 0x7d9   :  { %v3302_v22 = vpop.eup %3301  ;;  %1669 = vadd.xlane.f32.xlu0 %v1668_v9  ;;  %v3248_v9 = vld [vmem:[#allocation10 + $0x80] sm:$0xff]  }
 0x7da   :  { %v1671_v23 = vsel %vm1248_vm2, %v3302_v22, 0.0 }
 0x7db   :  { %1672 = vadd.xlane.f32.xlu1 %v1671_v23  ;;  %v3249_v23 = vld [vmem:[#allocation10 + $0xc8] sm:$0xff]  }
 0x866   :  { %v1670_v24 = vpop.xlane.xlu0 %1669 }
 0x867   :  { %3303 = vrcp.f32 %v1670_v24  ;;  %v3234_v24 = vld [vmem:[#allocation10 + $0x8] sm:$0xff]  }
 0x868   :  { %v1673_v25 = vpop.xlane.xlu1 %1672 }
 0x869   :  { %3305 = vrcp.f32 %v1673_v25  ;;  %v3235_v25 = vld [vmem:[#allocation10 + $0x50] sm:$0xff]  }
 0x871   :  { %v3304_v27 = vpop.eup %3303 }
 0x872   :  { %v1676_v30 = vmul.f32 %v3304_v27, %v3300_v8  ;;  %v3233_v8 = vld [vmem:[#allocation10 + $0x48] sm:$0xff]  }
 0x873   :  { %v3306_v31 = vpop.eup %3305  ;;  %v3250_v27 = vld [vmem:[#allocation10 + $0x88] sm:$0xff]  }
 0x874   :  { %v1677_v34 = vmul.f32 %v3306_v31, %v3302_v22  ;;  %v1678_v38 = vpack.c.bf16 %v1676_v30, %v1676_v30  ;;  %v3251_v30 = vld [vmem:[#allocation10 + $0xd0] sm:$0xff]  }
 0x875   :  { %v3236_v31 = vld [vmem:[#allocation10 + $0x10] sm:$0xff]  }
 0x876   :  { %2997 = vmatmul.mubr.msk.bf16.vlgmr.msra.gmra.mrb[32].mxu0 %vm1248_vm2, %v1678_v38  ;;  %v1679_v41 = vpack.c.bf16 %v1677_v34, %v1677_v34  ;;  %v3237_v34 = vld [vmem:[#allocation10 + $0x58] sm:$0xff]   ;;  %v3252_v38 = vld [vmem:[#allocation10 + $0x90] sm:$0xff]  }
 0x877   :  { %3007 = vmatpush3.bf16.xpose.msra.mxu0 %v1776_v40  ;;  %3008 = vmatprep.mubr.msk.bf16.mxu0 %vm3520_vm0, %v3519_v3  ;;  %v3253_v40 = vld [vmem:[#allocation10 + $0xd8] sm:$0xff]  }
 0x878   :  { %3003 = vmatmul.mubr.msk.bf16.vlgmr.msra.gmra.mrb[32].mxu1 %vm1248_vm2, %v1679_v41  ;;  %3018 = vmatprep.subr.bf16.mxu0 %v3519_v3  ;;  %v3255_v41 = vld [vmem:[#allocation10 + $0xe0] sm:$0xff]  }
 0x879   :  { %3013 = vmatpush3.bf16.xpose.msra.mxu1 %v1820_v42  ;;  %3014 = vmatprep.mubr.msk.bf16.mxu1 %vm3520_vm0, %v3519_v3  ;;  %v3240_v42 = vld [vmem:[#allocation10 + $0x20] sm:$0xff]  }
 0x87a   :  { %3024 = vmatprep.subr.bf16.mxu1 %v3519_v3 }
 0x87e   :  { %3009 = vmatmul.mubr.bf16.vlgmr.msra.gmra.mrb[36].mxu0 %v1774_v54  ;;  %v3241_v54 = vld [vmem:[#allocation10 + $0x68] sm:$0xff]  }
 0x87f   :  { %3019 = vmatpush3.bf16.msra.mxu0 %v3831_v36  ;;  %3020 = vmatprep.mubr.msk.bf16.mxu0 %vm3520_vm0, %v3519_v3 }
 0x880   :  { %3015 = vmatmul.mubr.bf16.vlgmr.msra.gmra.mrb[36].mxu1 %v1818_v43  ;;  %2872 = vmatprep.subr.bf16.mxu0 %v3231_v15  ;;  %v3256_v43 = vld [vmem:[#allocation10 + $0xa0] sm:$0xff]  }
 0x881   :  { %3025 = vmatpush3.bf16.msra.mxu1 %v3836_v39  ;;  %3026 = vmatprep.mubr.msk.bf16.mxu1 %vm3520_vm0, %v3519_v3 }
 0x882   :  { %2894 = vmatprep.subr.bf16.mxu1 %v3247_v53 }
 0x949   :  { %v3918_v58 = vpop.f32.mrb[32].mxu0 }
 0x94a   :  { %v2998_v44 = vpop.f32.mrb[33].mxu0 }
 0x94b   :  { %v1723_v45 = vpop.f32.mrb[34].mxu0  ;;  %v3920_v46 = vpop.f32.mrb[32].mxu1  ;;  %v3257_v44 = vld [vmem:[#allocation10 + $0xe8] sm:$0xff]  }
 0x94c   :  { %v2838_v29 = vpack.c.bf16 %v3920_v46, %v3918_v58  ;;  %v2999_v33 = vpop.f32.mrb[35].mxu0  ;;  %v3004_v36 = vpop.f32.mrb[33].mxu1  ;;  %v3242_v45 = vld [vmem:[#allocation10 + $0x28] sm:$0xff]  }
 0x94d   :  { %v1769_v47 = vpop.f32.mrb[34].mxu1  ;;  %v3243_v33 = vld [vmem:[#allocation10 + $0x70] sm:$0xff]   ;;  %v3258_v36 = vld [vmem:[#allocation10 + $0xa8] sm:$0xff]  }
 0x94e   :  { %v3005_v48 = vpop.f32.mrb[35].mxu1  ;;  %v3259_v47 = vld [vmem:[#allocation10 + $0xf0] sm:$0xff]  }
 0x94f   :  { %v3244_v48 = vld [vmem:[#allocation10 + $0x30] sm:$0xff]  }
 0x951   :  { %v1812_v49 = vpop.f32.mrb[36].mxu0 }
 0x952   :  { %v3010_v50 = vpop.f32.mrb[37].mxu0  ;;  %v1862_v39 = vsel %vm1248_vm2, %v1812_v49, -inf }
 0x953   :  { %v1856_v51 = vpop.f32.mrb[36].mxu1  ;;  %1863 = vmax.xlane.f32.xlu0 %v1862_v39  ;;  %v1815_v37 = vpop.f32.mrb[38].mxu0  ;;  %v3260_v50 = vld [vmem:[#allocation10 + $0xb0] sm:$0xff]   ;;  %v3246_v39 = vld [vmem:[#allocation10 + $0x38] sm:$0xff]  }
 0x954   :  { %v3011_v52 = vpop.f32.mrb[39].mxu0  ;;  %v3016_v55 = vpop.f32.mrb[37].mxu1  ;;  %v1865_v56 = vsel %vm1248_vm2, %v1856_v51, -inf  ;;  %v3262_v37 = vld [vmem:[#allocation10 + $0xb8] sm:$0xff]  }
 0x955   :  { %1866 = vmax.xlane.f32.xlu1 %v1865_v56  ;;  %v1859_v60 = vpop.f32.mrb[38].mxu1 }
 0x956   :  { %v3017_v61 = vpop.f32.mrb[39].mxu1 }
 0x9e0   :  { %v1864_v0 = vpop.xlane.xlu0 %1863 }
 0x9e1   :  { %v1868_v5 = vsub.f32 %v1812_v49, %v1864_v0  ;;  %v3245_v49 = vld [vmem:[#allocation10 + $0x78] sm:$0xff]  }
 0x9e2   :  { %v1867_v1 = vpop.xlane.xlu1 %1866 }
 0x9e3   :  { %v1870_v4 = vmul.f32 1.442695, %v1868_v5  ;;  %v1869_v10 = vsub.f32 %v1856_v51, %v1867_v1  ;;  %v3261_v51 = vld [vmem:[#allocation10 + $0xf8] sm:$0xff]  }
 0x9e5   :  { %3307 = vpow2.f32 %v1870_v4  ;;  %v1872_v35 = vmul.f32 1.442695, %v1869_v10 }
 0x9e7   :  { %3309 = vpow2.f32 %v1872_v35 }
 0x9ef   :  { %v3308_v11 = vpop.eup %3307 }
 0x9f0   :  { %v1874_v12 = vsel %vm1248_vm2, %v3308_v11, 0.0 }
 0x9f1   :  { %v3310_v13 = vpop.eup %3309  ;;  %1875 = vadd.xlane.f32.xlu0 %v1874_v12  ;;  %v2767_v12 = vld [vmem:[%s4013_s10] ss:$0 sm:$0xff] }
 0x9f2   :  { %v1877_v14 = vsel %vm1248_vm2, %v3310_v13, 0.0 }
 0x9f3   :  { %1878 = vadd.xlane.f32.xlu1 %v1877_v14 }
 0xa7e   :  { %v1876_v16 = vpop.xlane.xlu0 %1875 }
 0xa7f   :  { %3311 = vrcp.f32 %v1876_v16 }
 0xa80   :  { %v1879_v17 = vpop.xlane.xlu1 %1878 }
 0xa81   :  { %3313 = vrcp.f32 %v1879_v17 }
 0xa89   :  { %v3312_v28 = vpop.eup %3311 }
 0xa8a   :  { %v1882_v19 = vmul.f32 %v3312_v28, %v3308_v11 }
 0xa8b   :  { %v3314_v20 = vpop.eup %3313 }
 0xa8c   :  { %v1883_v21 = vmul.f32 %v3314_v20, %v3310_v13  ;;  %v1884_v7 = vpack.c.bf16 %v1882_v19, %v1882_v19 }
 0xa8e   :  { %3021 = vmatmul.mubr.msk.bf16.vlgmr.msra.gmra.mrb[40].mxu0 %vm1248_vm2, %v1884_v7  ;;  %v1885_v22 = vpack.c.bf16 %v1883_v21, %v1883_v21  ;;  %v3263_v7 = vld [vmem:[#allocation11] sm:$0xff]  }
 0xa8f   :  { %2873 = vmatpush3.bf16.msra.mxu0 %v3232_v6  ;;  %2301 = vmatprep.mubr.bf16.mxu0 %v2837_v26  ;;  %v3254_v26 = vld [vmem:[#allocation10 + $0x98] sm:$0xff]  }
 0xa90   :  { %3027 = vmatmul.mubr.msk.bf16.vlgmr.msra.gmra.mrb[40].mxu1 %vm1248_vm2, %v1885_v22  ;;  %2874 = vmatprep.subr.bf16.mxu0 %v3233_v8  ;;  %v3266_v8 = vld [vmem:[#allocation11 + $0x18] sm:$0xff]   ;;  %v3268_v22 = vld [vmem:[#allocation11 + $0x28] sm:$0xff]  }
 0xa91   :  { %2895 = vmatpush3.bf16.msra.mxu1 %v3248_v9  ;;  %v3267_v9 = vld [vmem:[#allocation11 + $0x20] sm:$0xff]  }
 0xa92   :  { %2896 = vmatprep.subr.bf16.mxu1 %v3249_v23  ;;  %v3269_v23 = vld [vmem:[#allocation11 + $0x30] sm:$0xff]  }
 0xa93   :  { %2875 = vmatpush3.bf16.msra.mxu0 %v3234_v24  ;;  %v3270_v24 = vld [vmem:[#allocation11 + $0x38] sm:$0xff]  }
 0xa94   :  { %2876 = vmatprep.subr.bf16.mxu0 %v3235_v25  ;;  %v3271_v25 = vld [vmem:[#allocation13] sm:$0xff]  }
 0xa95   :  { %2897 = vmatpush3.bf16.msra.mxu1 %v3250_v27  ;;  %v3272_v27 = vld [vmem:[#allocation13 + $0x8] sm:$0xff]  }
 0xa96   :  { %2898 = vmatprep.subr.bf16.mxu1 %v3251_v30  ;;  %v3273_v30 = vld [vmem:[#allocation13 + $0x10] sm:$0xff]  }
 0xa97   :  { %2877 = vmatpush3.bf16.msra.mxu0 %v3236_v31  ;;  %v3274_v31 = vld [vmem:[#allocation13 + $0x18] sm:$0xff]  }
 0xa98   :  { %2878 = vmatprep.subr.bf16.mxu0 %v3237_v34  ;;  %v3275_v34 = vld [vmem:[#allocation13 + $0x20] sm:$0xff]  }
 0xa99   :  { %2899 = vmatpush3.bf16.msra.mxu1 %v3252_v38  ;;  %v3276_v38 = vld [vmem:[#allocation13 + $0x28] sm:$0xff]  }
 0xa9a   :  { %2900 = vmatprep.subr.bf16.mxu1 %v3253_v40 }
 0xa9b   :  { %2879 = vmatpush3.bf16.msra.mxu0 %v3238_v59 }
 0xa9c   :  { %2880 = vmatprep.subr.bf16.mxu0 %v3239_v62 }
 0xa9d   :  { %2901 = vmatpush3.bf16.msra.mxu1 %v3254_v26 }
 0xa9e   :  { %2902 = vmatprep.subr.bf16.mxu1 %v3255_v41 }
 0xa9f   :  { %2881 = vmatpush3.bf16.msra.mxu0 %v3240_v42 }
 0xaa0   :  { %2882 = vmatprep.subr.bf16.mxu0 %v3241_v54 }
 0xaa1   :  { %2903 = vmatpush3.bf16.msra.mxu1 %v3256_v43 }
 0xaa2   :  { %2904 = vmatprep.subr.bf16.mxu1 %v3257_v44 }
 0xaa3   :  { %2883 = vmatpush3.bf16.msra.mxu0 %v3242_v45 }
 0xaa4   :  { %2884 = vmatprep.subr.bf16.mxu0 %v3243_v33 }
 0xaa5   :  { %2905 = vmatpush3.bf16.msra.mxu1 %v3258_v36 }
 0xaa6   :  { %2906 = vmatprep.subr.bf16.mxu1 %v3259_v47 }
 0xaa7   :  { %2885 = vmatpush3.bf16.msra.mxu0 %v3244_v48 }
 0xaa8   :  { %2886 = vmatprep.subr.bf16.mxu0 %v3245_v49 }
 0xaa9   :  { %2907 = vmatpush3.bf16.msra.mxu1 %v3260_v50 }
 0xaaa   :  { %2908 = vmatprep.subr.bf16.mxu1 %v3261_v51 }
 0xaab   :  { %2887 = vmatpush3.bf16.msra.mxu0 %v3246_v39  ;;  %v2804_v39 = vld [vmem:[%s4014_s11] ss:$0 sm:$0xff] }
 0xaac   :  { %3030 = vmatprep.subr.bf16.mxu0 %v3519_v3 }
 0xaad   :  { %2909 = vmatpush3.bf16.msra.mxu1 %v3262_v37 }
 0xaae   :  { %2302 = vmatmul.mubr.bf16.vlgmr.msra.gmra.mrb[44].mxu0 %v2836_v32  ;;  %3050 = vmatprep.subr.bf16.mxu1 %v3519_v3 }
 0xaaf   :  { %3046 = vmatprep.mubr.msk.bf16.mxu0 %vm3520_vm0, %v3519_v3  ;;  %3031 = vmatpush3.bf16.msra.mxu0 %v3263_v7 }
 0xab0   :  { %3032 = vmatprep.subr.bf16.mxu0 %v3519_v3 }
 0xb61   :  { %v1927_v52 = vpop.f32.mrb[40].mxu0 }
 0xb62   :  { %v3022_v55 = vpop.f32.mrb[41].mxu0 }
 0xb63   :  { %v1930_v56 = vpop.f32.mrb[42].mxu0  ;;  %v1974_v60 = vpop.f32.mrb[40].mxu1 }
 0xb64   :  { %v2839_v61 = vpack.c.bf16 %v1974_v60, %v1927_v52  ;;  %v3023_v0 = vpop.f32.mrb[43].mxu0  ;;  %v3028_v5 = vpop.f32.mrb[41].mxu1  ;;  %v2805_v60 = vld [vmem:[%s4015_s12] ss:$0 sm:$0xff] }
 0xb65   :  { %v1977_v1 = vpop.f32.mrb[42].mxu1 }
 0xb66   :  { %v3029_v4 = vpop.f32.mrb[43].mxu1  ;;  %2342 = vmatprep.mubr.bf16.mxu1 %v2839_v61 }
 0xb67   :  { %2343 = vmatmul.mubr.bf16.vlgmr.msra.gmra.mrb[44].mxu1 %v2838_v29  ;;  %v3277_v4 = vld [vmem:[#allocation13 + $0x30] sm:$0xff]  }
 0xb68   :  { %3066 = vmatprep.mubr.msk.bf16.mxu1 %vm3520_vm0, %v3519_v3  ;;  %3051 = vmatpush3.bf16.msra.mxu1 %v3271_v25 }
 0xb69   :  { %3052 = vmatprep.subr.bf16.mxu1 %v3519_v3 }
 0xb6c   :  { %3053 = vmatpush3.bf16.msra.mxu1 %v3272_v27 }
 0xb6d   :  { %3054 = vmatprep.subr.bf16.mxu1 %v3519_v3 }
 0xb70   :  { %3055 = vmatpush3.bf16.msra.mxu1 %v3273_v30 }
 0xb71   :  { %3056 = vmatprep.subr.bf16.mxu1 %v3519_v3 }
 0xb74   :  { %3057 = vmatpush3.bf16.msra.mxu1 %v3274_v31 }
 0xb75   :  { %3058 = vmatprep.subr.bf16.mxu1 %v3519_v3 }
 0xb78   :  { %3059 = vmatpush3.bf16.msra.mxu1 %v3275_v34 }
 0xb79   :  { %3060 = vmatprep.subr.bf16.mxu1 %v3519_v3 }
 0xb7c   :  { %3061 = vmatpush3.bf16.msra.mxu1 %v3276_v38 }
 0xb7d   :  { %3062 = vmatprep.subr.bf16.mxu1 %v3519_v3 }
 0xb80   :  { %3063 = vmatpush3.bf16.msra.mxu1 %v3277_v4 }
 0xb81   :  { %v2888_v57 = vpop.f32.mrb[44].mxu0  ;;  %3064 = vmatprep.subr.bf16.mxu1 %v3519_v3 }
 0xb82   :  { %v2889_v18 = vpop.f32.mrb[45].mxu0 }
 0xb83   :  { %v2890_v32 = vadd.f32 %v2889_v18, %v2888_v57  ;;  %v2891_v10 = vpop.f32.mrb[46].mxu0  ;;  %v3278_v57 = vld [vmem:[#allocation13 + $0x38] sm:$0xff]   ;;  %v2806_v18 = vld [vmem:[%s4017_s14] ss:$0 sm:$0xff]  ;;  %s2634_s14 = sshll.u32 %s3521_s3, 4  ;;  %s2635_s14 = int_to_ptr.vmem [resolvable:$true] %s2634_s14 }
 0xb84   :  { %v2892_v35 = vpop.f32.mrb[47].mxu0  ;;  %3065 = vmatpush3.bf16.msra.mxu1 %v3278_v57  ;;  %s3473_s29 = scalar_lea.vmem %s2635_s14, 256  ;;  %p3478_p1 = scmp.lt.s32.totalorder %s2635_s14, %s2635_s14 }
 0xb85   :  { %v2893_v11 = vadd.f32 %v2892_v35, %v2891_v10  ;;  %v2304_v15 = vadd.f32 %v2890_v32, %v2767_v12  ;;  %p3474_p0 = scmp.ne.s32.totalorder %s2635_s14, %s3473_s29  ;;  %p3479_p2 = scmp.lt.s32.totalorder %s3473_s29, %s3473_s29 }
 0xb87   :  { %v2307_v46 = vadd.f32 %v2893_v11, %v2767_v12  ;;  %p3480_p3 = por %p3479_p2, %p3478_p1 }
 0xb89   :  { %p3481_p4 = pnand %p3480_p3, %p3474_p0 }
 0xc3a   :  { %v2910_v13 = vpop.f32.mrb[44].mxu1 }
 0xc3b   :  { %v2911_v14 = vpop.f32.mrb[45].mxu1 }
 0xc3c   :  { %v2912_v53 = vadd.f32 %v2911_v14, %v2910_v13  ;;  %v2913_v16 = vpop.f32.mrb[46].mxu1 }
 0xc3d   :  { %v2914_v58 = vpop.f32.mrb[47].mxu1 }
 0xc3e   :  { %v2345_v29 = vadd.f32 %v2912_v53, %v2304_v15  ;;  %v2915_v17 = vadd.f32 %v2914_v58, %v2913_v16 }
 0xc40   :  { %v2348_v28 = vadd.f32 %v2915_v17, %v2307_v46  ;;  %v3949_v19 = vadd.f32 %v2345_v29, %v3751_v63  ;;  %v3264_v63 = vld [vmem:[#allocation11 + $0x8] sm:$0xff]  }
 0xc41   :  { %3033 = vmatpush3.bf16.msra.mxu0 %v3264_v63 }
 0xc42   :  { %2355 = vadd.xlane.f32.xlu0 %v3949_v19  ;;  %v3953_v20 = vadd.f32 %v2348_v28, %v3753_v2  ;;  %v2361_v6 = vmul.f32 %v3949_v19, %v3949_v19  ;;  %3034 = vmatprep.subr.bf16.mxu0 %v3519_v3  ;;  %v3265_v2 = vld [vmem:[#allocation11 + $0x10] sm:$0xff]  }
 0xc44   :  { %2357 = vadd.xlane.f32.xlu1 %v3953_v20  ;;  %v2362_v21 = vmul.f32 %v3953_v20, %v3953_v20 }
 0xc45   :  { %3035 = vmatpush3.bf16.msra.mxu0 %v3265_v2 }
 0xc46   :  { %2363 = vadd.xlane.f32.xlu0 %v2361_v6  ;;  %3036 = vmatprep.subr.bf16.mxu0 %v3519_v3 }
 0xc48   :  { %2365 = vadd.xlane.f32.xlu1 %v2362_v21 }
 0xc49   :  { %3037 = vmatpush3.bf16.msra.mxu0 %v3266_v8 }
 0xc4a   :  { %3038 = vmatprep.subr.bf16.mxu0 %v3519_v3 }
 0xc4d   :  { %3039 = vmatpush3.bf16.msra.mxu0 %v3267_v9 }
 0xc4e   :  { %3040 = vmatprep.subr.bf16.mxu0 %v3519_v3 }
 0xc51   :  { %3041 = vmatpush3.bf16.msra.mxu0 %v3268_v22 }
 0xc52   :  { %3042 = vmatprep.subr.bf16.mxu0 %v3519_v3 }
 0xc55   :  { %3043 = vmatpush3.bf16.msra.mxu0 %v3269_v23 }
 0xc56   :  { %3044 = vmatprep.subr.bf16.mxu0 %v3519_v3  ;;  %v2815_v3 = vld [vmem:[%s4019_s16] ss:$0 sm:$0xff] }
 0xc59   :  { %3045 = vmatpush3.bf16.msra.mxu0 %v3270_v24 }
 0xccf   :  { %v2356_v40 = vpop.xlane.xlu0 %2355 }
 0xcd0   :  { %v2359_v59 = vmul.f32 0.03125, %v2356_v40 }
 0xcd1   :  { %v2358_v62 = vpop.xlane.xlu1 %2357 }
 0xcd2   :  { %v2360_v26 = vmul.f32 0.03125, %v2358_v62  ;;  %v2369_v42 = vmul.f32 %v2359_v59, %v2359_v59  ;;  %v2373_v49 = vsub.f32 %v3949_v19, %v2359_v59 }
 0xcd3   :  { %v2364_v41 = vpop.xlane.xlu0 %2363 }
 0xcd4   :  { %v2367_v54 = vmul.f32 0.03125, %v2364_v41  ;;  %v2370_v44 = vmul.f32 %v2360_v26, %v2360_v26  ;;  %v2374_v51 = vsub.f32 %v3953_v20, %v2360_v26 }
 0xcd5   :  { %v2366_v43 = vpop.xlane.xlu1 %2365 }
 0xcd6   :  { %v2371_v45 = vsub.f32 %v2367_v54, %v2369_v42  ;;  %v2368_v33 = vmul.f32 0.03125, %v2366_v43 }
 0xcd8   :  { %v2375_v36 = vadd.f32 1e-05, %v2371_v45  ;;  %v2372_v47 = vsub.f32 %v2368_v33, %v2370_v44 }
 0xcda   :  { %3315 = vrsqrt.f32 %v2375_v36  ;;  %v2376_v48 = vadd.f32 1e-05, %v2372_v47 }
 0xcdc   :  { %3317 = vrsqrt.f32 %v2376_v48 }
 0xce4   :  { %v3316_v50 = vpop.eup %3315 }
 0xce5   :  { %v2379_v37 = vmul.f32 %v3316_v50, %v2373_v49 }
 0xce6   :  { %v3318_v52 = vpop.eup %3317 }
 0xce7   :  { %v2380_v55 = vmul.f32 %v3318_v52, %v2374_v51  ;;  %v2387_v56 = vmul.f32 %v2804_v39, %v2379_v37 }
 0xce9   :  { %v2388_v61 = vmul.f32 %v2804_v39, %v2380_v55  ;;  %v2395_v0 = vadd.f32 %v2805_v60, %v2387_v56 }
 0xceb   :  { %v2396_v5 = vadd.f32 %v2805_v60, %v2388_v61 }
 0xced   :  { %v2397_v1 = vpack.c.bf16 %v2396_v5, %v2395_v0 }
 0xcef   :  { %3047 = vmatmul.mubr.bf16.vlgmr.msra.gmra.mrb[48].mxu0 %v2397_v1 }
 0xdc2   :  { %v2503_v32 = vpop.f32.mrb[48].mxu0 }
 0xdc3   :  { %v2504_v10 = vadd.f32 %v2806_v18, %v2503_v32  ;;  %v3048_v35 = vpop.f32.mrb[49].mxu0 }
 0xdc4   :  { %v2506_v11 = vpop.f32.mrb[50].mxu0 }
 0xdc5   :  { %v2507_v12 = vadd.f32 %v2806_v18, %v2506_v11  ;;  %v3049_v13 = vpop.f32.mrb[51].mxu0  ;;  %v2510_v14 = vmax.f32 %v2504_v10, 0.0 }
 0xdc7   :  { %v2511_v15 = vmax.f32 %v2507_v12, 0.0 }
 0xdc9   :  { %v2512_v53 = vpack.c.bf16 %v2511_v15, %v2510_v14 }
 0xdcb   :  { %3067 = vmatmul.mubr.bf16.vlgmr.msra.gmra.mrb[48].mxu1 %v2512_v53 }
 0xe9e   :  { %v2618_v16 = vpop.f32.mrb[48].mxu1 }
 0xe9f   :  { %v2619_v58 = vadd.f32 %v2815_v3, %v2618_v16  ;;  %v3068_v46 = vpop.f32.mrb[49].mxu1 }
 0xea0   :  { %v2621_v29 = vpop.f32.mrb[50].mxu1 }
 0xea1   :  { %v2625_v17 = vadd.f32 %v2619_v58, %v2395_v0  ;;  %v2622_v28 = vadd.f32 %v2815_v3, %v2621_v29  ;;  %v3069_v19 = vpop.f32.mrb[51].mxu1 }
 0xea3   :  { %2627 = vst [vmem:[#allocation14] sm:$0xff] %v2625_v17  ;;  %v2626_v20 = vadd.f32 %v2622_v28, %v2396_v5 }
 0xea5   :  { %2628 = vst [vmem:[#allocation14 + $0x8] sm:$0xff] %v2626_v20 }
 0xea6   :  { %3484 = shalt.err (!%p3481_p4)
}
 0xea7   :  { %s3485_s9 = scalar_lea.hbm %s4020_s17, 256 }
 0xea8   :  { %p3486_p5 = scmp.ne.s32.totalorder %s4020_s17, %s3485_s9  ;;  %p3489_p6 = scmp.lt.u32.totalorder %s3485_s9, %s4020_s17 }
 0xeaa   :  { %p3491_p7 = pnand %p3489_p6, %p3486_p5 }
 0xeac   :  { %3494 = shalt.err (!%p3491_p7)
}
 0xead   :  { %2640 = dma.vmem_to_hbm [thread:$0]  %s2635_s14, 256, %s4020_s17, [#allocation4], %s3513_s13, %s3513_s13, %s3514_s22  }
 0xeae   :  { %3503 = dma.done.wait [#allocation4], 256  }
 0xeaf   :  { %3504 = vsyncadd [#allocation4], 4294967040 }
 0xeb0   :  { %2644 = vsyncpa [#allocation3], 1 }
 0xeb1   :  { %2645 = vsyncpa [#allocation6], 1 }
 0xeb2   :  { %2646 = vsyncpa [#allocation9], 1 }
 0xeb3   :  { %2647 = vsyncpa [#allocation12], 1 }
 0xeb4   :  { %2648 = vsyncpa [#allocation4], 1 }

// kernel: tpu_custom_call.1
= control target key start
LH: loop header
LB: loop body
LE: loop exit
PB: predicated region body
PF: predicated region fallthrough
CT: control target
= control target key end

     0   :  { %s4003_s0 = inlined_call_operand.hbm [shape: f32[2,8,128], index: 0, kind: input, shape index: {}]   ;;  %s4004_s1 = inlined_call_operand.vmem [shape: f32[1,128], index: 1, kind: input, shape index: {}]   ;;  %s4005_s2 = inlined_call_operand.vmem [shape: f32[1,128], index: 2, kind: input, shape index: {}]   ;;  %s4006_s3 = inlined_call_operand.hbm [shape: bf16[128,512], index: 3, kind: input, shape index: {}]   ;;  %s4007_s4 = inlined_call_operand.hbm [shape: bf16[128,512], index: 4, kind: input, shape index: {}]   ;;  %s4008_s5 = inlined_call_operand.hbm [shape: bf16[128,512], index: 5, kind: input, shape index: {}]   ;;  %s4009_s6 = inlined_call_operand.vmem [shape: f32[1,512], index: 6, kind: input, shape index: {}]   ;;  %s4010_s7 = inlined_call_operand.vmem [shape: f32[1,512], index: 7, kind: input, shape index: {}]   ;;  %s4011_s8 = inlined_call_operand.vmem [shape: f32[1,512], index: 8, kind: input, shape index: {}]   ;;  %s4012_s9 = inlined_call_operand.hbm [shape: bf16[512,128], index: 9, kind: input, shape index: {}]   ;;  %s4013_s10 = inlined_call_operand.vmem [shape: f32[1,128], index: 10, kind: input, shape index: {}]   ;;  %s4014_s11 = inlined_call_operand.vmem [shape: f32[1,128], index: 11, kind: input, shape index: {}]   ;;  %s4015_s12 = inlined_call_operand.vmem [shape: f32[1,128], index: 12, kind: input, shape index: {}]   ;;  %s4016_s13 = inlined_call_operand.hbm [shape: bf16[128,128], index: 13, kind: input, shape index: {}]   ;;  %s4017_s14 = inlined_call_operand.vmem [shape: f32[1,128], index: 14, kind: input, shape index: {}]   ;;  %s4018_s15 = inlined_call_operand.hbm [shape: bf16[128,128], index: 15, kind: input, shape index: {}]   ;;  %s4019_s16 = inlined_call_operand.vmem [shape: f32[1,128], index: 16, kind: input, shape index: {}]   ;;  %s4020_s17 = inlined_call_operand.hbm [shape: f32[2,8,128], index: 17, kind: output, shape index: {}]  }
   0x1   :  { %4027 = sst [smem:[#allocation20_spill]] %s4003_s0 }
   0x2   :  { %4028 = sst [smem:[#allocation21_spill]] %s4004_s1 }
   0x3   :  { %22 = vsyncpa [#allocation3], 0 }
   0x4   :  { %23 = vsyncpa [#allocation6], 0 }
   0x5   :  { %24 = vsyncpa [#allocation9], 0 }
   0x6   :  { %25 = vsyncpa [#allocation12], 0 }
   0x7   :  { %26 = vsyncpa [#allocation4], 0  ;;  %s3505_s24 = smov [#allocation5]   ;;  %s3319_s28 = scalar_lea.hbm %s4006_s3, 4096 }
   0x8   :  { %s48_s25 = sshll.u32 %s3505_s24, 4  ;;  %p3320_p0 = scmp.ne.s32.totalorder %s4006_s3, %s3319_s28  ;;  %s49_s25 = int_to_ptr.vmem [resolvable:$true] %s48_s25 }
   0x9   :  { %p3323_p1 = scmp.lt.u32.totalorder %s3319_s28, %s4006_s3 }
   0xb   :  { %p3325_p2 = pnand %p3323_p1, %p3320_p0 }
   0xd   :  { %3328 = shalt.err (!%p3325_p2)
}
   0xe   :  { %s3329_s19 = scalar_lea.vmem %s49_s25, 4096  ;;  %p3334_p4 = scmp.lt.s32.totalorder %s49_s25, %s49_s25 }
   0xf   :  { %p3330_p3 = scmp.ne.s32.totalorder %s49_s25, %s3329_s19  ;;  %p3335_p5 = scmp.lt.s32.totalorder %s3329_s19, %s3329_s19 }
  0x11   :  { %p3336_p6 = por %p3335_p5, %p3334_p4 }
  0x13   :  { %p3337_p7 = pnand %p3336_p6, %p3330_p3 }
  0x15   :  { %3340 = shalt.err (!%p3337_p7)
}
  0x16   :  { %s4026_s1 = smov 256   ;;  %s3507_s20 = smov 16  }
  0x17   :  { %54 = dma.hbm_to_vmem [thread:$0]  %s4006_s3, 4096, %s49_s25, [#allocation6], %s4026_s1, %s4026_s1, %s3507_s20  }
  0x18   :  { %s3508_s23 = smov [#allocation8]   ;;  %s3341_s28 = scalar_lea.hbm %s4008_s5, 4096 }
  0x19   :  { %s72_s24 = sshll.u32 %s3508_s23, 4  ;;  %p3342_p8 = scmp.ne.s32.totalorder %s4008_s5, %s3341_s28  ;;  %s73_s24 = int_to_ptr.vmem [resolvable:$true] %s72_s24 }
  0x1a   :  { %p3345_p9 = scmp.lt.u32.totalorder %s3341_s28, %s4008_s5 }
  0x1c   :  { %p3347_p10 = pnand %p3345_p9, %p3342_p8 }
  0x1e   :  { %3350 = shalt.err (!%p3347_p10)
}
  0x1f   :  { %s3351_s19 = scalar_lea.vmem %s73_s24, 4096  ;;  %p3356_p12 = scmp.lt.s32.totalorder %s73_s24, %s73_s24 }
  0x20   :  { %p3352_p11 = scmp.ne.s32.totalorder %s73_s24, %s3351_s19  ;;  %p3357_p13 = scmp.lt.s32.totalorder %s3351_s19, %s3351_s19 }
  0x22   :  { %p3358_p0 = por %p3357_p13, %p3356_p12 }
  0x24   :  { %p3359_p1 = pnand %p3358_p0, %p3352_p11 }
  0x26   :  { %3362 = shalt.err (!%p3359_p1)
}
  0x27   :  { %78 = dma.hbm_to_vmem [thread:$0]  %s4008_s5, 4096, %s73_s24, [#allocation9], %s4026_s1, %s4026_s1, %s3507_s20  }
  0x28   :  { %s3509_s21 = smov [#allocation11]   ;;  %s3510_s23 = smov [#allocation2]  }
  0x29   :  { %s108_s22 = sshll.u32 %s3509_s21, 4  ;;  %s32_s26 = sshll.u32 %s3510_s23, 4  ;;  %s109_s22 = int_to_ptr.vmem [resolvable:$true] %s108_s22  ;;  %s3642_s26 = int_to_ptr.vmem [resolvable:$true] %s32_s26 }
  0x2a   :  { %s3363_s29 = scalar_lea.hbm %s4016_s13, 1024 }
  0x2b   :  { %p3364_p2 = scmp.ne.s32.totalorder %s4016_s13, %s3363_s29  ;;  %p3367_p3 = scmp.lt.u32.totalorder %s3363_s29, %s4016_s13 }
  0x2d   :  { %p3369_p4 = pnand %p3367_p3, %p3364_p2 }
  0x2f   :  { %3372 = shalt.err (!%p3369_p4)
}
  0x30   :  { %s3373_s5 = scalar_lea.vmem %s109_s22, 1024  ;;  %p3378_p6 = scmp.lt.s32.totalorder %s109_s22, %s109_s22 }
  0x31   :  { %p3374_p5 = scmp.ne.s32.totalorder %s109_s22, %s3373_s5  ;;  %p3379_p7 = scmp.lt.s32.totalorder %s3373_s5, %s3373_s5 }
  0x33   :  { %p3380_p8 = por %p3379_p7, %p3378_p6 }
  0x35   :  { %p3381_p9 = pnand %p3380_p8, %p3374_p5 }
  0x37   :  { %3384 = shalt.err (!%p3381_p9)
}
  0x38   :  { %s4022_s24 = smov 64   ;;  %s4024_s3 = smov 4  }
  0x39   :  { %114 = dma.hbm_to_vmem [thread:$0]  %s4016_s13, 1024, %s109_s22, [#allocation12], %s4022_s24, %s4022_s24, %s4024_s3  }
  0x3a   :  { %s4029_s28 = sld [smem:[#allocation20_spill]] }
  0x40   :  { %s3385_s29 = scalar_lea.hbm %s4029_s28, 256 }
  0x41   :  { %p3386_p10 = scmp.ne.s32.totalorder %s4029_s28, %s3385_s29  ;;  %p3389_p11 = scmp.lt.u32.totalorder %s3385_s29, %s4029_s28 }
  0x43   :  { %p3391_p12 = pnand %p3389_p11, %p3386_p10 }
  0x45   :  { %3394 = shalt.err (!%p3391_p12)
}
  0x46   :  { %s3395_s5 = scalar_lea.vmem %s3642_s26, 256  ;;  %p3400_p0 = scmp.lt.s32.totalorder %s3642_s26, %s3642_s26 }
  0x47   :  { %p3396_p13 = scmp.ne.s32.totalorder %s3642_s26, %s3395_s5  ;;  %p3401_p1 = scmp.lt.s32.totalorder %s3395_s5, %s3395_s5 }
  0x49   :  { %p3402_p2 = por %p3401_p1, %p3400_p0 }
  0x4b   :  { %p3403_p3 = pnand %p3402_p2, %p3396_p13 }
  0x4d   :  { %3406 = shalt.err (!%p3403_p3)
}
  0x4e   :  { %s3513_s13 = smov 128   ;;  %s3514_s22 = smov 8  }
  0x4f   :  { %38 = dma.hbm_to_vmem [thread:$0]  %s4029_s28, 256, %s3642_s26, [#allocation3], %s3513_s13, %s3513_s13, %s3514_s22  }
  0x50   :  { %s3515_s23 = smov [#allocation7]   ;;  %s3516_s29 = smov [#allocation10]  }
  0x51   :  { %s60_s27 = sshll.u32 %s3515_s23, 4  ;;  %s90_s0 = sshll.u32 %s3516_s29, 4  ;;  %s61_s27 = int_to_ptr.vmem [resolvable:$true] %s60_s27  ;;  %s3679_s0 = int_to_ptr.vmem [resolvable:$true] %s90_s0 }
  0x52   :  { %s3407_s19 = scalar_lea.hbm %s4007_s4, 4096 }
  0x53   :  { %p3408_p4 = scmp.ne.s32.totalorder %s4007_s4, %s3407_s19  ;;  %p3411_p5 = scmp.lt.u32.totalorder %s3407_s19, %s4007_s4 }
  0x55   :  { %p3413_p6 = pnand %p3411_p5, %p3408_p4 }
  0x57   :  { %3416 = shalt.err (!%p3413_p6)
}
  0x58   :  { %s3417_s26 = scalar_lea.vmem %s61_s27, 4096  ;;  %p3422_p8 = scmp.lt.s32.totalorder %s61_s27, %s61_s27 }
  0x59   :  { %p3418_p7 = scmp.ne.s32.totalorder %s61_s27, %s3417_s26  ;;  %p3423_p9 = scmp.lt.s32.totalorder %s3417_s26, %s3417_s26 }
  0x5b   :  { %p3424_p10 = por %p3423_p9, %p3422_p8 }
  0x5d   :  { %p3425_p11 = pnand %p3424_p10, %p3418_p7 }
  0x5f   :  { %3428 = shalt.err (!%p3425_p11)
}
  0x60   :  { %s4030_s28 = smov 256   ;;  %s3429_s1 = scalar_lea.hbm %s4012_s9, 4096 }
  0x61   :  { %66 = dma.hbm_to_vmem [thread:$0]  %s4007_s4, 4096, %s61_s27, [#allocation6], %s4030_s28, %s4030_s28, %s3507_s20  }
  0x62   :  { %p3430_p12 = scmp.ne.s32.totalorder %s4012_s9, %s3429_s1  ;;  %p3433_p13 = scmp.lt.u32.totalorder %s3429_s1, %s4012_s9 }
  0x64   :  { %p3435_p0 = pnand %p3433_p13, %p3430_p12 }
  0x66   :  { %3438 = shalt.err (!%p3435_p0)
}
  0x67   :  { %s3439_s19 = scalar_lea.vmem %s3679_s0, 4096  ;;  %p3444_p2 = scmp.lt.s32.totalorder %s3679_s0, %s3679_s0 }
  0x68   :  { %p3440_p1 = scmp.ne.s32.totalorder %s3679_s0, %s3439_s19  ;;  %p3445_p3 = scmp.lt.s32.totalorder %s3439_s19, %s3439_s19 }
  0x6a   :  { %p3446_p4 = por %p3445_p3, %p3444_p2 }
  0x6c   :  { %p3447_p5 = pnand %p3446_p4, %p3440_p1 }
  0x6e   :  { %3450 = shalt.err (!%p3447_p5)
}
  0x6f   :  { %s4031_s4 = smov 4   ;;  %s4032_s20 = smov 64  }
  0x70   :  { %96 = dma.hbm_to_vmem [thread:$0]  %s4012_s9, 4096, %s3679_s0, [#allocation9], %s4032_s20, %s4032_s20, %s4031_s4  }
  0x71   :  { %s3517_s26 = smov [#allocation13]   ;;  %s3451_s24 = scalar_lea.hbm %s4018_s15, 1024 }
  0x72   :  { %s122_s28 = sshll.u32 %s3517_s26, 4  ;;  %p3452_p6 = scmp.ne.s32.totalorder %s4018_s15, %s3451_s24  ;;  %s123_s28 = int_to_ptr.vmem [resolvable:$true] %s122_s28 }
  0x73   :  { %p3455_p7 = scmp.lt.u32.totalorder %s3451_s24, %s4018_s15 }
  0x75   :  { %p3457_p8 = pnand %p3455_p7, %p3452_p6 }
  0x77   :  { %3460 = shalt.err (!%p3457_p8)
}
  0x78   :  { %s3461_s30 = scalar_lea.vmem %s123_s28, 1024  ;;  %p3466_p10 = scmp.lt.s32.totalorder %s123_s28, %s123_s28 }
  0x79   :  { %p3462_p9 = scmp.ne.s32.totalorder %s123_s28, %s3461_s30  ;;  %p3467_p11 = scmp.lt.s32.totalorder %s3461_s30, %s3461_s30 }
  0x7b   :  { %p3468_p12 = por %p3467_p11, %p3466_p10 }
  0x7d   :  { %p3469_p13 = pnand %p3468_p12, %p3462_p9 }
  0x7f   :  { %3472 = shalt.err (!%p3469_p13)
}
  0x80   :  { %128 = dma.hbm_to_vmem [thread:$0]  %s4018_s15, 1024, %s123_s28, [#allocation12], %s4032_s20, %s4032_s20, %s4031_s4  }
  0x81   :  { %3495 = dma.done.wait [#allocation3], 256  }
  0x82   :  { %3496 = vsyncadd [#allocation3], 4294967040 }
  0x83   :  { %3497 = dma.done.wait [#allocation6], 8192  }
  0x84   :  { %3498 = vsyncadd [#allocation6], 4294959104 }
  0x85   :  { %3499 = dma.done.wait [#allocation9], 8192  }
  0x86   :  { %3500 = vsyncadd [#allocation9], 4294959104 }
  0x87   :  { %3501 = dma.done.wait [#allocation12], 2048  }
  0x88   :  { %3502 = vsyncadd [#allocation12], 4294965248  ;;  %v3731_v0 = vld [vmem:[#allocation2] sm:$0xff]  ;;  %v3733_v1 = vld [vmem:[#allocation2 + $0x8] sm:$0xff]  ;;  %v3518_v37 = vmov 0   ;;  %s4033_s19 = sld [smem:[#allocation21_spill]] }
  0x89   :  { %157 = vadd.xlane.f32.xlu0 %v3731_v0  ;;  %v163_v2 = vmul.f32 %v3731_v0, %v3731_v0  ;;  %v3087_v3 = vld [vmem:[#allocation5 + $0x4] ss:$16 sps:$4 sm:$0xff]   ;;  %v3089_v4 = vld [vmem:[#allocation5 + $0xc] ss:$16 sps:$4 sm:$0xff]   ;;  %v3091_v5 = vld [vmem:[#allocation5] ss:$16 sps:$4 sm:$0xff]   ;;  %v164_v6 = vmul.f32 %v3733_v1, %v3733_v1  ;;  %446 = vmatprep.mubr.bf16.mxu0 %v3518_v37 }
  0x8a   :  { %414 = vmatprep.subr.bf16.mxu0 %v3087_v3  ;;  %v3092_v7 = vld [vmem:[#allocation5 + $0x8] ss:$16 sps:$4 sm:$0xff]   ;;  %457 = vmatprep.subr.bf16.mxu1 %v3089_v4  ;;  %v3093_v8 = vld [vmem:[#allocation5 + $0x24] ss:$16 sps:$4 sm:$0xff]   ;;  %v3095_v9 = vld [vmem:[#allocation5 + $0x2c] ss:$16 sps:$4 sm:$0xff]  }
  0x8b   :  { %165 = vadd.xlane.f32.xlu1 %v163_v2  ;;  %415 = vmatpush1.bf16.msra.mxu0 %v3091_v5  ;;  %v3097_v10 = vld [vmem:[#allocation5 + $0x20] ss:$16 sps:$4 sm:$0xff]   ;;  %v3098_v11 = vld [vmem:[#allocation5 + $0x28] ss:$16 sps:$4 sm:$0xff]   ;;  %v3099_v12 = vld [vmem:[#allocation5 + $0x44] ss:$16 sps:$4 sm:$0xff]  }
  0x8c   :  { %458 = vmatpush1.bf16.msra.mxu1 %v3092_v7  ;;  %416 = vmatprep.subr.bf16.mxu0 %v3093_v8  ;;  %v3101_v13 = vld [vmem:[#allocation5 + $0x4c] ss:$16 sps:$4 sm:$0xff]   ;;  %v3103_v14 = vld [vmem:[#allocation5 + $0x40] ss:$16 sps:$4 sm:$0xff]   ;;  %v3104_v15 = vld [vmem:[#allocation5 + $0x48] ss:$16 sps:$4 sm:$0xff]  }
  0x8d   :  { %159 = vadd.xlane.f32.xlu0 %v3733_v1  ;;  %459 = vmatprep.subr.bf16.mxu1 %v3095_v9  ;;  %v3105_v16 = vld [vmem:[#allocation5 + $0x64] ss:$16 sps:$4 sm:$0xff]   ;;  %v3107_v17 = vld [vmem:[#allocation5 + $0x6c] ss:$16 sps:$4 sm:$0xff]   ;;  %v3109_v18 = vld [vmem:[#allocation5 + $0x60] ss:$16 sps:$4 sm:$0xff]  }
  0x8e   :  { %v3110_v19 = vld [vmem:[#allocation5 + $0x68] ss:$16 sps:$4 sm:$0xff]   ;;  %v3111_v20 = vld [vmem:[#allocation5 + $0x84] ss:$16 sps:$4 sm:$0xff]   ;;  %v3113_v21 = vld [vmem:[#allocation5 + $0x8c] ss:$16 sps:$4 sm:$0xff]   ;;  %489 = vmatprep.mubr.bf16.mxu1 %v3518_v37 }
  0x8f   :  { %167 = vadd.xlane.f32.xlu1 %v164_v6  ;;  %417 = vmatpush1.bf16.msra.mxu0 %v3097_v10  ;;  %v3115_v22 = vld [vmem:[#allocation5 + $0x80] ss:$16 sps:$4 sm:$0xff]   ;;  %v3116_v23 = vld [vmem:[#allocation5 + $0x88] ss:$16 sps:$4 sm:$0xff]   ;;  %v3117_v24 = vld [vmem:[#allocation5 + $0xa4] ss:$16 sps:$4 sm:$0xff]  }
  0x90   :  { %460 = vmatpush1.bf16.msra.mxu1 %v3098_v11  ;;  %418 = vmatprep.subr.bf16.mxu0 %v3099_v12  ;;  %v3119_v25 = vld [vmem:[#allocation5 + $0xac] ss:$16 sps:$4 sm:$0xff]   ;;  %v3121_v26 = vld [vmem:[#allocation5 + $0xa0] ss:$16 sps:$4 sm:$0xff]   ;;  %v3122_v27 = vld [vmem:[#allocation5 + $0xa8] ss:$16 sps:$4 sm:$0xff]  }
  0x91   :  { %461 = vmatprep.subr.bf16.mxu1 %v3101_v13  ;;  %v3123_v28 = vld [vmem:[#allocation5 + $0xc4] ss:$16 sps:$4 sm:$0xff]   ;;  %v3125_v29 = vld [vmem:[#allocation5 + $0xcc] ss:$16 sps:$4 sm:$0xff]   ;;  %v3127_v30 = vld [vmem:[#allocation5 + $0xc0] ss:$16 sps:$4 sm:$0xff]  }
  0x92   :  { %v3128_v31 = vld [vmem:[#allocation5 + $0xc8] ss:$16 sps:$4 sm:$0xff]   ;;  %v3129_v32 = vld [vmem:[#allocation5 + $0xe4] ss:$16 sps:$4 sm:$0xff]   ;;  %v3131_v33 = vld [vmem:[#allocation5 + $0xec] ss:$16 sps:$4 sm:$0xff]  }
  0x93   :  { %419 = vmatpush1.bf16.msra.mxu0 %v3103_v14  ;;  %v3133_v34 = vld [vmem:[#allocation5 + $0xe0] ss:$16 sps:$4 sm:$0xff]   ;;  %v3134_v35 = vld [vmem:[#allocation5 + $0xe8] ss:$16 sps:$4 sm:$0xff]   ;;  %v3137_v36 = vld [vmem:[#allocation7 + $0x4] ss:$16 sps:$4 sm:$0xff]  }
  0x94   :  { %462 = vmatpush1.bf16.msra.mxu1 %v3104_v15  ;;  %420 = vmatprep.subr.bf16.mxu0 %v3105_v16  ;;  %v3140_v38 = vld [vmem:[#allocation7 + $0xc] ss:$16 sps:$4 sm:$0xff]   ;;  %v2649_v56 = vld [vmem:[%s4033_s19] ss:$0 sm:$0xff]  ;;  %v3138_v3 = vld [vmem:[#allocation7 + $0x8] ss:$16 sps:$4 sm:$0xff]  }
  0x95   :  { %463 = vmatprep.subr.bf16.mxu1 %v3107_v17  ;;  %v2650_v61 = vld [vmem:[%s4005_s2] ss:$0 sm:$0xff]  ;;  %v3143_v5 = vld [vmem:[#allocation7 + $0x24] ss:$16 sps:$4 sm:$0xff]   ;;  %v3144_v7 = vld [vmem:[#allocation7 + $0x28] ss:$16 sps:$4 sm:$0xff]  }
  0x96   :  { %v3141_v6 = vld [vmem:[#allocation7 + $0x20] ss:$16 sps:$4 sm:$0xff]   ;;  %v3149_v8 = vld [vmem:[#allocation7 + $0x44] ss:$16 sps:$4 sm:$0xff]   ;;  %v3152_v9 = vld [vmem:[#allocation7 + $0x4c] ss:$16 sps:$4 sm:$0xff]  }
  0x97   :  { %421 = vmatpush1.bf16.msra.mxu0 %v3109_v18  ;;  %v3147_v10 = vld [vmem:[#allocation7 + $0x40] ss:$16 sps:$4 sm:$0xff]   ;;  %v3150_v11 = vld [vmem:[#allocation7 + $0x48] ss:$16 sps:$4 sm:$0xff]   ;;  %v3155_v12 = vld [vmem:[#allocation7 + $0x64] ss:$16 sps:$4 sm:$0xff]  }
  0x98   :  { %464 = vmatpush1.bf16.msra.mxu1 %v3110_v19  ;;  %422 = vmatprep.subr.bf16.mxu0 %v3111_v20  ;;  %v3158_v13 = vld [vmem:[#allocation7 + $0x6c] ss:$16 sps:$4 sm:$0xff]   ;;  %v3153_v14 = vld [vmem:[#allocation7 + $0x60] ss:$16 sps:$4 sm:$0xff]   ;;  %v3156_v15 = vld [vmem:[#allocation7 + $0x68] ss:$16 sps:$4 sm:$0xff]  }
  0x99   :  { %465 = vmatprep.subr.bf16.mxu1 %v3113_v21  ;;  %v3161_v16 = vld [vmem:[#allocation7 + $0x84] ss:$16 sps:$4 sm:$0xff]   ;;  %v3164_v17 = vld [vmem:[#allocation7 + $0x8c] ss:$16 sps:$4 sm:$0xff]   ;;  %v3159_v18 = vld [vmem:[#allocation7 + $0x80] ss:$16 sps:$4 sm:$0xff]  }
  0x9a   :  { %v3162_v19 = vld [vmem:[#allocation7 + $0x88] ss:$16 sps:$4 sm:$0xff]   ;;  %v3167_v20 = vld [vmem:[#allocation7 + $0xa4] ss:$16 sps:$4 sm:$0xff]   ;;  %v3170_v21 = vld [vmem:[#allocation7 + $0xac] ss:$16 sps:$4 sm:$0xff]  }
  0x9b   :  { %423 = vmatpush1.bf16.msra.mxu0 %v3115_v22  ;;  %v3165_v22 = vld [vmem:[#allocation7 + $0xa0] ss:$16 sps:$4 sm:$0xff]   ;;  %vm3520_vm0 = vmmov 0   ;;  %vm1276_vm1 = vcmask 1043456   ;;  %vm1248_vm2 = vcmask 64512   ;;  %s3521_s3 = smov [#allocation14]  }
  0x9c   :  { %466 = vmatpush1.bf16.msra.mxu1 %v3116_v23  ;;  %424 = vmatprep.subr.bf16.mxu0 %v3117_v24  ;;  %v3168_v23 = vld [vmem:[#allocation7 + $0xa8] ss:$16 sps:$4 sm:$0xff]   ;;  %v3173_v24 = vld [vmem:[#allocation7 + $0xc4] ss:$16 sps:$4 sm:$0xff]  }
  0x9d   :  { %467 = vmatprep.subr.bf16.mxu1 %v3119_v25  ;;  %v3176_v25 = vld [vmem:[#allocation7 + $0xcc] ss:$16 sps:$4 sm:$0xff]  }
  0x9f   :  { %425 = vmatpush1.bf16.msra.mxu0 %v3121_v26  ;;  %v3171_v26 = vld [vmem:[#allocation7 + $0xc0] ss:$16 sps:$4 sm:$0xff]  }
  0xa0   :  { %468 = vmatpush1.bf16.msra.mxu1 %v3122_v27  ;;  %426 = vmatprep.subr.bf16.mxu0 %v3123_v28  ;;  %v3174_v27 = vld [vmem:[#allocation7 + $0xc8] ss:$16 sps:$4 sm:$0xff]   ;;  %v3179_v28 = vld [vmem:[#allocation7 + $0xe4] ss:$16 sps:$4 sm:$0xff]  }
  0xa1   :  { %469 = vmatprep.subr.bf16.mxu1 %v3125_v29  ;;  %v3182_v29 = vld [vmem:[#allocation7 + $0xec] ss:$16 sps:$4 sm:$0xff]  }
  0xa3   :  { %427 = vmatpush1.bf16.msra.mxu0 %v3127_v30  ;;  %v3177_v30 = vld [vmem:[#allocation7 + $0xe0] ss:$16 sps:$4 sm:$0xff]  }
  0xa4   :  { %470 = vmatpush1.bf16.msra.mxu1 %v3128_v31  ;;  %428 = vmatprep.subr.bf16.mxu0 %v3129_v32  ;;  %v3180_v31 = vld [vmem:[#allocation7 + $0xe8] ss:$16 sps:$4 sm:$0xff]   ;;  %v3185_v32 = vld [vmem:[#allocation8 + $0x4] ss:$16 sps:$4 sm:$0xff]  }
  0xa5   :  { %471 = vmatprep.subr.bf16.mxu1 %v3131_v33  ;;  %v3188_v33 = vld [vmem:[#allocation8 + $0xc] ss:$16 sps:$4 sm:$0xff]  }
  0xa7   :  { %429 = vmatpush1.bf16.msra.mxu0 %v3133_v34  ;;  %v3183_v34 = vld [vmem:[#allocation8] ss:$16 sps:$4 sm:$0xff]  }
  0xa8   :  { %472 = vmatpush1.bf16.msra.mxu1 %v3134_v35  ;;  %714 = vmatprep.subr.bf16.mxu0 %v3137_v36  ;;  %v3186_v35 = vld [vmem:[#allocation8 + $0x8] ss:$16 sps:$4 sm:$0xff]   ;;  %v3191_v36 = vld [vmem:[#allocation8 + $0x24] ss:$16 sps:$4 sm:$0xff]  }
  0xa9   :  { %757 = vmatprep.subr.bf16.mxu1 %v3140_v38  ;;  %v3194_v38 = vld [vmem:[#allocation8 + $0x2c] ss:$16 sps:$4 sm:$0xff]  }
 0x116   :  { %v158_v39 = vpop.xlane.xlu0 %157 }
 0x117   :  { %v161_v40 = vmul.f32 0.03125, %v158_v39  ;;  %v3189_v39 = vld [vmem:[#allocation8 + $0x20] ss:$16 sps:$4 sm:$0xff]  }
 0x118   :  { %v166_v41 = vpop.xlane.xlu1 %165 }
 0x119   :  { %v171_v42 = vmul.f32 %v161_v40, %v161_v40  ;;  %v169_v43 = vmul.f32 0.03125, %v166_v41  ;;  %v175_v53 = vsub.f32 %v3731_v0, %v161_v40  ;;  %v3135_v0 = vld [vmem:[#allocation7] ss:$16 sps:$4 sm:$0xff]   ;;  %v3192_v40 = vld [vmem:[#allocation8 + $0x28] ss:$16 sps:$4 sm:$0xff]  }
 0x11a   :  { %v160_v44 = vpop.xlane.xlu0 %159  ;;  %v3197_v41 = vld [vmem:[#allocation8 + $0x44] ss:$16 sps:$4 sm:$0xff]  }
 0x11b   :  { %v173_v45 = vsub.f32 %v169_v43, %v171_v42  ;;  %v162_v46 = vmul.f32 0.03125, %v160_v44  ;;  %v3200_v42 = vld [vmem:[#allocation8 + $0x4c] ss:$16 sps:$4 sm:$0xff]   ;;  %v3195_v43 = vld [vmem:[#allocation8 + $0x40] ss:$16 sps:$4 sm:$0xff]  }
 0x11c   :  { %v168_v47 = vpop.xlane.xlu1 %167  ;;  %v3198_v44 = vld [vmem:[#allocation8 + $0x48] ss:$16 sps:$4 sm:$0xff]  }
 0x11d   :  { %v177_v48 = vadd.f32 1e-05, %v173_v45  ;;  %v172_v49 = vmul.f32 %v162_v46, %v162_v46  ;;  %v170_v50 = vmul.f32 0.03125, %v168_v47  ;;  %v176_v57 = vsub.f32 %v3733_v1, %v162_v46  ;;  %v3146_v1 = vld [vmem:[#allocation7 + $0x2c] ss:$16 sps:$4 sm:$0xff]  }
 0x11e   :  { %v3203_v45 = vld [vmem:[#allocation8 + $0x64] ss:$16 sps:$4 sm:$0xff]   ;;  %v3206_v46 = vld [vmem:[#allocation8 + $0x6c] ss:$16 sps:$4 sm:$0xff]   ;;  %v3201_v47 = vld [vmem:[#allocation8 + $0x60] ss:$16 sps:$4 sm:$0xff]  }
 0x11f   :  { %3279 = vrsqrt.f32 %v177_v48  ;;  %v174_v51 = vsub.f32 %v170_v50, %v172_v49  ;;  %v3204_v48 = vld [vmem:[#allocation8 + $0x68] ss:$16 sps:$4 sm:$0xff]   ;;  %v3209_v49 = vld [vmem:[#allocation8 + $0x84] ss:$16 sps:$4 sm:$0xff]   ;;  %v3212_v50 = vld [vmem:[#allocation8 + $0x8c] ss:$16 sps:$4 sm:$0xff]  }
 0x121   :  { %v178_v52 = vadd.f32 1e-05, %v174_v51  ;;  %v3207_v51 = vld [vmem:[#allocation8 + $0x80] ss:$16 sps:$4 sm:$0xff]  }
 0x123   :  { %3281 = vrsqrt.f32 %v178_v52  ;;  %v3215_v52 = vld [vmem:[#allocation8 + $0xa4] ss:$16 sps:$4 sm:$0xff]  }
 0x129   :  { %v3280_v54 = vpop.eup %3279 }
 0x12a   :  { %v181_v55 = vmul.f32 %v3280_v54, %v175_v53  ;;  %v3218_v53 = vld [vmem:[#allocation8 + $0xac] ss:$16 sps:$4 sm:$0xff]   ;;  %v3213_v54 = vld [vmem:[#allocation8 + $0xa0] ss:$16 sps:$4 sm:$0xff]  }
 0x12c   :  { %v189_v59 = vmul.f32 %v2649_v56, %v181_v55  ;;  %v3216_v55 = vld [vmem:[#allocation8 + $0xa8] ss:$16 sps:$4 sm:$0xff]  }
 0x12d   :  { %v3282_v58 = vpop.eup %3281 }
 0x12e   :  { %v182_v60 = vmul.f32 %v3282_v58, %v176_v57  ;;  %v3751_v63 = vadd.f32 %v2650_v61, %v189_v59  ;;  %v3224_v57 = vld [vmem:[#allocation8 + $0xcc] ss:$16 sps:$4 sm:$0xff]   ;;  %v3219_v58 = vld [vmem:[#allocation8 + $0xc0] ss:$16 sps:$4 sm:$0xff]   ;;  %v3222_v59 = vld [vmem:[#allocation8 + $0xc8] ss:$16 sps:$4 sm:$0xff]  }
 0x130   :  { %v190_v62 = vmul.f32 %v2649_v56, %v182_v60  ;;  %v3221_v56 = vld [vmem:[#allocation8 + $0xc4] ss:$16 sps:$4 sm:$0xff]  }
 0x131   :  { %v3227_v60 = vld [vmem:[#allocation8 + $0xe4] ss:$16 sps:$4 sm:$0xff]  }
 0x132   :  { %v3753_v2 = vadd.f32 %v2650_v61, %v190_v62  ;;  %v3230_v61 = vld [vmem:[#allocation8 + $0xec] ss:$16 sps:$4 sm:$0xff]   ;;  %v3225_v62 = vld [vmem:[#allocation8 + $0xe0] ss:$16 sps:$4 sm:$0xff]  }
 0x134   :  { %v3757_v4 = vpack.c.bf16 %v3753_v2, %v3751_v63 }
 0x136   :  { %447 = vmatmul.mubr.bf16.vlgmr.msra.gmra.mrb[0].mxu0 %v3757_v4  ;;  %490 = vmatmul.mubr.bf16.vlgmr.msra.gmra.mrb[0].mxu1 %v3757_v4 }
 0x137   :  { %715 = vmatpush1.bf16.msra.mxu0 %v3135_v0  ;;  %758 = vmatpush1.bf16.msra.mxu1 %v3138_v3  ;;  %v3228_v0 = vld [vmem:[#allocation8 + $0xe8] ss:$16 sps:$4 sm:$0xff]   ;;  %v3519_v3 = vmov 0.0  }
 0x138   :  { %716 = vmatprep.subr.bf16.mxu0 %v3143_v5  ;;  %759 = vmatprep.subr.bf16.mxu1 %v3146_v1  ;;  %v234_v5 = vlaneseq }
 0x139   :  { %746 = vmatprep.mubr.bf16.mxu0 %v3518_v37  ;;  %789 = vmatprep.mubr.bf16.mxu1 %v3518_v37 }
 0x13a   :  { %v235_v1 = vshrl.u32 %v234_v5, 7 }
 0x13b   :  { %717 = vmatpush1.bf16.msra.mxu0 %v3141_v6  ;;  %760 = vmatpush1.bf16.msra.mxu1 %v3144_v7 }
 0x13c   :  { %718 = vmatprep.subr.bf16.mxu0 %v3149_v8  ;;  %761 = vmatprep.subr.bf16.mxu1 %v3152_v9  ;;  %v3775_v6 = vsub.s32 0, %v235_v1  ;;  %v3777_v7 = vsub.s32 2, %v235_v1  ;;  %v240_v8 = vsub.s32 1, %v235_v1  ;;  %v248_v9 = vsub.s32 3, %v235_v1 }
 0x13f   :  { %719 = vmatpush1.bf16.msra.mxu0 %v3147_v10  ;;  %762 = vmatpush1.bf16.msra.mxu1 %v3150_v11 }
 0x140   :  { %720 = vmatprep.subr.bf16.mxu0 %v3155_v12  ;;  %763 = vmatprep.subr.bf16.mxu1 %v3158_v13 }
 0x143   :  { %721 = vmatpush1.bf16.msra.mxu0 %v3153_v14  ;;  %764 = vmatpush1.bf16.msra.mxu1 %v3156_v15 }
 0x144   :  { %722 = vmatprep.subr.bf16.mxu0 %v3161_v16  ;;  %765 = vmatprep.subr.bf16.mxu1 %v3164_v17 }
 0x147   :  { %723 = vmatpush1.bf16.msra.mxu0 %v3159_v18  ;;  %766 = vmatpush1.bf16.msra.mxu1 %v3162_v19 }
 0x148   :  { %724 = vmatprep.subr.bf16.mxu0 %v3167_v20  ;;  %767 = vmatprep.subr.bf16.mxu1 %v3170_v21 }
 0x14b   :  { %725 = vmatpush1.bf16.msra.mxu0 %v3165_v22  ;;  %768 = vmatpush1.bf16.msra.mxu1 %v3168_v23 }
 0x14c   :  { %726 = vmatprep.subr.bf16.mxu0 %v3173_v24  ;;  %769 = vmatprep.subr.bf16.mxu1 %v3176_v25 }
 0x14f   :  { %727 = vmatpush1.bf16.msra.mxu0 %v3171_v26  ;;  %770 = vmatpush1.bf16.msra.mxu1 %v3174_v27 }
 0x150   :  { %728 = vmatprep.subr.bf16.mxu0 %v3179_v28  ;;  %771 = vmatprep.subr.bf16.mxu1 %v3182_v29 }
 0x153   :  { %729 = vmatpush1.bf16.msra.mxu0 %v3177_v30  ;;  %772 = vmatpush1.bf16.msra.mxu1 %v3180_v31 }
 0x154   :  { %1014 = vmatprep.subr.bf16.mxu0 %v3185_v32  ;;  %1057 = vmatprep.subr.bf16.mxu1 %v3188_v33 }
 0x156   :  { %747 = vmatmul.mubr.bf16.vlgmr.msra.gmra.mrb[4].mxu0 %v3757_v4  ;;  %790 = vmatmul.mubr.bf16.vlgmr.msra.gmra.mrb[4].mxu1 %v3757_v4 }
 0x157   :  { %1015 = vmatpush1.bf16.msra.mxu0 %v3183_v34  ;;  %1058 = vmatpush1.bf16.msra.mxu1 %v3186_v35  ;;  %v532_v34 = vld [vmem:[%s4010_s7] sm:$0xf] }
 0x158   :  { %1016 = vmatprep.subr.bf16.mxu0 %v3191_v36  ;;  %1059 = vmatprep.subr.bf16.mxu1 %v3194_v38  ;;  %v537_v35 = vrot.slane %v532_v34, %v3775_v6  ;;  %v545_v36 = vrot.slane %v532_v34, %v3777_v7  ;;  %v541_v38 = vrot.slane %v532_v34, %v240_v8 }
 0x159   :  { %1046 = vmatprep.mubr.bf16.mxu0 %v3518_v37  ;;  %1089 = vmatprep.mubr.bf16.mxu1 %v3518_v37  ;;  %v3210_v37 = vld [vmem:[#allocation8 + $0x88] ss:$16 sps:$4 sm:$0xff]  }
 0x15b   :  { %1017 = vmatpush1.bf16.msra.mxu0 %v3189_v39  ;;  %1060 = vmatpush1.bf16.msra.mxu1 %v3192_v40  ;;  %v549_v39 = vrot.slane %v532_v34, %v248_v9 }
 0x15c   :  { %1018 = vmatprep.subr.bf16.mxu0 %v3197_v41  ;;  %1061 = vmatprep.subr.bf16.mxu1 %v3200_v42 }
 0x15f   :  { %1019 = vmatpush1.bf16.msra.mxu0 %v3195_v43  ;;  %1062 = vmatpush1.bf16.msra.mxu1 %v3198_v44 }
 0x160   :  { %1020 = vmatprep.subr.bf16.mxu0 %v3203_v45  ;;  %1063 = vmatprep.subr.bf16.mxu1 %v3206_v46 }
 0x163   :  { %1021 = vmatpush1.bf16.msra.mxu0 %v3201_v47  ;;  %1064 = vmatpush1.bf16.msra.mxu1 %v3204_v48 }
 0x164   :  { %1022 = vmatprep.subr.bf16.mxu0 %v3209_v49  ;;  %1065 = vmatprep.subr.bf16.mxu1 %v3212_v50 }
 0x167   :  { %1023 = vmatpush1.bf16.msra.mxu0 %v3207_v51  ;;  %1066 = vmatpush1.bf16.msra.mxu1 %v3210_v37 }
 0x168   :  { %1024 = vmatprep.subr.bf16.mxu0 %v3215_v52  ;;  %1067 = vmatprep.subr.bf16.mxu1 %v3218_v53 }
 0x16b   :  { %1025 = vmatpush1.bf16.msra.mxu0 %v3213_v54  ;;  %1068 = vmatpush1.bf16.msra.mxu1 %v3216_v55 }
 0x16c   :  { %1026 = vmatprep.subr.bf16.mxu0 %v3221_v56  ;;  %1069 = vmatprep.subr.bf16.mxu1 %v3224_v57 }
 0x16f   :  { %1027 = vmatpush1.bf16.msra.mxu0 %v3219_v58  ;;  %1070 = vmatpush1.bf16.msra.mxu1 %v3222_v59  ;;  %v832_v59 = vld [vmem:[%s4011_s8] sm:$0xf] }
 0x170   :  { %1028 = vmatprep.subr.bf16.mxu0 %v3227_v60  ;;  %1071 = vmatprep.subr.bf16.mxu1 %v3230_v61  ;;  %v837_v60 = vrot.slane %v832_v59, %v3775_v6  ;;  %v845_v61 = vrot.slane %v832_v59, %v3777_v7 }
 0x173   :  { %1029 = vmatpush1.bf16.msra.mxu0 %v3225_v62  ;;  %1072 = vmatpush1.bf16.msra.mxu1 %v3228_v0  ;;  %v841_v62 = vrot.slane %v832_v59, %v240_v8  ;;  %v849_v0 = vrot.slane %v832_v59, %v248_v9 }
 0x174   :  { %2934 = vmatprep.subr.bf16.mxu0 %v3519_v3  ;;  %2940 = vmatprep.subr.bf16.mxu1 %v3519_v3 }
 0x176   :  { %1047 = vmatmul.mubr.bf16.vlgmr.msra.gmra.mrb[8].mxu0 %v3757_v4  ;;  %1090 = vmatmul.mubr.bf16.vlgmr.msra.gmra.mrb[8].mxu1 %v3757_v4  ;;  %v232_v4 = vld [vmem:[%s4009_s6] sm:$0xf] }
 0x177   :  { %2936 = vmatprep.mubr.msk.bf16.mxu0 %vm3520_vm0, %v3519_v3  ;;  %2942 = vmatprep.mubr.msk.bf16.mxu1 %vm3520_vm0, %v3519_v3  ;;  %v237_v10 = vrot.slane %v232_v4, %v3775_v6  ;;  %v245_v11 = vrot.slane %v232_v4, %v3777_v7  ;;  %v241_v12 = vrot.slane %v232_v4, %v240_v8 }
 0x178   :  { %v249_v13 = vrot.slane %v232_v4, %v248_v9 }
 0x209   :  { %v448_v14 = vpop.f32.mrb[0].mxu0  ;;  %v491_v15 = vpop.f32.mrb[0].mxu1 }
 0x20a   :  { %v449_v16 = vadd.f32 %v448_v14, %v237_v10  ;;  %v492_v17 = vadd.f32 %v491_v15, %v245_v11  ;;  %v450_v18 = vpop.f32.mrb[1].mxu0  ;;  %v493_v19 = vpop.f32.mrb[1].mxu1 }
 0x20b   :  { %v451_v20 = vadd.f32 %v450_v18, %v241_v12  ;;  %v494_v21 = vadd.f32 %v493_v19, %v249_v13  ;;  %v452_v22 = vpop.f32.mrb[2].mxu0  ;;  %v495_v23 = vpop.f32.mrb[2].mxu1 }
 0x20c   :  { %v453_v24 = vadd.f32 %v452_v22, %v237_v10  ;;  %v496_v25 = vadd.f32 %v495_v23, %v245_v11  ;;  %v454_v26 = vpop.f32.mrb[3].mxu0  ;;  %v497_v27 = vpop.f32.mrb[3].mxu1 }
 0x20d   :  { %v3784_v28 = vpack.c.bf16 %v451_v20, %v449_v16  ;;  %v3786_v29 = vpack.c.bf16 %v494_v21, %v492_v17  ;;  %v455_v30 = vadd.f32 %v454_v26, %v241_v12  ;;  %v498_v31 = vadd.f32 %v497_v27, %v249_v13 }
 0x20f   :  { %v3788_v32 = vpack.c.bf16 %v455_v30, %v453_v24  ;;  %v3790_v33 = vpack.c.bf16 %v498_v31, %v496_v25 }
 0x229   :  { %v748_v40 = vpop.f32.mrb[4].mxu0  ;;  %v791_v41 = vpop.f32.mrb[4].mxu1 }
 0x22a   :  { %v749_v42 = vadd.f32 %v748_v40, %v537_v35  ;;  %v792_v43 = vadd.f32 %v791_v41, %v545_v36  ;;  %v750_v44 = vpop.f32.mrb[5].mxu0  ;;  %v793_v45 = vpop.f32.mrb[5].mxu1 }
 0x22b   :  { %v751_v46 = vadd.f32 %v750_v44, %v541_v38  ;;  %v794_v47 = vadd.f32 %v793_v45, %v549_v39  ;;  %v752_v48 = vpop.f32.mrb[6].mxu0  ;;  %v795_v49 = vpop.f32.mrb[6].mxu1 }
 0x22c   :  { %v753_v50 = vadd.f32 %v752_v48, %v537_v35  ;;  %v796_v51 = vadd.f32 %v795_v49, %v545_v36  ;;  %v754_v37 = vpop.f32.mrb[7].mxu0  ;;  %v797_v52 = vpop.f32.mrb[7].mxu1 }
 0x22d   :  { %v3797_v53 = vpack.c.bf16 %v751_v46, %v749_v42  ;;  %v3799_v54 = vpack.c.bf16 %v794_v47, %v792_v43  ;;  %v755_v55 = vadd.f32 %v754_v37, %v541_v38  ;;  %v798_v56 = vadd.f32 %v797_v52, %v549_v39 }
 0x22f   :  { %v3801_v57 = vpack.c.bf16 %v755_v55, %v753_v50  ;;  %v3803_v58 = vpack.c.bf16 %v798_v56, %v796_v51  ;;  %2935 = vmatpush3.bf16.xpose.msra.mxu0 %v3797_v53 }
 0x230   :  { %2946 = vmatprep.subr.bf16.mxu0 %v3519_v3 }
 0x231   :  { %2941 = vmatpush3.bf16.xpose.msra.mxu1 %v3801_v57 }
 0x232   :  { %2952 = vmatprep.subr.bf16.mxu1 %v3519_v3 }
 0x236   :  { %2937 = vmatmul.mubr.bf16.vlgmr.msra.gmra.mrb[12].mxu0 %v3784_v28 }
 0x237   :  { %2948 = vmatprep.mubr.msk.bf16.mxu0 %vm3520_vm0, %v3519_v3 }
 0x238   :  { %2943 = vmatmul.mubr.bf16.vlgmr.msra.gmra.mrb[12].mxu1 %v3788_v32 }
 0x239   :  { %2954 = vmatprep.mubr.msk.bf16.mxu1 %vm3520_vm0, %v3519_v3 }
 0x249   :  { %v1048_v5 = vpop.f32.mrb[8].mxu0  ;;  %v1091_v1 = vpop.f32.mrb[8].mxu1 }
 0x24a   :  { %v1049_v4 = vadd.f32 %v1048_v5, %v837_v60  ;;  %v1092_v10 = vadd.f32 %v1091_v1, %v845_v61  ;;  %v1050_v11 = vpop.f32.mrb[9].mxu0  ;;  %v1093_v12 = vpop.f32.mrb[9].mxu1 }
 0x24b   :  { %v1051_v13 = vadd.f32 %v1050_v11, %v841_v62  ;;  %v1094_v14 = vadd.f32 %v1093_v12, %v849_v0  ;;  %v1052_v15 = vpop.f32.mrb[10].mxu0  ;;  %v1095_v16 = vpop.f32.mrb[10].mxu1 }
 0x24c   :  { %v1053_v17 = vadd.f32 %v1052_v15, %v837_v60  ;;  %v1096_v18 = vadd.f32 %v1095_v16, %v845_v61  ;;  %v1054_v19 = vpop.f32.mrb[11].mxu0  ;;  %v1097_v20 = vpop.f32.mrb[11].mxu1  ;;  %v1414_v15 = vrot.slane %v3801_v57, 4  ;;  %v1412_v16 = vrot.slane %v3788_v32, 4 }
 0x24d   :  { %v2832_v6 = vpack.c.bf16 %v1051_v13, %v1049_v4  ;;  %v2833_v21 = vpack.c.bf16 %v1094_v14, %v1092_v10  ;;  %v1055_v7 = vadd.f32 %v1054_v19, %v841_v62  ;;  %v1098_v8 = vadd.f32 %v1097_v20, %v849_v0 }
 0x24e   :  { %v1370_v13 = vrot.slane %v3797_v53, 4  ;;  %v1368_v53 = vrot.slane %v3784_v28, 4 }
 0x24f   :  { %v1480_v9 = vrot.slane %v2832_v6, 4  ;;  %v1886_v22 = vrot.slane %v2833_v21, 4  ;;  %v2834_v23 = vpack.c.bf16 %v1055_v7, %v1053_v17  ;;  %v2835_v24 = vpack.c.bf16 %v1098_v8, %v1096_v18 }
 0x250   :  { %v1278_v25 = vsel %vm1276_vm1, %v2832_v6, 0  ;;  %v3822_v26 = vsel %vm1276_vm1, %v2833_v21, 0 }
 0x251   :  { %v1527_v27 = vrot.slane %v2834_v23, 4  ;;  %v1933_v30 = vrot.slane %v2835_v24, 4  ;;  %2947 = vmatpush3.bf16.msra.mxu0 %v1278_v25  ;;  %v1324_v31 = vsel %vm1276_vm1, %v2834_v23, 0  ;;  %v1485_v34 = vsel %vm1276_vm1, %v1480_v9, 0 }
 0x252   :  { %2953 = vmatpush3.bf16.msra.mxu1 %v1324_v31  ;;  %2958 = vmatprep.subr.bf16.mxu0 %v3519_v3  ;;  %v3828_v35 = vsel %vm1276_vm1, %v2835_v24, 0  ;;  %v3831_v36 = vsel %vm1276_vm1, %v1886_v22, 0 }
 0x253   :  { %2964 = vmatprep.subr.bf16.mxu1 %v3519_v3  ;;  %v1532_v38 = vsel %vm1276_vm1, %v1527_v27, 0  ;;  %v3836_v39 = vsel %vm1276_vm1, %v1933_v30, 0 }
 0x309   :  { %v1202_v40 = vpop.f32.mrb[12].mxu0 }
 0x30a   :  { %v2938_v41 = vpop.f32.mrb[13].mxu0  ;;  %v1249_v42 = vsel %vm1248_vm2, %v1202_v40, -inf }
 0x30b   :  { %v1242_v43 = vpop.f32.mrb[12].mxu1  ;;  %1250 = vmax.xlane.f32.xlu0 %v1249_v42  ;;  %v1205_v44 = vpop.f32.mrb[14].mxu0 }
 0x30c   :  { %v2939_v45 = vpop.f32.mrb[15].mxu0  ;;  %v2944_v46 = vpop.f32.mrb[13].mxu1  ;;  %v1252_v47 = vsel %vm1248_vm2, %v1242_v43, -inf }
 0x30d   :  { %1253 = vmax.xlane.f32.xlu1 %v1252_v47  ;;  %v1245_v48 = vpop.f32.mrb[14].mxu1 }
 0x30e   :  { %v2945_v49 = vpop.f32.mrb[15].mxu1 }
 0x398   :  { %v1251_v50 = vpop.xlane.xlu0 %1250 }
 0x399   :  { %v1255_v51 = vsub.f32 %v1202_v40, %v1251_v50 }
 0x39a   :  { %v1254_v37 = vpop.xlane.xlu1 %1253 }
 0x39b   :  { %v1257_v52 = vmul.f32 1.442695, %v1255_v51  ;;  %v1256_v55 = vsub.f32 %v1242_v43, %v1254_v37 }
 0x39d   :  { %3283 = vpow2.f32 %v1257_v52  ;;  %v1259_v56 = vmul.f32 1.442695, %v1256_v55 }
 0x39f   :  { %3285 = vpow2.f32 %v1259_v56 }
 0x3a7   :  { %v3284_v59 = vpop.eup %3283 }
 0x3a8   :  { %v1261_v60 = vsel %vm1248_vm2, %v3284_v59, 0.0 }
 0x3a9   :  { %v3286_v61 = vpop.eup %3285  ;;  %1262 = vadd.xlane.f32.xlu0 %v1261_v60 }
 0x3aa   :  { %v1264_v62 = vsel %vm1248_vm2, %v3286_v61, 0.0 }
 0x3ab   :  { %1265 = vadd.xlane.f32.xlu1 %v1264_v62 }
 0x436   :  { %v1263_v0 = vpop.xlane.xlu0 %1262 }
 0x437   :  { %3287 = vrcp.f32 %v1263_v0 }
 0x438   :  { %v1266_v5 = vpop.xlane.xlu1 %1265 }
 0x439   :  { %3289 = vrcp.f32 %v1266_v5 }
 0x441   :  { %v3288_v1 = vpop.eup %3287 }
 0x442   :  { %v1269_v4 = vmul.f32 %v3288_v1, %v3284_v59 }
 0x443   :  { %v3290_v10 = vpop.eup %3289 }
 0x444   :  { %v1270_v11 = vmul.f32 %v3290_v10, %v3286_v61  ;;  %v1271_v12 = vpack.c.bf16 %v1269_v4, %v1269_v4 }
 0x446   :  { %2949 = vmatmul.mubr.msk.bf16.vlgmr.msra.gmra.mrb[16].mxu0 %vm1248_vm2, %v1271_v12  ;;  %v1272_v14 = vpack.c.bf16 %v1270_v11, %v1270_v11 }
 0x447   :  { %2959 = vmatpush3.bf16.xpose.msra.mxu0 %v1370_v13  ;;  %2960 = vmatprep.mubr.msk.bf16.mxu0 %vm3520_vm0, %v3519_v3 }
 0x448   :  { %2955 = vmatmul.mubr.msk.bf16.vlgmr.msra.gmra.mrb[16].mxu1 %vm1248_vm2, %v1272_v14  ;;  %2970 = vmatprep.subr.bf16.mxu0 %v3519_v3 }
 0x449   :  { %2965 = vmatpush3.bf16.xpose.msra.mxu1 %v1414_v15  ;;  %2966 = vmatprep.mubr.msk.bf16.mxu1 %vm3520_vm0, %v3519_v3 }
 0x44a   :  { %2976 = vmatprep.subr.bf16.mxu1 %v3519_v3 }
 0x44e   :  { %2961 = vmatmul.mubr.bf16.vlgmr.msra.gmra.mrb[20].mxu0 %v1368_v53 }
 0x44f   :  { %2971 = vmatpush3.bf16.msra.mxu0 %v1485_v34  ;;  %2972 = vmatprep.mubr.msk.bf16.mxu0 %vm3520_vm0, %v3519_v3 }
 0x450   :  { %2967 = vmatmul.mubr.bf16.vlgmr.msra.gmra.mrb[20].mxu1 %v1412_v16  ;;  %2982 = vmatprep.subr.bf16.mxu0 %v3519_v3 }
 0x451   :  { %2977 = vmatpush3.bf16.msra.mxu1 %v1532_v38  ;;  %2978 = vmatprep.mubr.msk.bf16.mxu1 %vm3520_vm0, %v3519_v3 }
 0x452   :  { %2988 = vmatprep.subr.bf16.mxu1 %v3519_v3 }
 0x519   :  { %v3860_v57 = vpop.f32.mrb[16].mxu0 }
 0x51a   :  { %v2950_v17 = vpop.f32.mrb[17].mxu0 }
 0x51b   :  { %v1317_v28 = vpop.f32.mrb[18].mxu0  ;;  %v3862_v18 = vpop.f32.mrb[16].mxu1 }
 0x51c   :  { %v2836_v32 = vpack.c.bf16 %v3862_v18, %v3860_v57  ;;  %v2951_v19 = vpop.f32.mrb[19].mxu0  ;;  %v2956_v20 = vpop.f32.mrb[17].mxu1 }
 0x51d   :  { %v1363_v6 = vpop.f32.mrb[18].mxu1 }
 0x51e   :  { %v2957_v21 = vpop.f32.mrb[19].mxu1 }
 0x521   :  { %v1406_v7 = vpop.f32.mrb[20].mxu0 }
 0x522   :  { %v2962_v8 = vpop.f32.mrb[21].mxu0  ;;  %v1456_v9 = vsel %vm1248_vm2, %v1406_v7, -inf }
 0x523   :  { %v1450_v22 = vpop.f32.mrb[20].mxu1  ;;  %1457 = vmax.xlane.f32.xlu0 %v1456_v9  ;;  %v1409_v23 = vpop.f32.mrb[22].mxu0 }
 0x524   :  { %v2963_v24 = vpop.f32.mrb[23].mxu0  ;;  %v2968_v25 = vpop.f32.mrb[21].mxu1  ;;  %v1459_v27 = vsel %vm1248_vm2, %v1450_v22, -inf }
 0x525   :  { %1460 = vmax.xlane.f32.xlu1 %v1459_v27  ;;  %v1453_v30 = vpop.f32.mrb[22].mxu1 }
 0x526   :  { %v2969_v31 = vpop.f32.mrb[23].mxu1 }
 0x5b0   :  { %v1458_v34 = vpop.xlane.xlu0 %1457 }
 0x5b1   :  { %v1462_v38 = vsub.f32 %v1406_v7, %v1458_v34 }
 0x5b2   :  { %v1461_v40 = vpop.xlane.xlu1 %1460 }
 0x5b3   :  { %v1464_v41 = vmul.f32 1.442695, %v1462_v38  ;;  %v1463_v42 = vsub.f32 %v1450_v22, %v1461_v40  ;;  %v1776_v40 = vrot.slane %v3799_v54, 4 }
 0x5b5   :  { %3291 = vpow2.f32 %v1464_v41  ;;  %v1466_v43 = vmul.f32 1.442695, %v1463_v42  ;;  %v1820_v42 = vrot.slane %v3803_v58, 4 }
 0x5b7   :  { %3293 = vpow2.f32 %v1466_v43  ;;  %v1818_v43 = vrot.slane %v3790_v33, 4 }
 0x5bf   :  { %v3292_v44 = vpop.eup %3291 }
 0x5c0   :  { %v1468_v45 = vsel %vm1248_vm2, %v3292_v44, 0.0 }
 0x5c1   :  { %v3294_v46 = vpop.eup %3293  ;;  %1469 = vadd.xlane.f32.xlu0 %v1468_v45 }
 0x5c2   :  { %v1471_v47 = vsel %vm1248_vm2, %v3294_v46, 0.0 }
 0x5c3   :  { %1472 = vadd.xlane.f32.xlu1 %v1471_v47 }
 0x64e   :  { %v1470_v48 = vpop.xlane.xlu0 %1469 }
 0x64f   :  { %3295 = vrcp.f32 %v1470_v48 }
 0x650   :  { %v1473_v49 = vpop.xlane.xlu1 %1472 }
 0x651   :  { %3297 = vrcp.f32 %v1473_v49 }
 0x659   :  { %v3296_v50 = vpop.eup %3295 }
 0x65a   :  { %v1476_v51 = vmul.f32 %v3296_v50, %v3292_v44 }
 0x65b   :  { %v3298_v37 = vpop.eup %3297 }
 0x65c   :  { %v1477_v52 = vmul.f32 %v3298_v37, %v3294_v46  ;;  %v1478_v55 = vpack.c.bf16 %v1476_v51, %v1476_v51 }
 0x65e   :  { %2973 = vmatmul.mubr.msk.bf16.vlgmr.msra.gmra.mrb[24].mxu0 %vm1248_vm2, %v1478_v55  ;;  %v1479_v56 = vpack.c.bf16 %v1477_v52, %v1477_v52 }
 0x65f   :  { %2983 = vmatpush3.bf16.xpose.msra.mxu0 %v3799_v54  ;;  %2984 = vmatprep.mubr.msk.bf16.mxu0 %vm3520_vm0, %v3519_v3  ;;  %v1774_v54 = vrot.slane %v3786_v29, 4 }
 0x660   :  { %2979 = vmatmul.mubr.msk.bf16.vlgmr.msra.gmra.mrb[24].mxu1 %vm1248_vm2, %v1479_v56  ;;  %2994 = vmatprep.subr.bf16.mxu0 %v3519_v3 }
 0x661   :  { %2989 = vmatpush3.bf16.xpose.msra.mxu1 %v3803_v58  ;;  %2990 = vmatprep.mubr.msk.bf16.mxu1 %vm3520_vm0, %v3519_v3 }
 0x662   :  { %3000 = vmatprep.subr.bf16.mxu1 %v3519_v3 }
 0x666   :  { %2985 = vmatmul.mubr.bf16.vlgmr.msra.gmra.mrb[28].mxu0 %v3786_v29 }
 0x667   :  { %2995 = vmatpush3.bf16.msra.mxu0 %v3822_v26  ;;  %2996 = vmatprep.mubr.msk.bf16.mxu0 %vm3520_vm0, %v3519_v3 }
 0x668   :  { %2991 = vmatmul.mubr.bf16.vlgmr.msra.gmra.mrb[28].mxu1 %v3790_v33  ;;  %3006 = vmatprep.subr.bf16.mxu0 %v3519_v3 }
 0x669   :  { %3001 = vmatpush3.bf16.msra.mxu1 %v3828_v35  ;;  %3002 = vmatprep.mubr.msk.bf16.mxu1 %vm3520_vm0, %v3519_v3 }
 0x66a   :  { %3012 = vmatprep.subr.bf16.mxu1 %v3519_v3 }
 0x731   :  { %v3890_v59 = vpop.f32.mrb[24].mxu0 }
 0x732   :  { %v2974_v60 = vpop.f32.mrb[25].mxu0 }
 0x733   :  { %v1524_v61 = vpop.f32.mrb[26].mxu0  ;;  %v3892_v62 = vpop.f32.mrb[24].mxu1 }
 0x734   :  { %v2837_v26 = vpack.c.bf16 %v3892_v62, %v3890_v59  ;;  %v2975_v0 = vpop.f32.mrb[27].mxu0  ;;  %v2980_v5 = vpop.f32.mrb[25].mxu1  ;;  %v3238_v59 = vld [vmem:[#allocation10 + $0x18] sm:$0xff]   ;;  %v3239_v62 = vld [vmem:[#allocation10 + $0x60] sm:$0xff]  }
 0x735   :  { %v1571_v1 = vpop.f32.mrb[26].mxu1 }
 0x736   :  { %v2981_v4 = vpop.f32.mrb[27].mxu1 }
 0x739   :  { %v1610_v10 = vpop.f32.mrb[28].mxu0 }
 0x73a   :  { %v2986_v35 = vpop.f32.mrb[29].mxu0  ;;  %v1656_v11 = vsel %vm1248_vm2, %v1610_v10, -inf }
 0x73b   :  { %v1650_v12 = vpop.f32.mrb[28].mxu1  ;;  %1657 = vmax.xlane.f32.xlu0 %v1656_v11  ;;  %v1613_v13 = vpop.f32.mrb[30].mxu0 }
 0x73c   :  { %v2987_v14 = vpop.f32.mrb[31].mxu0  ;;  %v2992_v15 = vpop.f32.mrb[29].mxu1  ;;  %v1659_v53 = vsel %vm1248_vm2, %v1650_v12, -inf }
 0x73d   :  { %1660 = vmax.xlane.f32.xlu1 %v1659_v53  ;;  %v1653_v16 = vpop.f32.mrb[30].mxu1  ;;  %v3231_v15 = vld [vmem:[#allocation10 + $0x40] sm:$0xff]  }
 0x73e   :  { %v2993_v17 = vpop.f32.mrb[31].mxu1  ;;  %v3247_v53 = vld [vmem:[#allocation10 + $0xc0] sm:$0xff]  }
 0x7c8   :  { %v1658_v28 = vpop.xlane.xlu0 %1657 }
 0x7c9   :  { %v1662_v19 = vsub.f32 %v1610_v10, %v1658_v28 }
 0x7ca   :  { %v1661_v20 = vpop.xlane.xlu1 %1660 }
 0x7cb   :  { %v1664_v6 = vmul.f32 1.442695, %v1662_v19  ;;  %v1663_v21 = vsub.f32 %v1650_v12, %v1661_v20 }
 0x7cd   :  { %3299 = vpow2.f32 %v1664_v6  ;;  %v1666_v7 = vmul.f32 1.442695, %v1663_v21  ;;  %v3232_v6 = vld [vmem:[#allocation10] sm:$0xff]  }
 0x7cf   :  { %3301 = vpow2.f32 %v1666_v7 }
 0x7d7   :  { %v3300_v8 = vpop.eup %3299 }
 0x7d8   :  { %v1668_v9 = vsel %vm1248_vm2, %v3300_v8, 0.0 }
 0x7d9   :  { %v3302_v22 = vpop.eup %3301  ;;  %1669 = vadd.xlane.f32.xlu0 %v1668_v9  ;;  %v3248_v9 = vld [vmem:[#allocation10 + $0x80] sm:$0xff]  }
 0x7da   :  { %v1671_v23 = vsel %vm1248_vm2, %v3302_v22, 0.0 }
 0x7db   :  { %1672 = vadd.xlane.f32.xlu1 %v1671_v23  ;;  %v3249_v23 = vld [vmem:[#allocation10 + $0xc8] sm:$0xff]  }
 0x866   :  { %v1670_v24 = vpop.xlane.xlu0 %1669 }
 0x867   :  { %3303 = vrcp.f32 %v1670_v24  ;;  %v3234_v24 = vld [vmem:[#allocation10 + $0x8] sm:$0xff]  }
 0x868   :  { %v1673_v25 = vpop.xlane.xlu1 %1672 }
 0x869   :  { %3305 = vrcp.f32 %v1673_v25  ;;  %v3235_v25 = vld [vmem:[#allocation10 + $0x50] sm:$0xff]  }
 0x871   :  { %v3304_v27 = vpop.eup %3303 }
 0x872   :  { %v1676_v30 = vmul.f32 %v3304_v27, %v3300_v8  ;;  %v3233_v8 = vld [vmem:[#allocation10 + $0x48] sm:$0xff]  }
 0x873   :  { %v3306_v31 = vpop.eup %3305  ;;  %v3250_v27 = vld [vmem:[#allocation10 + $0x88] sm:$0xff]  }
 0x874   :  { %v1677_v34 = vmul.f32 %v3306_v31, %v3302_v22  ;;  %v1678_v38 = vpack.c.bf16 %v1676_v30, %v1676_v30  ;;  %v3251_v30 = vld [vmem:[#allocation10 + $0xd0] sm:$0xff]  }
 0x875   :  { %v3236_v31 = vld [vmem:[#allocation10 + $0x10] sm:$0xff]  }
 0x876   :  { %2997 = vmatmul.mubr.msk.bf16.vlgmr.msra.gmra.mrb[32].mxu0 %vm1248_vm2, %v1678_v38  ;;  %v1679_v41 = vpack.c.bf16 %v1677_v34, %v1677_v34  ;;  %v3237_v34 = vld [vmem:[#allocation10 + $0x58] sm:$0xff]   ;;  %v3252_v38 = vld [vmem:[#allocation10 + $0x90] sm:$0xff]  }
 0x877   :  { %3007 = vmatpush3.bf16.xpose.msra.mxu0 %v1776_v40  ;;  %3008 = vmatprep.mubr.msk.bf16.mxu0 %vm3520_vm0, %v3519_v3  ;;  %v3253_v40 = vld [vmem:[#allocation10 + $0xd8] sm:$0xff]  }
 0x878   :  { %3003 = vmatmul.mubr.msk.bf16.vlgmr.msra.gmra.mrb[32].mxu1 %vm1248_vm2, %v1679_v41  ;;  %3018 = vmatprep.subr.bf16.mxu0 %v3519_v3  ;;  %v3255_v41 = vld [vmem:[#allocation10 + $0xe0] sm:$0xff]  }
 0x879   :  { %3013 = vmatpush3.bf16.xpose.msra.mxu1 %v1820_v42  ;;  %3014 = vmatprep.mubr.msk.bf16.mxu1 %vm3520_vm0, %v3519_v3  ;;  %v3240_v42 = vld [vmem:[#allocation10 + $0x20] sm:$0xff]  }
 0x87a   :  { %3024 = vmatprep.subr.bf16.mxu1 %v3519_v3 }
 0x87e   :  { %3009 = vmatmul.mubr.bf16.vlgmr.msra.gmra.mrb[36].mxu0 %v1774_v54  ;;  %v3241_v54 = vld [vmem:[#allocation10 + $0x68] sm:$0xff]  }
 0x87f   :  { %3019 = vmatpush3.bf16.msra.mxu0 %v3831_v36  ;;  %3020 = vmatprep.mubr.msk.bf16.mxu0 %vm3520_vm0, %v3519_v3 }
 0x880   :  { %3015 = vmatmul.mubr.bf16.vlgmr.msra.gmra.mrb[36].mxu1 %v1818_v43  ;;  %2872 = vmatprep.subr.bf16.mxu0 %v3231_v15  ;;  %v3256_v43 = vld [vmem:[#allocation10 + $0xa0] sm:$0xff]  }
 0x881   :  { %3025 = vmatpush3.bf16.msra.mxu1 %v3836_v39  ;;  %3026 = vmatprep.mubr.msk.bf16.mxu1 %vm3520_vm0, %v3519_v3 }
 0x882   :  { %2894 = vmatprep.subr.bf16.mxu1 %v3247_v53 }
 0x949   :  { %v3918_v58 = vpop.f32.mrb[32].mxu0 }
 0x94a   :  { %v2998_v44 = vpop.f32.mrb[33].mxu0 }
 0x94b   :  { %v1723_v45 = vpop.f32.mrb[34].mxu0  ;;  %v3920_v46 = vpop.f32.mrb[32].mxu1  ;;  %v3257_v44 = vld [vmem:[#allocation10 + $0xe8] sm:$0xff]  }
 0x94c   :  { %v2838_v29 = vpack.c.bf16 %v3920_v46, %v3918_v58  ;;  %v2999_v33 = vpop.f32.mrb[35].mxu0  ;;  %v3004_v36 = vpop.f32.mrb[33].mxu1  ;;  %v3242_v45 = vld [vmem:[#allocation10 + $0x28] sm:$0xff]  }
 0x94d   :  { %v1769_v47 = vpop.f32.mrb[34].mxu1  ;;  %v3243_v33 = vld [vmem:[#allocation10 + $0x70] sm:$0xff]   ;;  %v3258_v36 = vld [vmem:[#allocation10 + $0xa8] sm:$0xff]  }
 0x94e   :  { %v3005_v48 = vpop.f32.mrb[35].mxu1  ;;  %v3259_v47 = vld [vmem:[#allocation10 + $0xf0] sm:$0xff]  }
 0x94f   :  { %v3244_v48 = vld [vmem:[#allocation10 + $0x30] sm:$0xff]  }
 0x951   :  { %v1812_v49 = vpop.f32.mrb[36].mxu0 }
 0x952   :  { %v3010_v50 = vpop.f32.mrb[37].mxu0  ;;  %v1862_v39 = vsel %vm1248_vm2, %v1812_v49, -inf }
 0x953   :  { %v1856_v51 = vpop.f32.mrb[36].mxu1  ;;  %1863 = vmax.xlane.f32.xlu0 %v1862_v39  ;;  %v1815_v37 = vpop.f32.mrb[38].mxu0  ;;  %v3260_v50 = vld [vmem:[#allocation10 + $0xb0] sm:$0xff]   ;;  %v3246_v39 = vld [vmem:[#allocation10 + $0x38] sm:$0xff]  }
 0x954   :  { %v3011_v52 = vpop.f32.mrb[39].mxu0  ;;  %v3016_v55 = vpop.f32.mrb[37].mxu1  ;;  %v1865_v56 = vsel %vm1248_vm2, %v1856_v51, -inf  ;;  %v3262_v37 = vld [vmem:[#allocation10 + $0xb8] sm:$0xff]  }
 0x955   :  { %1866 = vmax.xlane.f32.xlu1 %v1865_v56  ;;  %v1859_v60 = vpop.f32.mrb[38].mxu1 }
 0x956   :  { %v3017_v61 = vpop.f32.mrb[39].mxu1 }
 0x9e0   :  { %v1864_v0 = vpop.xlane.xlu0 %1863 }
 0x9e1   :  { %v1868_v5 = vsub.f32 %v1812_v49, %v1864_v0  ;;  %v3245_v49 = vld [vmem:[#allocation10 + $0x78] sm:$0xff]  }
 0x9e2   :  { %v1867_v1 = vpop.xlane.xlu1 %1866 }
 0x9e3   :  { %v1870_v4 = vmul.f32 1.442695, %v1868_v5  ;;  %v1869_v10 = vsub.f32 %v1856_v51, %v1867_v1  ;;  %v3261_v51 = vld [vmem:[#allocation10 + $0xf8] sm:$0xff]  }
 0x9e5   :  { %3307 = vpow2.f32 %v1870_v4  ;;  %v1872_v35 = vmul.f32 1.442695, %v1869_v10 }
 0x9e7   :  { %3309 = vpow2.f32 %v1872_v35 }
 0x9ef   :  { %v3308_v11 = vpop.eup %3307 }
 0x9f0   :  { %v1874_v12 = vsel %vm1248_vm2, %v3308_v11, 0.0 }
 0x9f1   :  { %v3310_v13 = vpop.eup %3309  ;;  %1875 = vadd.xlane.f32.xlu0 %v1874_v12  ;;  %v2767_v12 = vld [vmem:[%s4013_s10] ss:$0 sm:$0xff] }
 0x9f2   :  { %v1877_v14 = vsel %vm1248_vm2, %v3310_v13, 0.0 }
 0x9f3   :  { %1878 = vadd.xlane.f32.xlu1 %v1877_v14 }
 0xa7e   :  { %v1876_v16 = vpop.xlane.xlu0 %1875 }
 0xa7f   :  { %3311 = vrcp.f32 %v1876_v16 }
 0xa80   :  { %v1879_v17 = vpop.xlane.xlu1 %1878 }
 0xa81   :  { %3313 = vrcp.f32 %v1879_v17 }
 0xa89   :  { %v3312_v28 = vpop.eup %3311 }
 0xa8a   :  { %v1882_v19 = vmul.f32 %v3312_v28, %v3308_v11 }
 0xa8b   :  { %v3314_v20 = vpop.eup %3313 }
 0xa8c   :  { %v1883_v21 = vmul.f32 %v3314_v20, %v3310_v13  ;;  %v1884_v7 = vpack.c.bf16 %v1882_v19, %v1882_v19 }
 0xa8e   :  { %3021 = vmatmul.mubr.msk.bf16.vlgmr.msra.gmra.mrb[40].mxu0 %vm1248_vm2, %v1884_v7  ;;  %v1885_v22 = vpack.c.bf16 %v1883_v21, %v1883_v21  ;;  %v3263_v7 = vld [vmem:[#allocation11] sm:$0xff]  }
 0xa8f   :  { %2873 = vmatpush3.bf16.msra.mxu0 %v3232_v6  ;;  %2301 = vmatprep.mubr.bf16.mxu0 %v2837_v26  ;;  %v3254_v26 = vld [vmem:[#allocation10 + $0x98] sm:$0xff]  }
 0xa90   :  { %3027 = vmatmul.mubr.msk.bf16.vlgmr.msra.gmra.mrb[40].mxu1 %vm1248_vm2, %v1885_v22  ;;  %2874 = vmatprep.subr.bf16.mxu0 %v3233_v8  ;;  %v3266_v8 = vld [vmem:[#allocation11 + $0x18] sm:$0xff]   ;;  %v3268_v22 = vld [vmem:[#allocation11 + $0x28] sm:$0xff]  }
 0xa91   :  { %2895 = vmatpush3.bf16.msra.mxu1 %v3248_v9  ;;  %v3267_v9 = vld [vmem:[#allocation11 + $0x20] sm:$0xff]  }
 0xa92   :  { %2896 = vmatprep.subr.bf16.mxu1 %v3249_v23  ;;  %v3269_v23 = vld [vmem:[#allocation11 + $0x30] sm:$0xff]  }
 0xa93   :  { %2875 = vmatpush3.bf16.msra.mxu0 %v3234_v24  ;;  %v3270_v24 = vld [vmem:[#allocation11 + $0x38] sm:$0xff]  }
 0xa94   :  { %2876 = vmatprep.subr.bf16.mxu0 %v3235_v25  ;;  %v3271_v25 = vld [vmem:[#allocation13] sm:$0xff]  }
 0xa95   :  { %2897 = vmatpush3.bf16.msra.mxu1 %v3250_v27  ;;  %v3272_v27 = vld [vmem:[#allocation13 + $0x8] sm:$0xff]  }
 0xa96   :  { %2898 = vmatprep.subr.bf16.mxu1 %v3251_v30  ;;  %v3273_v30 = vld [vmem:[#allocation13 + $0x10] sm:$0xff]  }
 0xa97   :  { %2877 = vmatpush3.bf16.msra.mxu0 %v3236_v31  ;;  %v3274_v31 = vld [vmem:[#allocation13 + $0x18] sm:$0xff]  }
 0xa98   :  { %2878 = vmatprep.subr.bf16.mxu0 %v3237_v34  ;;  %v3275_v34 = vld [vmem:[#allocation13 + $0x20] sm:$0xff]  }
 0xa99   :  { %2899 = vmatpush3.bf16.msra.mxu1 %v3252_v38  ;;  %v3276_v38 = vld [vmem:[#allocation13 + $0x28] sm:$0xff]  }
 0xa9a   :  { %2900 = vmatprep.subr.bf16.mxu1 %v3253_v40 }
 0xa9b   :  { %2879 = vmatpush3.bf16.msra.mxu0 %v3238_v59 }
 0xa9c   :  { %2880 = vmatprep.subr.bf16.mxu0 %v3239_v62 }
 0xa9d   :  { %2901 = vmatpush3.bf16.msra.mxu1 %v3254_v26 }
 0xa9e   :  { %2902 = vmatprep.subr.bf16.mxu1 %v3255_v41 }
 0xa9f   :  { %2881 = vmatpush3.bf16.msra.mxu0 %v3240_v42 }
 0xaa0   :  { %2882 = vmatprep.subr.bf16.mxu0 %v3241_v54 }
 0xaa1   :  { %2903 = vmatpush3.bf16.msra.mxu1 %v3256_v43 }
 0xaa2   :  { %2904 = vmatprep.subr.bf16.mxu1 %v3257_v44 }
 0xaa3   :  { %2883 = vmatpush3.bf16.msra.mxu0 %v3242_v45 }
 0xaa4   :  { %2884 = vmatprep.subr.bf16.mxu0 %v3243_v33 }
 0xaa5   :  { %2905 = vmatpush3.bf16.msra.mxu1 %v3258_v36 }
 0xaa6   :  { %2906 = vmatprep.subr.bf16.mxu1 %v3259_v47 }
 0xaa7   :  { %2885 = vmatpush3.bf16.msra.mxu0 %v3244_v48 }
 0xaa8   :  { %2886 = vmatprep.subr.bf16.mxu0 %v3245_v49 }
 0xaa9   :  { %2907 = vmatpush3.bf16.msra.mxu1 %v3260_v50 }
 0xaaa   :  { %2908 = vmatprep.subr.bf16.mxu1 %v3261_v51 }
 0xaab   :  { %2887 = vmatpush3.bf16.msra.mxu0 %v3246_v39  ;;  %v2804_v39 = vld [vmem:[%s4014_s11] ss:$0 sm:$0xff] }
 0xaac   :  { %3030 = vmatprep.subr.bf16.mxu0 %v3519_v3 }
 0xaad   :  { %2909 = vmatpush3.bf16.msra.mxu1 %v3262_v37 }
 0xaae   :  { %2302 = vmatmul.mubr.bf16.vlgmr.msra.gmra.mrb[44].mxu0 %v2836_v32  ;;  %3050 = vmatprep.subr.bf16.mxu1 %v3519_v3 }
 0xaaf   :  { %3046 = vmatprep.mubr.msk.bf16.mxu0 %vm3520_vm0, %v3519_v3  ;;  %3031 = vmatpush3.bf16.msra.mxu0 %v3263_v7 }
 0xab0   :  { %3032 = vmatprep.subr.bf16.mxu0 %v3519_v3 }
 0xb61   :  { %v1927_v52 = vpop.f32.mrb[40].mxu0 }
 0xb62   :  { %v3022_v55 = vpop.f32.mrb[41].mxu0 }
 0xb63   :  { %v1930_v56 = vpop.f32.mrb[42].mxu0  ;;  %v1974_v60 = vpop.f32.mrb[40].mxu1 }
 0xb64   :  { %v2839_v61 = vpack.c.bf16 %v1974_v60, %v1927_v52  ;;  %v3023_v0 = vpop.f32.mrb[43].mxu0  ;;  %v3028_v5 = vpop.f32.mrb[41].mxu1  ;;  %v2805_v60 = vld [vmem:[%s4015_s12] ss:$0 sm:$0xff] }
 0xb65   :  { %v1977_v1 = vpop.f32.mrb[42].mxu1 }
 0xb66   :  { %v3029_v4 = vpop.f32.mrb[43].mxu1  ;;  %2342 = vmatprep.mubr.bf16.mxu1 %v2839_v61 }
 0xb67   :  { %2343 = vmatmul.mubr.bf16.vlgmr.msra.gmra.mrb[44].mxu1 %v2838_v29  ;;  %v3277_v4 = vld [vmem:[#allocation13 + $0x30] sm:$0xff]  }
 0xb68   :  { %3066 = vmatprep.mubr.msk.bf16.mxu1 %vm3520_vm0, %v3519_v3  ;;  %3051 = vmatpush3.bf16.msra.mxu1 %v3271_v25 }
 0xb69   :  { %3052 = vmatprep.subr.bf16.mxu1 %v3519_v3 }
 0xb6c   :  { %3053 = vmatpush3.bf16.msra.mxu1 %v3272_v27 }
 0xb6d   :  { %3054 = vmatprep.subr.bf16.mxu1 %v3519_v3 }
 0xb70   :  { %3055 = vmatpush3.bf16.msra.mxu1 %v3273_v30 }
 0xb71   :  { %3056 = vmatprep.subr.bf16.mxu1 %v3519_v3 }
 0xb74   :  { %3057 = vmatpush3.bf16.msra.mxu1 %v3274_v31 }
 0xb75   :  { %3058 = vmatprep.subr.bf16.mxu1 %v3519_v3 }
 0xb78   :  { %3059 = vmatpush3.bf16.msra.mxu1 %v3275_v34 }
 0xb79   :  { %3060 = vmatprep.subr.bf16.mxu1 %v3519_v3 }
 0xb7c   :  { %3061 = vmatpush3.bf16.msra.mxu1 %v3276_v38 }
 0xb7d   :  { %3062 = vmatprep.subr.bf16.mxu1 %v3519_v3 }
 0xb80   :  { %3063 = vmatpush3.bf16.msra.mxu1 %v3277_v4 }
 0xb81   :  { %v2888_v57 = vpop.f32.mrb[44].mxu0  ;;  %3064 = vmatprep.subr.bf16.mxu1 %v3519_v3 }
 0xb82   :  { %v2889_v18 = vpop.f32.mrb[45].mxu0 }
 0xb83   :  { %v2890_v32 = vadd.f32 %v2889_v18, %v2888_v57  ;;  %v2891_v10 = vpop.f32.mrb[46].mxu0  ;;  %v3278_v57 = vld [vmem:[#allocation13 + $0x38] sm:$0xff]   ;;  %v2806_v18 = vld [vmem:[%s4017_s14] ss:$0 sm:$0xff]  ;;  %s2634_s14 = sshll.u32 %s3521_s3, 4  ;;  %s2635_s14 = int_to_ptr.vmem [resolvable:$true] %s2634_s14 }
 0xb84   :  { %v2892_v35 = vpop.f32.mrb[47].mxu0  ;;  %3065 = vmatpush3.bf16.msra.mxu1 %v3278_v57  ;;  %s3473_s29 = scalar_lea.vmem %s2635_s14, 256  ;;  %p3478_p1 = scmp.lt.s32.totalorder %s2635_s14, %s2635_s14 }
 0xb85   :  { %v2893_v11 = vadd.f32 %v2892_v35, %v2891_v10  ;;  %v2304_v15 = vadd.f32 %v2890_v32, %v2767_v12  ;;  %p3474_p0 = scmp.ne.s32.totalorder %s2635_s14, %s3473_s29  ;;  %p3479_p2 = scmp.lt.s32.totalorder %s3473_s29, %s3473_s29 }
 0xb87   :  { %v2307_v46 = vadd.f32 %v2893_v11, %v2767_v12  ;;  %p3480_p3 = por %p3479_p2, %p3478_p1 }
 0xb89   :  { %p3481_p4 = pnand %p3480_p3, %p3474_p0 }
 0xc3a   :  { %v2910_v13 = vpop.f32.mrb[44].mxu1 }
 0xc3b   :  { %v2911_v14 = vpop.f32.mrb[45].mxu1 }
 0xc3c   :  { %v2912_v53 = vadd.f32 %v2911_v14, %v2910_v13  ;;  %v2913_v16 = vpop.f32.mrb[46].mxu1 }
 0xc3d   :  { %v2914_v58 = vpop.f32.mrb[47].mxu1 }
 0xc3e   :  { %v2345_v29 = vadd.f32 %v2912_v53, %v2304_v15  ;;  %v2915_v17 = vadd.f32 %v2914_v58, %v2913_v16 }
 0xc40   :  { %v2348_v28 = vadd.f32 %v2915_v17, %v2307_v46  ;;  %v3949_v19 = vadd.f32 %v2345_v29, %v3751_v63  ;;  %v3264_v63 = vld [vmem:[#allocation11 + $0x8] sm:$0xff]  }
 0xc41   :  { %3033 = vmatpush3.bf16.msra.mxu0 %v3264_v63 }
 0xc42   :  { %2355 = vadd.xlane.f32.xlu0 %v3949_v19  ;;  %v3953_v20 = vadd.f32 %v2348_v28, %v3753_v2  ;;  %v2361_v6 = vmul.f32 %v3949_v19, %v3949_v19  ;;  %3034 = vmatprep.subr.bf16.mxu0 %v3519_v3  ;;  %v3265_v2 = vld [vmem:[#allocation11 + $0x10] sm:$0xff]  }
 0xc44   :  { %2357 = vadd.xlane.f32.xlu1 %v3953_v20  ;;  %v2362_v21 = vmul.f32 %v3953_v20, %v3953_v20 }
 0xc45   :  { %3035 = vmatpush3.bf16.msra.mxu0 %v3265_v2 }
 0xc46   :  { %2363 = vadd.xlane.f32.xlu0 %v2361_v6  ;;  %3036 = vmatprep.subr.bf16.mxu0 %v3519_v3 }
 0xc48   :  { %2365 = vadd.xlane.f32.xlu1 %v2362_v21 }
 0xc49   :  { %3037 = vmatpush3.bf16.msra.mxu0 %v3266_v8 }
 0xc4a   :  { %3038 = vmatprep.subr.bf16.mxu0 %v3519_v3 }
 0xc4d   :  { %3039 = vmatpush3.bf16.msra.mxu0 %v3267_v9 }
 0xc4e   :  { %3040 = vmatprep.subr.bf16.mxu0 %v3519_v3 }
 0xc51   :  { %3041 = vmatpush3.bf16.msra.mxu0 %v3268_v22 }
 0xc52   :  { %3042 = vmatprep.subr.bf16.mxu0 %v3519_v3 }
 0xc55   :  { %3043 = vmatpush3.bf16.msra.mxu0 %v3269_v23 }
 0xc56   :  { %3044 = vmatprep.subr.bf16.mxu0 %v3519_v3  ;;  %v2815_v3 = vld [vmem:[%s4019_s16] ss:$0 sm:$0xff] }
 0xc59   :  { %3045 = vmatpush3.bf16.msra.mxu0 %v3270_v24 }
 0xccf   :  { %v2356_v40 = vpop.xlane.xlu0 %2355 }
 0xcd0   :  { %v2359_v59 = vmul.f32 0.03125, %v2356_v40 }
 0xcd1   :  { %v2358_v62 = vpop.xlane.xlu1 %2357 }
 0xcd2   :  { %v2360_v26 = vmul.f32 0.03125, %v2358_v62  ;;  %v2369_v42 = vmul.f32 %v2359_v59, %v2359_v59  ;;  %v2373_v49 = vsub.f32 %v3949_v19, %v2359_v59 }
 0xcd3   :  { %v2364_v41 = vpop.xlane.xlu0 %2363 }
 0xcd4   :  { %v2367_v54 = vmul.f32 0.03125, %v2364_v41  ;;  %v2370_v44 = vmul.f32 %v2360_v26, %v2360_v26  ;;  %v2374_v51 = vsub.f32 %v3953_v20, %v2360_v26 }
 0xcd5   :  { %v2366_v43 = vpop.xlane.xlu1 %2365 }
 0xcd6   :  { %v2371_v45 = vsub.f32 %v2367_v54, %v2369_v42  ;;  %v2368_v33 = vmul.f32 0.03125, %v2366_v43 }
 0xcd8   :  { %v2375_v36 = vadd.f32 1e-05, %v2371_v45  ;;  %v2372_v47 = vsub.f32 %v2368_v33, %v2370_v44 }
 0xcda   :  { %3315 = vrsqrt.f32 %v2375_v36  ;;  %v2376_v48 = vadd.f32 1e-05, %v2372_v47 }
 0xcdc   :  { %3317 = vrsqrt.f32 %v2376_v48 }
 0xce4   :  { %v3316_v50 = vpop.eup %3315 }
 0xce5   :  { %v2379_v37 = vmul.f32 %v3316_v50, %v2373_v49 }
 0xce6   :  { %v3318_v52 = vpop.eup %3317 }
 0xce7   :  { %v2380_v55 = vmul.f32 %v3318_v52, %v2374_v51  ;;  %v2387_v56 = vmul.f32 %v2804_v39, %v2379_v37 }
 0xce9   :  { %v2388_v61 = vmul.f32 %v2804_v39, %v2380_v55  ;;  %v2395_v0 = vadd.f32 %v2805_v60, %v2387_v56 }
 0xceb   :  { %v2396_v5 = vadd.f32 %v2805_v60, %v2388_v61 }
 0xced   :  { %v2397_v1 = vpack.c.bf16 %v2396_v5, %v2395_v0 }
 0xcef   :  { %3047 = vmatmul.mubr.bf16.vlgmr.msra.gmra.mrb[48].mxu0 %v2397_v1 }
 0xdc2   :  { %v2503_v32 = vpop.f32.mrb[48].mxu0 }
 0xdc3   :  { %v2504_v10 = vadd.f32 %v2806_v18, %v2503_v32  ;;  %v3048_v35 = vpop.f32.mrb[49].mxu0 }
 0xdc4   :  { %v2506_v11 = vpop.f32.mrb[50].mxu0 }
 0xdc5   :  { %v2507_v12 = vadd.f32 %v2806_v18, %v2506_v11  ;;  %v3049_v13 = vpop.f32.mrb[51].mxu0  ;;  %v2510_v14 = vmax.f32 %v2504_v10, 0.0 }
 0xdc7   :  { %v2511_v15 = vmax.f32 %v2507_v12, 0.0 }
 0xdc9   :  { %v2512_v53 = vpack.c.bf16 %v2511_v15, %v2510_v14 }
 0xdcb   :  { %3067 = vmatmul.mubr.bf16.vlgmr.msra.gmra.mrb[48].mxu1 %v2512_v53 }
 0xe9e   :  { %v2618_v16 = vpop.f32.mrb[48].mxu1 }
 0xe9f   :  { %v2619_v58 = vadd.f32 %v2815_v3, %v2618_v16  ;;  %v3068_v46 = vpop.f32.mrb[49].mxu1 }
 0xea0   :  { %v2621_v29 = vpop.f32.mrb[50].mxu1 }
 0xea1   :  { %v2625_v17 = vadd.f32 %v2619_v58, %v2395_v0  ;;  %v2622_v28 = vadd.f32 %v2815_v3, %v2621_v29  ;;  %v3069_v19 = vpop.f32.mrb[51].mxu1 }
 0xea3   :  { %2627 = vst [vmem:[#allocation14] sm:$0xff] %v2625_v17  ;;  %v2626_v20 = vadd.f32 %v2622_v28, %v2396_v5 }
 0xea5   :  { %2628 = vst [vmem:[#allocation14 + $0x8] sm:$0xff] %v2626_v20 }
 0xea6   :  { %3484 = shalt.err (!%p3481_p4)
}
 0xea7   :  { %s3485_s9 = scalar_lea.hbm %s4020_s17, 256 }
 0xea8   :  { %p3486_p5 = scmp.ne.s32.totalorder %s4020_s17, %s3485_s9  ;;  %p3489_p6 = scmp.lt.u32.totalorder %s3485_s9, %s4020_s17 }
 0xeaa   :  { %p3491_p7 = pnand %p3489_p6, %p3486_p5 }
 0xeac   :  { %3494 = shalt.err (!%p3491_p7)
}
 0xead   :  { %2640 = dma.vmem_to_hbm [thread:$0]  %s2635_s14, 256, %s4020_s17, [#allocation4], %s3513_s13, %s3513_s13, %s3514_s22  }
 0xeae   :  { %3503 = dma.done.wait [#allocation4], 256  }
 0xeaf   :  { %3504 = vsyncadd [#allocation4], 4294967040 }
 0xeb0   :  { %2644 = vsyncpa [#allocation3], 1 }
 0xeb1   :  { %2645 = vsyncpa [#allocation6], 1 }
 0xeb2   :  { %2646 = vsyncpa [#allocation9], 1 }
 0xeb3   :  { %2647 = vsyncpa [#allocation12], 1 }
 0xeb4   :  { %2648 = vsyncpa [#allocation4], 1 }

</bundles_post_ra>
